<compile_context>
chip_gen: v5e
topology: v5e:2x2
jax: 0.10.0
libtpu: 0.0.40
codegen_flags: <defaults>
</compile_context>

<pallas_src>
import functools

import jax
import jax.numpy as jnp
from jax.experimental import pallas as pl
from jax.experimental.pallas import tpu as pltpu

K1 = 5      # conv1 kernel size (padding=2)
K2 = 3      # conv2 kernel size (padding=1)
K1P = 8     # conv1 taps zero-padded to a sublane multiple
NCP = 128   # lane-dense padded logits width


def cnn_kernel(xcol_ref, w1_ref, c1b_ref, w2_ref, c2b_ref, fcw_ref, fcb_ref,
               out_ref, *, L):
    TB, Lh, _ = xcol_ref.shape            # Lh = L + 2 halo rows, rounded up to 16 sublanes
    C1 = w1_ref.shape[1]                  # 64
    C2 = w2_ref.shape[1]                  # 128

    # ---- conv1 (+ folded bias/BN): one bf16 MXU matmul over the halo-extended im2col ----
    xcol = xcol_ref[...].reshape(TB * Lh, K1P)                   # bf16 (TB*Lh, 8)
    h1 = jnp.dot(xcol, w1_ref[...], preferred_element_type=jnp.float32)
    h1 = h1.reshape(TB, Lh, C1)                                  # f32
    # conv2 zero-pads h1: the halo rows (positions -1 and L) and alignment-pad rows must be
    # exactly zero (not ReLU(bias)), so mask while applying bias+ReLU; drop to bf16 so the
    # copy-heavy conv2-LHS build below moves half the bytes.
    pos = jax.lax.broadcasted_iota(jnp.int32, (1, Lh, 1), 1)
    valid = (pos >= 1) & (pos <= L)
    h1 = jnp.where(valid, jnp.maximum(h1 + c1b_ref[...], 0.0),
                   0.0).astype(jnp.bfloat16)                     # (TB, Lh, C1) bf16

    # ---- conv2 im2col: three static shifted views + one channel concat (all bf16) ----
    xcat = jnp.concatenate(
        [h1[:, 0:L, :], h1[:, 1:L + 1, :], h1[:, 2:L + 2, :]], axis=-1)
    xcat = xcat.reshape(TB * L, K2 * C1)                         # (TB*L, 192) bf16

    # ---- conv2 (+ folded bias/BN): single fused K=192 bf16 matmul, f32 accumulation ----
    h2 = jnp.dot(xcat, w2_ref[...], preferred_element_type=jnp.float32)
    h2 = jnp.maximum(h2 + c2b_ref[...], 0.0)                     # (TB*L, C2) f32
    h2 = h2.reshape(TB, L, C2)

    # ---- AdaptiveMaxPool1d(1) over L ----
    pooled = jnp.max(h2, axis=1)                                 # (TB, C2) f32

    # ---- Dropout(0.5): eval-mode identity (omitted) ----
    # ---- fc: bf16 matmul, f32 accumulation, lane-dense padded output ----
    logits = jnp.dot(pooled.astype(jnp.bfloat16), fcw_ref[...],
                     preferred_element_type=jnp.float32) + fcb_ref[...]
    out_ref[...] = logits.astype(out_ref.dtype)


def cnn_forward(x, params, *, tb=64):
    """x: (B, L) float32 -> logits (B, num_classes)."""
    B, L = x.shape
    (w1, b1, s1, t1, w2, b2, s2, t2, fcw, fcb) = params
    C1 = w1.shape[1]
    C2 = w2.shape[2]
    NC = fcw.shape[1]

    # ---- host-side folding of conv bias + BatchNorm(eval) into the conv weights ----
    w1f = w1 * s1                               # (K1, C1)
    c1b = b1 * s1 + t1                          # (1, C1)
    w2f = w2 * s2.reshape(1, 1, C2)             # (K2, C1, C2)
    c2b = b2 * s2 + t2                          # (1, C2)

    w1p = jnp.zeros((K1P, C1), jnp.float32).at[:K1].set(w1f).astype(jnp.bfloat16)
    w2cat = w2f.reshape(K2 * C1, C2).astype(jnp.bfloat16)        # fused K=192 weight
    fcwp = jnp.zeros((C2, NCP), jnp.float32).at[:, :NC].set(fcw).astype(jnp.bfloat16)
    fcbp = jnp.zeros((1, NCP), jnp.float32).at[:, :NC].set(fcb)

    # ---- host-side halo-extended im2col (bf16, layout plumbing only) ----
    # Emit L+2 conv1 positions (one conv2-halo row each side), rounded up to 16 sublanes so
    # the in-kernel (TB, Lh, 8) -> (TB*Lh, 8) collapse stays tile-aligned for bf16.
    Lh = ((L + 2 + 15) // 16) * 16
    pad_lo = K1 // 2 + 1                                          # conv1 pad + 1 halo row
    xpad = jnp.pad(x, ((0, 0), (pad_lo, pad_lo + (Lh - (L + 2)))))
    xcol = jnp.stack([xpad[:, k:k + Lh] for k in range(K1)], axis=-1)   # (B, Lh, 5)
    xcol = jnp.pad(xcol, ((0, 0), (0, 0), (0, K1P - K1))).astype(jnp.bfloat16)
    # NOTE: the minor dim of 8 still pads to 128 lanes in VMEM; bf16 halves that cost.
    # TODO(synk): if this becomes the VMEM limiter at very large batch tiles, compute conv1
    # from a lane-dense (tb, L) input with 5 shifted VPU FMAs instead of the im2col matmul.

    # ---- batch tile: multiple of 8; keep >= 2 grid steps when the batch allows (v7x 2 TCs) ----
    b8 = ((B + 7) // 8) * 8
    tbe = max(8, (min(tb, b8) // 8) * 8)
    if b8 // tbe < 2 and b8 >= 16:
        tbe = max(8, ((b8 // 2) // 8) * 8)
    Bp = ((B + tbe - 1) // tbe) * tbe
    if Bp != B:
        xcol = jnp.pad(xcol, ((0, Bp - B), (0, 0), (0, 0)))

    out = pl.pallas_call(
        functools.partial(cnn_kernel, L=L),
        out_shape=jax.ShapeDtypeStruct((Bp, NCP), jnp.float32),
        grid_spec=pltpu.PrefetchScalarGridSpec(
            num_scalar_prefetch=0,
            grid=(Bp // tbe,),
            in_specs=[
                pl.BlockSpec((tbe, Lh, K1P), lambda i: (i, 0, 0)),   # batch-tiled input
                pl.BlockSpec((K1P, C1), lambda i: (0, 0)),
                pl.BlockSpec((1, C1), lambda i: (0, 0)),
                pl.BlockSpec((K2 * C1, C2), lambda i: (0, 0)),
                pl.BlockSpec((1, C2), lambda i: (0, 0)),
                pl.BlockSpec((C2, NCP), lambda i: (0, 0)),
                pl.BlockSpec((1, NCP), lambda i: (0, 0)),
            ],
            out_specs=pl.BlockSpec((tbe, NCP), lambda i: (i, 0)),
        ),
        compiler_params=pltpu.CompilerParams(
            dimension_semantics=("parallel",),
            # 64 MiB fits v7x physical VMEM and lifts the scoped default on v5e/v6e.
            vmem_limit_bytes=64 * 1024 * 1024),
    )(xcol, w1p, c1b, w2cat, c2b, fcwp, fcbp)

    return out[:B, :NC]


def reference_forward(x, params):
    """Pure-JAX (f32) reference of the PyTorch module in eval mode."""
    (w1, b1, s1, t1, w2, b2, s2, t2, fcw, fcb) = params
    B, L = x.shape
    C1, C2 = w1.shape[1], w2.shape[2]
    xpad = jnp.pad(x, ((0, 0), (K1 // 2, K1 // 2)))
    h1 = jnp.zeros((B, L, C1), jnp.float32)
    for k in range(K1):
        h1 = h1 + xpad[:, k:k + L][:, :, None] * w1[k][None, None, :]
    h1 = jnp.maximum((h1 + b1) * s1 + t1, 0.0)
    h1p = jnp.pad(h1, ((0, 0), (1, 1), (0, 0)))
    h2 = jnp.zeros((B, L, C2), jnp.float32)
    for k in range(K2):
        h2 = h2 + jnp.einsum('blc,cd->bld', h1p[:, k:k + L, :], w2[k])
    h2 = jnp.maximum((h2 + b2) * s2 + t2, 0.0)
    pooled = h2.max(axis=1)
    return pooled @ fcw + fcb


def init_params(key, num_classes=2, c1=64, c2=128, eps=1e-5):
    ks = jax.random.split(key, 12)
    # conv1: torch weight (64, 1, 5) -> stored transposed as (5, 64)
    w1 = 0.1 * jax.random.normal(ks[0], (K1, c1), jnp.float32)
    b1 = 0.1 * jax.random.normal(ks[1], (1, c1), jnp.float32)
    # bn1 (inference): fold gamma/beta/mean/var into scale & shift
    g1 = 1.0 + 0.1 * jax.random.normal(ks[2], (c1,), jnp.float32)
    be1 = 0.1 * jax.random.normal(ks[3], (c1,), jnp.float32)
    m1 = 0.1 * jax.random.normal(ks[4], (c1,), jnp.float32)
    v1 = jax.random.uniform(ks[5], (c1,), jnp.float32, 0.5, 1.5)
    s1 = (g1 / jnp.sqrt(v1 + eps)).reshape(1, c1)
    t1 = (be1 - m1 * g1 / jnp.sqrt(v1 + eps)).reshape(1, c1)
    # conv2: torch weight (128, 64, 3) -> stored as (3, 64, 128)
    w2 = 0.05 * jax.random.normal(ks[6], (K2, c1, c2), jnp.float32)
    b2 = 0.1 * jax.random.normal(ks[7], (1, c2), jnp.float32)
    g2 = 1.0 + 0.1 * jax.random.normal(ks[8], (c2,), jnp.float32)
    be2 = 0.1 * jax.random.normal(ks[9], (c2,), jnp.float32)
    m2 = 0.1 * jax.random.normal(ks[10], (c2,), jnp.float32)
    v2 = jax.random.uniform(ks[11], (c2,), jnp.float32, 0.5, 1.5)
    s2 = (g2 / jnp.sqrt(v2 + eps)).reshape(1, c2)
    t2 = (be2 - m2 * g2 / jnp.sqrt(v2 + eps)).reshape(1, c2)
    # fc: torch weight (2, 128) -> stored transposed as (128, 2)
    kf1, kf2 = jax.random.split(jax.random.fold_in(key, 99))
    fcw = 0.1 * jax.random.normal(kf1, (c2, num_classes), jnp.float32)
    fcb = 0.1 * jax.random.normal(kf2, (1, num_classes), jnp.float32)
    return (w1, b1, s1, t1, w2, b2, s2, t2, fcw, fcb)


if __name__ == "__main__":
    key = jax.random.PRNGKey(0)
    kx, kp = jax.random.split(key)
    B, L = 16, 128                      # small shapes (module default L is 768)
    x = jax.random.normal(kx, (B, L), jnp.float32)
    params = init_params(kp, num_classes=2)

    out = cnn_forward(x, params)        # effective batch tile 8 -> grid of 2 pipelined tiles
    out = jax.block_until_ready(out)
    assert out.shape == (B, 2) and bool(jnp.isfinite(out).all())

    ref = reference_forward(x, params)
    assert bool(jnp.allclose(out, ref, rtol=0.1, atol=0.1)), "mismatch vs f32 reference"
    print("KERNEL_OK")
</pallas_src>

<mosaic_0001>
module attributes {stable_mosaic.version = 11 : i64} {
  func.func @cnn_kernel(%arg0: i32, %arg1: memref<8x144x8xbf16, #tpu.memory_space<vmem>>, %arg2: memref<8x64xbf16, #tpu.memory_space<vmem>>, %arg3: memref<1x64xf32, #tpu.memory_space<vmem>>, %arg4: memref<192x128xbf16, #tpu.memory_space<vmem>>, %arg5: memref<1x128xf32, #tpu.memory_space<vmem>>, %arg6: memref<128x128xbf16, #tpu.memory_space<vmem>>, %arg7: memref<1x128xf32, #tpu.memory_space<vmem>>, %arg8: memref<8x128xf32, #tpu.memory_space<vmem>>) attributes {dimension_semantics = [#tpu.dimension_semantics<parallel>], iteration_bounds = array<i64: 2>, scalar_prefetch = 0 : i64, scratch_operands = 0 : i64, tpu.core_type = #tpu.core_type<tc>, window_params = [{transform_indices = @transform_0, window_bounds = array<i64: 8, 144, 8>}, {pipeline_mode = #tpu.pipeline_mode<synchronous>, transform_indices = @transform_1, window_bounds = array<i64: 8, 64>}, {pipeline_mode = #tpu.pipeline_mode<synchronous>, transform_indices = @transform_2, window_bounds = array<i64: 1, 64>}, {pipeline_mode = #tpu.pipeline_mode<synchronous>, transform_indices = @transform_3, window_bounds = array<i64: 192, 128>}, {pipeline_mode = #tpu.pipeline_mode<synchronous>, transform_indices = @transform_4, window_bounds = array<i64: 1, 128>}, {pipeline_mode = #tpu.pipeline_mode<synchronous>, transform_indices = @transform_5, window_bounds = array<i64: 128, 128>}, {pipeline_mode = #tpu.pipeline_mode<synchronous>, transform_indices = @transform_6, window_bounds = array<i64: 1, 128>}, {transform_indices = @transform_7, window_bounds = array<i64: 8, 128>}]} {
    %c0 = arith.constant 0 : index
    %c0_0 = arith.constant 0 : index
    %c0_1 = arith.constant 0 : index
    %0 = vector.load %arg1[%c0, %c0_0, %c0_1] : memref<8x144x8xbf16, #tpu.memory_space<vmem>>, vector<8x144x8xbf16>
    %1 = vector.shape_cast %0 : vector<8x144x8xbf16> to vector<1152x8xbf16>
    %c0_2 = arith.constant 0 : index
    %c0_3 = arith.constant 0 : index
    %2 = vector.load %arg2[%c0_2, %c0_3] : memref<8x64xbf16, #tpu.memory_space<vmem>>, vector<8x64xbf16>
    %cst = arith.constant dense<0.000000e+00> : vector<1152x64xf32>
    %3 = tpu.matmul %1, %2, %cst {dimension_numbers = #tpu.dot_dimension_numbers<[1], [0], [0], [1], [0, 0, 1, 1], [], []>} : vector<1152x8xbf16>, vector<8x64xbf16>, vector<1152x64xf32> -> vector<1152x64xf32>
    %4 = vector.shape_cast %3 : vector<1152x64xf32> to vector<8x144x64xf32>
    %5 = tpu.iota {dimensions = array<i32: 1>} : vector<1x144x1xi32>
    %c1_i32 = arith.constant 1 : i32
    %6 = vector.broadcast %c1_i32 : i32 to vector<1x144x1xi32>
    %7 = arith.cmpi sge, %5, %6 : vector<1x144x1xi32>
    %c128_i32 = arith.constant 128 : i32
    %8 = vector.broadcast %c128_i32 : i32 to vector<1x144x1xi32>
    %9 = arith.cmpi sle, %5, %8 : vector<1x144x1xi32>
    %10 = arith.andi %7, %9 : vector<1x144x1xi1>
    %c0_4 = arith.constant 0 : index
    %c0_5 = arith.constant 0 : index
    %11 = vector.load %arg3[%c0_4, %c0_5] : memref<1x64xf32, #tpu.memory_space<vmem>>, vector<1x64xf32>
    %12 = vector.shape_cast %11 : vector<1x64xf32> to vector<1x1x64xf32>
    %13 = vector.broadcast %12 : vector<1x1x64xf32> to vector<8x144x64xf32>
    %14 = arith.addf %4, %13 : vector<8x144x64xf32>
    %cst_6 = arith.constant 0.000000e+00 : f32
    %15 = vector.broadcast %cst_6 : f32 to vector<8x144x64xf32>
    %16 = arith.maximumf %14, %15 : vector<8x144x64xf32>
    %cst_7 = arith.constant 0.000000e+00 : f32
    %17 = vector.shape_cast %10 : vector<1x144x1xi1> to vector<1x144x1xi1>
    %18 = vector.broadcast %17 : vector<1x144x1xi1> to vector<8x144x64xi1>
    %19 = vector.broadcast %cst_7 : f32 to vector<8x144x64xf32>
    %20 = arith.select %18, %16, %19 : vector<8x144x64xi1>, vector<8x144x64xf32>
    %21 = arith.truncf %20 : vector<8x144x64xf32> to vector<8x144x64xbf16>
    %22 = vector.extract_strided_slice %21 {offsets = [0, 0, 0], sizes = [8, 128, 64], strides = [1, 1, 1]} : vector<8x144x64xbf16> to vector<8x128x64xbf16>
    %23 = vector.extract_strided_slice %21 {offsets = [0, 1, 0], sizes = [8, 128, 64], strides = [1, 1, 1]} : vector<8x144x64xbf16> to vector<8x128x64xbf16>
    %24 = vector.extract_strided_slice %21 {offsets = [0, 2, 0], sizes = [8, 128, 64], strides = [1, 1, 1]} : vector<8x144x64xbf16> to vector<8x128x64xbf16>
    %25 = tpu.concatenate %22, %23, %24 in 2 : vector<8x128x64xbf16>, vector<8x128x64xbf16>, vector<8x128x64xbf16> -> vector<8x128x192xbf16>
    %26 = vector.shape_cast %25 : vector<8x128x192xbf16> to vector<1024x192xbf16>
    %c0_8 = arith.constant 0 : index
    %c0_9 = arith.constant 0 : index
    %27 = vector.load %arg4[%c0_8, %c0_9] : memref<192x128xbf16, #tpu.memory_space<vmem>>, vector<192x128xbf16>
    %cst_10 = arith.constant dense<0.000000e+00> : vector<1024x128xf32>
    %28 = tpu.matmul %26, %27, %cst_10 {dimension_numbers = #tpu.dot_dimension_numbers<[1], [0], [0], [1], [0, 0, 1, 1], [], []>} : vector<1024x192xbf16>, vector<192x128xbf16>, vector<1024x128xf32> -> vector<1024x128xf32>
    %c0_11 = arith.constant 0 : index
    %c0_12 = arith.constant 0 : index
    %29 = vector.load %arg5[%c0_11, %c0_12] : memref<1x128xf32, #tpu.memory_space<vmem>>, vector<1x128xf32>
    %30 = vector.broadcast %29 : vector<1x128xf32> to vector<1024x128xf32>
    %31 = arith.addf %28, %30 : vector<1024x128xf32>
    %cst_13 = arith.constant 0.000000e+00 : f32
    %32 = vector.broadcast %cst_13 : f32 to vector<1024x128xf32>
    %33 = arith.maximumf %31, %32 : vector<1024x128xf32>
    %34 = vector.shape_cast %33 : vector<1024x128xf32> to vector<8x128x128xf32>
    %cst_14 = arith.constant dense<0xFF800000> : vector<8x128xf32>
    %35 = vector.multi_reduction <maximumf>, %34, %cst_14 [1] : vector<8x128x128xf32> to vector<8x128xf32>
    %36 = arith.truncf %35 : vector<8x128xf32> to vector<8x128xbf16>
    %c0_15 = arith.constant 0 : index
    %c0_16 = arith.constant 0 : index
    %37 = vector.load %arg6[%c0_15, %c0_16] : memref<128x128xbf16, #tpu.memory_space<vmem>>, vector<128x128xbf16>
    %cst_17 = arith.constant dense<0.000000e+00> : vector<8x128xf32>
    %38 = tpu.matmul %36, %37, %cst_17 {dimension_numbers = #tpu.dot_dimension_numbers<[1], [0], [0], [1], [0, 0, 1, 1], [], []>} : vector<8x128xbf16>, vector<128x128xbf16>, vector<8x128xf32> -> vector<8x128xf32>
    %c0_18 = arith.constant 0 : index
    %c0_19 = arith.constant 0 : index
    %39 = vector.load %arg7[%c0_18, %c0_19] : memref<1x128xf32, #tpu.memory_space<vmem>>, vector<1x128xf32>
    %40 = vector.broadcast %39 : vector<1x128xf32> to vector<8x128xf32>
    %41 = arith.addf %38, %40 : vector<8x128xf32>
    %c0_20 = arith.constant 0 : index
    %c0_21 = arith.constant 0 : index
    %42 = vector.load %arg8[%c0_20, %c0_21] : memref<8x128xf32, #tpu.memory_space<vmem>>, vector<8x128xf32>
    tpu.vector_store %arg8[%c0_20, %c0_21], %41 {strides = array<i32>} : memref<8x128xf32, #tpu.memory_space<vmem>>, vector<8x128xf32>,
    return
  }
  func.func @transform_0(%arg0: i32) -> (i32, i32, i32) {
    %c0_i32 = arith.constant 0 : i32
    %c0_i32_0 = arith.constant 0 : i32
    %c0_i32_1 = arith.constant 0 : i32
    return %arg0, %c0_i32, %c0_i32_0 : i32, i32, i32
  }
  func.func @transform_1(%arg0: i32) -> (i32, i32) {
    %c0_i32 = arith.constant 0 : i32
    %c0_i32_0 = arith.constant 0 : i32
    %c0_i32_1 = arith.constant 0 : i32
    return %c0_i32, %c0_i32_0 : i32, i32
  }
  func.func @transform_2(%arg0: i32) -> (i32, i32) {
    %c0_i32 = arith.constant 0 : i32
    %c0_i32_0 = arith.constant 0 : i32
    %c0_i32_1 = arith.constant 0 : i32
    return %c0_i32, %c0_i32_0 : i32, i32
  }
  func.func @transform_3(%arg0: i32) -> (i32, i32) {
    %c0_i32 = arith.constant 0 : i32
    %c0_i32_0 = arith.constant 0 : i32
    %c0_i32_1 = arith.constant 0 : i32
    return %c0_i32, %c0_i32_0 : i32, i32
  }
  func.func @transform_4(%arg0: i32) -> (i32, i32) {
    %c0_i32 = arith.constant 0 : i32
    %c0_i32_0 = arith.constant 0 : i32
    %c0_i32_1 = arith.constant 0 : i32
    return %c0_i32, %c0_i32_0 : i32, i32
  }
  func.func @transform_5(%arg0: i32) -> (i32, i32) {
    %c0_i32 = arith.constant 0 : i32
    %c0_i32_0 = arith.constant 0 : i32
    %c0_i32_1 = arith.constant 0 : i32
    return %c0_i32, %c0_i32_0 : i32, i32
  }
  func.func @transform_6(%arg0: i32) -> (i32, i32) {
    %c0_i32 = arith.constant 0 : i32
    %c0_i32_0 = arith.constant 0 : i32
    %c0_i32_1 = arith.constant 0 : i32
    return %c0_i32, %c0_i32_0 : i32, i32
  }
  func.func @transform_7(%arg0: i32) -> (i32, i32) {
    %c0_i32 = arith.constant 0 : i32
    %c0_i32_0 = arith.constant 0 : i32
    return %arg0, %c0_i32 : i32, i32
  }
}

</mosaic_0001>

<bundles_post_ra>
// kernel: tpu_custom_call.1
= control target key start
LH: loop header
LB: loop body
LE: loop exit
PB: predicated region body
PF: predicated region fallthrough
CT: control target
= control target key end

     0   :  { %12 = vsyncpa [#allocation3], 0  ;;  %s7483_s0 = inlined_call_operand.vmem [shape: bf16[16,144,8], index: 0, kind: input, shape index: {}]   ;;  %s7484_s1 = inlined_call_operand.vmem [shape: bf16[8,64], index: 1, kind: input, shape index: {}]   ;;  %s7485_s2 = inlined_call_operand.vmem [shape: f32[1,64], index: 2, kind: input, shape index: {}]   ;;  %s7486_s3 = inlined_call_operand.vmem [shape: bf16[192,128], index: 3, kind: input, shape index: {}]   ;;  %s7487_s4 = inlined_call_operand.vmem [shape: f32[1,128], index: 4, kind: input, shape index: {}]   ;;  %s7488_s5 = inlined_call_operand.vmem [shape: bf16[128,128], index: 5, kind: input, shape index: {}]   ;;  %s7489_s6 = inlined_call_operand.vmem [shape: f32[1,128], index: 6, kind: input, shape index: {}]   ;;  %s7490_s7 = inlined_call_operand.hbm [shape: f32[16,128], index: 7, kind: output, shape index: {}]  }
   0x1   :  { %14 = vsyncpa [#allocation3 + $0x1], 0  ;;  %s5587_s24 = smov 0   ;;  %s5589_s25 = smov 0  }
   0x2   :  { %s5591_s26 = smov 0   ;;  %s5593_s27 = smov 0  }
   0x3 LB: > { %s4810_s28 = sadd.s32 4294967295, %s5544_s27   ;;  %s4811_s29 = sadd.s32 4294967294, %s5544_s27   ;;  %s5544_s27 = sphi %s5593_s27, %s7561_s27   ;;  %s5540_s26 = sphi %s5591_s26, %s7560_s26   ;;  %s5536_s25 = sphi %s5589_s25, %s7559_s25   ;;  %s5532_s24 = sphi %s5587_s24, %s7558_s24  }
   0x4   : > { %s5610_s30 = sadd.s32 1, %s5544_s27   ;;  %s179_s8 = sadd.s32 1, %s5540_s26 }
   0x5   : > { %s176_s9 = ssub.s32 %s5544_s27, %s5610_s30  ;;  %p189_p0 = scmp.ne.s32.totalorder %s5540_s26, %s5536_s25 }
   0x6   : > { %p177_p1 = scmp.eq.s32.totalorder %s176_s9, 0  ;;  %p190_p2 = scmp.eq.s32.totalorder %s4810_s28, 1 }
   0x7   : > { %p195_p3 = scmp.ne.s32.totalorder %s5536_s25, %s5532_s24  ;;  %p196_p4 = scmp.eq.s32.totalorder %s4811_s29, 1 }
   0x8   : > { %s5620_s10 = scalar_select %p177_p1, %s5540_s26, %s179_s8  }
   0x9   : > { %p5622_p5 = por %p190_p2, %p189_p0  ;;  %p5626_p6 = por %p196_p4, %p195_p3 }
   0xa   : > { %p4814_p7 = scmp.ge.s32.totalorder %s5544_s27, 1  ;;  %p242_p8 = scmp.lt.s32.totalorder %s5544_s27, 3 }
   0xc   : > { %p243_p9 = pnand %p4814_p7, %p242_p8 }
   0xe   : > { %246 = sbr.rel (%p243_p9) target bundleno = 1477 (0x5c5), region = 48 }
  0x13   : > { %v427_v0 = vld [vmem:[%s7484_s1] sm:$0xf]  ;;  %vm1005_vm0 = vcmask 1043456   ;;  %s5635_s15 = sshll.u32 %s4810_s28, 3  ;;  %vm788_vm1 = vcmask 64512   ;;  %v5663_v10 = vld [vmem:[%s7486_s3 + $0x58] sm:$0xff]  ;;  %v1370_v17 = vlaneseq }
  0x14   : > { %v1007_v1 = vsel %vm1005_vm0, %v427_v0, 0  ;;  %p276_p10 = scmp.lt.s32.totalorder %s5635_s15, 15  ;;  %3993 = vmatpush.bf16.msra.mxu2 %v5663_v10  ;;  %v5669_v11 = vld [vmem:[%s7486_s3 + $0x50] sm:$0xff]  ;;  %v5675_v12 = vld [vmem:[%s7486_s3 + $0x48] sm:$0xff]  ;;  %v5682_v15 = vld [vmem:[%s7486_s3 + $0x40] sm:$0xff]  ;;  %vm3038_vm3 = vcmask 1046528   ;;  %s4747_s18 = scalar_lea.hbm %s7490_s7, %s5635_s15 }
  0x15   : > { %1016 = vmatpush.bf16.msra.mxu0 %v1007_v1  ;;  %5418 = vmatpush.bf16.msra.mxu3 %v1007_v1  ;;  %v5689_v16 = vld [vmem:[%s7485_s2] ss:$0 sm:$0xff]  ;;  %v5692_v20 = vshrl.u32 %v1370_v17, 7  ;;  %vm3175_vm4 = vcmask 523264   ;;  %vm2365_vm5 = vsmask.f32 7424 }
  0x16   : > { %s277_s16 = scalar_select %p276_p10, %s5635_s15, 15  ;;  %vm4658_vm7 = vcmask 1041409   ;;  %vm4660_vm8 = vcmask 1042434   ;;  %vm4662_vm9 = vcmask 1043459   ;;  %vm4664_vm10 = vcmask 1044484  }
  0x17   : > { %vm1388_vm2 = vcmp.ge.s32.totalorder %v5692_v20, 1  ;;  %vm4666_vm11 = vcmask 1045509   ;;  %vm4668_vm12 = vcmask 1046534   ;;  %vm4670_vm13 = vcmask 1047559   ;;  %s272_s9 = sand.u32 1, %s5536_s25   ;;  %s4751_s23 = sshll.u32 %s4747_s18, 4  ;;  %s4752_s23 = int_to_ptr.hbm [resolvable:$true] %s4751_s23 }
  0x18   : > { %s5431_s17 = smul.u32 72, %s277_s16  ;;  %3994 = vmatpush.bf16.msra.mxu2 %v5669_v11  ;;  %s4815_s13 = sshll.u32 %s272_s9, 3 }
  0x19   : > { %s274_s22 = scalar_lea.vmem [#allocation2], %s4815_s13  ;;  %s5496_s28 = sshra.s32 %s4752_s23, 4  ;;  %s5497_s28 = int_to_ptr.hbm [resolvable:$true] %s5496_s28 }
  0x1a   : > { %s5642_s20 = scalar_lea.vmem %s7483_s0, %s5431_s17  ;;  %s5546_s17 = smov 64  }
  0x1b   : > { %v5326_v2 = vld [vmem:[%s5642_s20] sm:$0xff]  ;;  %v5327_v3 = vld [vmem:[%s5642_s20 + $0x8] sm:$0xff]  ;;  %v5328_v4 = vld [vmem:[%s5642_s20 + $0x10] sm:$0xff]  ;;  %s5498_s29 = scalar_lea.hbm %s5497_s28, 8  ;;  %s5502_s14 = scalar_lea.hbm %s7490_s7, 16 }
  0x1c   : > { %5106 = vmatmul.msk.bf16.vlgmr.msra.gmra.mxu0 %vm788_vm1, %v5326_v2  ;;  %v5329_v5 = vld [vmem:[%s5642_s20 + $0x18] sm:$0xff]  ;;  %v5330_v6 = vld [vmem:[%s5642_s20 + $0x20] sm:$0xff]  ;;  %v5331_v7 = vld [vmem:[%s5642_s20 + $0x28] sm:$0xff]  ;;  %3995 = vmatpush.bf16.msra.mxu2 %v5675_v12  ;;  %p5499_p11 = scmp.ne.s32.totalorder %s5497_s28, %s5498_s29  ;;  %p5503_p0 = scmp.lt.s32.totalorder %s5497_s28, %s7490_s7 }
  0x1d   : > { %v5332_v8 = vld [vmem:[%s5642_s20 + $0x30] sm:$0xff]  ;;  %v5333_v9 = vld [vmem:[%s5642_s20 + $0x38] sm:$0xff]  ;;  %v5334_v13 = vld [vmem:[%s5642_s20 + $0x40] sm:$0xff]  ;;  %p5504_p1 = scmp.lt.s32.totalorder %s5502_s14, %s5498_s29 }
  0x1e   : > { %v5335_v24 = vld [vmem:[%s5642_s20 + $0x48] sm:$0xff]  ;;  %v5336_v42 = vld [vmem:[%s5642_s20 + $0x50] sm:$0xff]  ;;  %v5337_v63 = vld [vmem:[%s5642_s20 + $0x58] sm:$0xff]  ;;  %p5500_p12 = pnand %p5499_p11, %p5622_p5 }
  0x1f   : > { %p5505_p2 = por %p5504_p1, %p5503_p0 }
  0x20   : > { %3996 = vmatpush.bf16.msra.mxu2 %v5682_v15  ;;  %p5501_p13 = pneg %p5500_p12 }
  0x22   : > { %p5506_p3 = pnand %p5505_p2, %p5501_p13 }
  0x2c   : > { %5107 = vmatmul.msk.bf16.gmra.mxu0 %vm788_vm1, %v5327_v3 }
  0x3c   : > { %5108 = vmatmul.msk.bf16.gmra.mxu0 %vm788_vm1, %v5328_v4 }
  0x4c   : > { %5109 = vmatmul.msk.bf16.gmra.mxu0 %vm788_vm1, %v5329_v5 }
  0x5c   : > { %5110 = vmatmul.msk.bf16.gmra.mxu0 %vm788_vm1, %v5330_v6 }
  0x6c   : > { %5111 = vmatmul.msk.bf16.gmra.mxu0 %vm788_vm1, %v5331_v7 }
  0x7c   : > { %5112 = vmatmul.msk.bf16.gmra.mxu0 %vm788_vm1, %v5332_v8 }
  0x8c   : > { %5113 = vmatmul.msk.bf16.gmra.mxu0 %vm788_vm1, %v5333_v9 }
  0x99   : > { %v1018_v14 = vpop.f32.mrf.mxu0 }
  0x9a   : > { %v1443_v18 = vadd.f32 %v5689_v16, %v1018_v14 }
  0x9c   : > { %5114 = vmatmul.msk.bf16.gmra.mxu0 %vm788_vm1, %v5334_v13  ;;  %v1579_v22 = vmax.f32 %v1443_v18, 0.0 }
  0x9e   : > { %v1749_v25 = vsel %vm1388_vm2, %v1579_v22, 0.0 }
  0x9f   : > { %v1885_v28 = vpack.c.bf16 %v1749_v25, %v1749_v25 }
  0xa1   : > { %v1020_v19 = vpop.f32.mrf.mxu0  ;;  %v2149_v31 = vunpack.c.l.b16 %v1885_v28 }
  0xa2   : > { %v1444_v21 = vadd.f32 %v5689_v16, %v1020_v19 }
  0xa4   : > { %v1580_v23 = vmax.f32 %v1444_v21, 0.0 }
  0xa6   : > { %v1886_v27 = vpack.c.bf16 %v1580_v23, %v1580_v23 }
  0xa8   : > { %v2150_v30 = vunpack.c.l.b16 %v1886_v27 }
  0xa9   : > { %v1023_v26 = vpop.f32.mrf.mxu0 }
  0xaa   : > { %v1445_v29 = vadd.f32 %v5689_v16, %v1023_v26  ;;  %v5701_v34 = vpack.c.b16 %v2150_v30, %v2149_v31 }
  0xac   : > { %5115 = vmatmul.msk.bf16.gmra.mxu0 %vm788_vm1, %v5335_v24  ;;  %v1581_v32 = vmax.f32 %v1445_v29, 0.0  ;;  %v2369_v39 = vshll.u32 %v5701_v34, 16  ;;  %v3039_v46 = vrot.slane %v5701_v34, 1  ;;  %v2367_v49 = vshrl.u32 %v5701_v34, 16  ;;  %v5338_v24 = vld [vmem:[%s5642_s20 + $0x60] sm:$0xff] }
  0xae   : > { %v1887_v36 = vpack.c.bf16 %v1581_v32, %v1581_v32  ;;  %v2371_v45 = vrot.slane %v2369_v39, 1 }
  0xb0   : > { %v2151_v40 = vunpack.c.l.b16 %v1887_v36  ;;  %v2372_v52 = vor.u32 %v2371_v45, %v2367_v49  ;;  %v5339_v45 = vld [vmem:[%s5642_s20 + $0x68] sm:$0xff] }
  0xb1   : > { %v1025_v33 = vpop.f32.mrf.mxu0 }
  0xb2   : > { %v1446_v35 = vadd.f32 %v5689_v16, %v1025_v33 }
  0xb4   : > { %v1582_v37 = vmax.f32 %v1446_v35, 0.0 }
  0xb6   : > { %v1888_v38 = vpack.c.bf16 %v1582_v37, %v1582_v37 }
  0xb8   : > { %v2152_v41 = vunpack.c.l.b16 %v1888_v38 }
  0xb9   : > { %v1028_v43 = vpop.f32.mrf.mxu0 }
  0xba   : > { %v5706_v44 = vpack.c.b16 %v2152_v41, %v2151_v40  ;;  %v1447_v47 = vadd.f32 %v5689_v16, %v1028_v43 }
  0xbc   : > { %5116 = vmatmul.msk.bf16.gmra.mxu0 %vm788_vm1, %v5336_v42  ;;  %v3040_v48 = vrot.slane %v5706_v44, 1  ;;  %v2374_v50 = vshll.u32 %v5706_v44, 16  ;;  %v1583_v54 = vmax.f32 %v1447_v47, 0.0  ;;  %v2378_v4 = vshrl.u32 %v5706_v44, 16 }
  0xbe   : > { %v3041_v51 = vsel %vm3038_vm3, %v3039_v46, %v3040_v48  ;;  %v2376_v53 = vrot.slane %v2374_v50, 1  ;;  %v1889_v58 = vpack.c.bf16 %v1583_v54, %v1583_v54 }
  0xbf   : > { %5226 = vmatmul.msk.bf16.vlgmr.msra.gmra.mxu2 %vm3175_vm4, %v3041_v51 }
  0xc0   : > { %v2377_v55 = vsel %vm2365_vm5, %v2372_v52, %v2376_v53  ;;  %v2153_v61 = vunpack.c.l.b16 %v1889_v58  ;;  %v2380_v7 = vor.u32 %v2378_v4, %v2376_v53 }
  0xc1   : > { %2910 = vrot.lane.b32.xlu0 %v2377_v55, %s5546_s17  ;;  %v1030_v56 = vpop.f32.mrf.mxu0 }
  0xc2   : > { %v1448_v57 = vadd.f32 %v5689_v16, %v1030_v56 }
  0xc4   : > { %v1584_v59 = vmax.f32 %v1448_v57, 0.0 }
  0xc6   : > { %v1890_v60 = vpack.c.bf16 %v1584_v59, %v1584_v59 }
  0xc8   : > { %v2154_v62 = vunpack.c.l.b16 %v1890_v60 }
  0xc9   : > { %v1033_v0 = vpop.f32.mrf.mxu0 }
  0xca   : > { %v5720_v1 = vpack.c.b16 %v2154_v62, %v2153_v61  ;;  %v1449_v2 = vadd.f32 %v5689_v16, %v1033_v0  ;;  %v5405_v61 = vld [vmem:[%s7486_s3 + $0x38] sm:$0xff] }
  0xcb   : > { %3660 = vmatpush.bf16.msra.mxu1 %v5405_v61  ;;  %5419 = vmatpush.bf16.msrb.mxu3 %v5405_v61 }
  0xcc   : > { %5117 = vmatmul.msk.bf16.gmra.mxu0 %vm788_vm1, %v5337_v63  ;;  %v3042_v3 = vrot.slane %v5720_v1, 1  ;;  %v2382_v5 = vshll.u32 %v5720_v1, 16  ;;  %v1585_v9 = vmax.f32 %v1449_v2, 0.0  ;;  %v2386_v29 = vshrl.u32 %v5720_v1, 16  ;;  %v5340_v2 = vld [vmem:[%s5642_s20 + $0x70] sm:$0xff] }
  0xce   : > { %v3043_v6 = vsel %vm3038_vm3, %v3040_v48, %v3042_v3  ;;  %v2384_v8 = vrot.slane %v2382_v5, 1  ;;  %v1891_v18 = vpack.c.bf16 %v1585_v9, %v1585_v9 }
  0xcf   : > { %5227 = vmatmul.msk.bf16.gmra.mxu2 %vm3175_vm4, %v3043_v6 }
  0xd0   : > { %v2385_v13 = vsel %vm2365_vm5, %v2380_v7, %v2384_v8  ;;  %v2155_v22 = vunpack.c.l.b16 %v1891_v18  ;;  %v2388_v32 = vor.u32 %v2386_v29, %v2384_v8 }
  0xd1   : > { %2912 = vrot.lane.b32.xlu0 %v2385_v13, %s5546_s17  ;;  %v1035_v14 = vpop.f32.mrf.mxu0  ;;  %v5403_v13 = vld [vmem:[%s7486_s3 + $0x28] sm:$0xff] }
  0xd2   : > { %v1450_v17 = vadd.f32 %v5689_v16, %v1035_v14 }
  0xd4   : > { %v1586_v19 = vmax.f32 %v1450_v17, 0.0 }
  0xd6   : > { %v1892_v21 = vpack.c.bf16 %v1586_v19, %v1586_v19 }
  0xd8   : > { %v2156_v23 = vunpack.c.l.b16 %v1892_v21 }
  0xd9   : > { %v1038_v25 = vpop.f32.mrf.mxu0 }
  0xda   : > { %v5733_v26 = vpack.c.b16 %v2156_v23, %v2155_v22  ;;  %v1451_v27 = vadd.f32 %v5689_v16, %v1038_v25  ;;  %v5402_v22 = vld [vmem:[%s7486_s3 + $0x20] sm:$0xff] }
  0xdc   : > { %5118 = vmatmul.msk.bf16.gmra.mxu0 %vm788_vm1, %v5338_v24  ;;  %v3044_v28 = vrot.slane %v5733_v26, 1  ;;  %v2390_v30 = vshll.u32 %v5733_v26, 16  ;;  %v1587_v35 = vmax.f32 %v1451_v27, 0.0  ;;  %v2394_v50 = vshrl.u32 %v5733_v26, 16 }
  0xde   : > { %v3045_v31 = vsel %vm3038_vm3, %v3042_v3, %v3044_v28  ;;  %v2392_v33 = vrot.slane %v2390_v30, 1  ;;  %v1893_v39 = vpack.c.bf16 %v1587_v35, %v1587_v35  ;;  %v5404_v3 = vld [vmem:[%s7486_s3 + $0x30] sm:$0xff] }
  0xdf   : > { %5228 = vmatmul.msk.bf16.gmra.mxu2 %vm3175_vm4, %v3045_v31  ;;  %3661 = vmatpush.bf16.msra.mxu1 %v5404_v3 }
  0xe0   : > { %v2393_v36 = vsel %vm2365_vm5, %v2388_v32, %v2392_v33  ;;  %v2157_v42 = vunpack.c.l.b16 %v1893_v39  ;;  %v2396_v53 = vor.u32 %v2394_v50, %v2392_v33  ;;  %5420 = vmatpush.bf16.msrb.mxu3 %v5404_v3  ;;  %v5341_v32 = vld [vmem:[%s5642_s20 + $0x78] sm:$0xff]  ;;  %v5400_v33 = vld [vmem:[%s7486_s3 + $0x10] sm:$0xff] }
  0xe1   : > { %2914 = vrot.lane.b32.xlu1 %v2393_v36, %s5546_s17  ;;  %v1040_v37 = vpop.f32.mrf.mxu0 }
  0xe2   : > { %v1452_v38 = vadd.f32 %v5689_v16, %v1040_v37 }
  0xe3   : > { %3662 = vmatpush.bf16.msra.mxu1 %v5403_v13 }
  0xe4   : > { %v1588_v40 = vmax.f32 %v1452_v38, 0.0  ;;  %5421 = vmatpush.bf16.msrb.mxu3 %v5403_v13 }
  0xe6   : > { %v1894_v41 = vpack.c.bf16 %v1588_v40, %v1588_v40 }
  0xe7   : > { %3663 = vmatpush.bf16.msra.mxu1 %v5402_v22 }
  0xe8   : > { %v2158_v43 = vunpack.c.l.b16 %v1894_v41  ;;  %5422 = vmatpush.bf16.msrb.mxu3 %v5402_v22  ;;  %v5399_v41 = vld [vmem:[%s7486_s3 + $0x8] sm:$0xff] }
  0xe9   : > { %v1043_v46 = vpop.f32.mrf.mxu0 }
  0xea   : > { %v5746_v47 = vpack.c.b16 %v2158_v43, %v2157_v42  ;;  %v1453_v48 = vadd.f32 %v5689_v16, %v1043_v46 }
  0xec   : > { %5119 = vmatmul.msk.bf16.gmra.mxu0 %vm788_vm1, %v5339_v45  ;;  %v3046_v49 = vrot.slane %v5746_v47, 1  ;;  %v2398_v51 = vshll.u32 %v5746_v47, 16  ;;  %v1589_v55 = vmax.f32 %v1453_v48, 0.0  ;;  %v2402_v8 = vshrl.u32 %v5746_v47, 16 }
  0xee   : > { %v3047_v52 = vsel %vm3038_vm3, %v3044_v28, %v3046_v49  ;;  %v2400_v54 = vrot.slane %v2398_v51, 1  ;;  %v1895_v59 = vpack.c.bf16 %v1589_v55, %v1589_v55  ;;  %v5401_v28 = vld [vmem:[%s7486_s3 + $0x18] sm:$0xff]  ;;  %v5809_v55 = vadd.s32 128, %v5692_v20 }
  0xef   : > { %5229 = vmatmul.msk.bf16.gmra.mxu2 %vm3175_vm4, %v3047_v52  ;;  %3664 = vmatpush.bf16.msra.mxu1 %v5401_v28 }
  0xf0   : > { %v2401_v56 = vsel %vm2365_vm5, %v2396_v53, %v2400_v54  ;;  %v2159_v63 = vunpack.c.l.b16 %v1895_v59  ;;  %v2404_v17 = vor.u32 %v2402_v8, %v2400_v54  ;;  %5423 = vmatpush.bf16.msrb.mxu3 %v5401_v28  ;;  %vm1421_vm6 = vcmp.le.s32.totalorder %v5809_v55, 128  ;;  %v5377_v28 = vld [vmem:[%s5642_s20 + $0x198] sm:$0xff] }
  0xf1   : > { %2916 = vrot.lane.b32.xlu1 %v2401_v56, %s5546_s17  ;;  %v1045_v57 = vpop.f32.mrf.mxu0  ;;  %5157 = vmatmul.msk.bf16.vlgmr.msra.gmra.mxu3 %vm788_vm1, %v5377_v28 }
  0xf2   : > { %v1454_v58 = vadd.f32 %v5689_v16, %v1045_v57 }
  0xf3   : > { %3665 = vmatpush.bf16.msra.mxu1 %v5400_v33 }
  0xf4   : > { %v1590_v60 = vmax.f32 %v1454_v58, 0.0  ;;  %5424 = vmatpush.bf16.msrb.mxu3 %v5400_v33  ;;  %v5342_v58 = vld [vmem:[%s5642_s20 + $0x80] sm:$0xff] }
  0xf6   : > { %v1896_v62 = vpack.c.bf16 %v1590_v60, %v1590_v60 }
  0xf7   : > { %3666 = vmatpush.bf16.msra.mxu1 %v5399_v41 }
  0xf8   : > { %v2160_v0 = vunpack.c.l.b16 %v1896_v62  ;;  %5425 = vmatpush.bf16.msrb.mxu3 %v5399_v41 }
  0xf9   : > { %v1048_v4 = vpop.f32.mrf.mxu0 }
  0xfa   : > { %v5765_v5 = vpack.c.b16 %v2160_v0, %v2159_v63  ;;  %v1455_v6 = vadd.f32 %v5689_v16, %v1048_v4 }
  0xfc   : > { %5120 = vmatmul.msk.bf16.gmra.mxu0 %vm788_vm1, %v5340_v2  ;;  %v3048_v7 = vrot.slane %v5765_v5, 1  ;;  %v2406_v9 = vshll.u32 %v5765_v5, 16  ;;  %v1591_v19 = vmax.f32 %v1455_v6, 0.0  ;;  %v2410_v39 = vshrl.u32 %v5765_v5, 16 }
  0xfe   : > { %v3049_v14 = vsel %vm3038_vm3, %v3046_v49, %v3048_v7  ;;  %v2408_v18 = vrot.slane %v2406_v9, 1  ;;  %v1897_v25 = vpack.c.bf16 %v1591_v19, %v1591_v19  ;;  %v5398_v49 = vld [vmem:[%s7486_s3] sm:$0xff] }
  0xff   : > { %5230 = vmatmul.msk.bf16.gmra.mxu2 %vm3175_vm4, %v3049_v14  ;;  %3667 = vmatpush.bf16.msra.mxu1 %v5398_v49 }
 0x100   : > { %v2409_v21 = vsel %vm2365_vm5, %v2404_v17, %v2408_v18  ;;  %v2161_v30 = vunpack.c.l.b16 %v1897_v25  ;;  %v2412_v43 = vor.u32 %v2410_v39, %v2408_v18  ;;  %5426 = vmatpush.bf16.msrb.mxu3 %v5398_v49  ;;  %v5344_v39 = vld [vmem:[%s5642_s20 + $0x90] sm:$0xff] }
 0x101   : > { %2918 = vrot.lane.b32.xlu2 %v2409_v21, %s5546_s17  ;;  %v1050_v23 = vpop.f32.mrf.mxu0 }
 0x102   : > { %v1456_v24 = vadd.f32 %v5689_v16, %v1050_v23  ;;  %v5343_v23 = vld [vmem:[%s5642_s20 + $0x88] sm:$0xff] }
 0x104   : > { %v1592_v27 = vmax.f32 %v1456_v24, 0.0  ;;  %5427 = vmatpush.bf16.msra.mxu3 %v5663_v10 }
 0x106   : > { %v1898_v29 = vpack.c.bf16 %v1592_v27, %v1592_v27 }
 0x108   : > { %v2162_v31 = vunpack.c.l.b16 %v1898_v29  ;;  %5428 = vmatpush.bf16.msra.mxu3 %v5669_v11  ;;  %v5378_v11 = vld [vmem:[%s5642_s20 + $0x1a0] sm:$0xff] }
 0x109   : > { %v1053_v35 = vpop.f32.mrf.mxu0  ;;  %5158 = vmatmul.msk.bf16.gmra.mxu3 %vm788_vm1, %v5378_v11 }
 0x10a   : > { %v5790_v36 = vpack.c.b16 %v2162_v31, %v2161_v30  ;;  %v1457_v37 = vadd.f32 %v5689_v16, %v1053_v35 }
 0x10c   : > { %5121 = vmatmul.msk.bf16.gmra.mxu0 %vm788_vm1, %v5341_v32  ;;  %v3050_v38 = vrot.slane %v5790_v36, 1  ;;  %v2414_v40 = vshll.u32 %v5790_v36, 16  ;;  %v1593_v46 = vmax.f32 %v1457_v37, 0.0  ;;  %v2418_v0 = vshrl.u32 %v5790_v36, 16  ;;  %5429 = vmatpush.bf16.msra.mxu3 %v5675_v12 }
 0x10e   : > { %v3051_v42 = vsel %vm3038_vm3, %v3048_v7, %v3050_v38  ;;  %v2416_v45 = vrot.slane %v2414_v40, 1  ;;  %v1899_v52 = vpack.c.bf16 %v1593_v46, %v1593_v46 }
 0x10f   : > { %5231 = vmatmul.msk.bf16.gmra.mxu2 %vm3175_vm4, %v3051_v42 }
 0x110   : > { %v2417_v48 = vsel %vm2365_vm5, %v2412_v43, %v2416_v45  ;;  %v2163_v56 = vunpack.c.l.b16 %v1899_v52  ;;  %v2420_v6 = vor.u32 %v2418_v0, %v2416_v45  ;;  %5430 = vmatpush.bf16.msra.mxu3 %v5682_v15 }
 0x111   : > { %2920 = vrot.lane.b32.xlu2 %v2417_v48, %s5546_s17  ;;  %v1055_v50 = vpop.f32.mrf.mxu0 }
 0x112   : > { %v1458_v51 = vadd.f32 %v5689_v16, %v1055_v50 }
 0x114   : > { %v1594_v53 = vmax.f32 %v1458_v51, 0.0 }
 0x116   : > { %v1900_v54 = vpack.c.bf16 %v1594_v53, %v1594_v53 }
 0x118   : > { %v2164_v57 = vunpack.c.l.b16 %v1900_v54 }
 0x119   : > { %v1058_v59 = vpop.f32.mrf.mxu0 }
 0x11a   : > { %v5812_v60 = vpack.c.b16 %v2164_v57, %v2163_v56  ;;  %v1459_v61 = vadd.f32 %v5689_v16, %v1058_v59  ;;  %v5345_v59 = vld [vmem:[%s5642_s20 + $0x98] sm:$0xff] }
 0x11c   : > { %v1595_v62 = vmax.f32 %v1459_v61, 0.0  ;;  %5122 = vmatmul.msk.bf16.gmra.mxu0 %vm788_vm1, %v5342_v58  ;;  %v3052_v63 = vrot.slane %v5812_v60, 1  ;;  %v2422_v2 = vshll.u32 %v5812_v60, 16  ;;  %v2426_v19 = vshrl.u32 %v5812_v60, 16 }
 0x11e   : > { %v1765_v3 = vsel %vm1421_vm6, %v1595_v62, 0.0  ;;  %v3053_v4 = vsel %vm3038_vm3, %v3050_v38, %v3052_v63  ;;  %v2424_v7 = vrot.slane %v2422_v2, 1 }
 0x11f   : > { %v1901_v8 = vpack.c.bf16 %v1765_v3, %v1765_v3  ;;  %5232 = vmatmul.msk.bf16.gmra.mxu2 %vm3175_vm4, %v3053_v4 }
 0x120   : > { %v2425_v9 = vsel %vm2365_vm5, %v2420_v6, %v2424_v7  ;;  %v2428_v21 = vor.u32 %v2426_v19, %v2424_v7  ;;  %v5379_v7 = vld [vmem:[%s5642_s20 + $0x1a8] sm:$0xff] }
 0x121   : > { %v2349_v13 = vunpack.c.l.b16 %v1901_v8  ;;  %2922 = vrot.lane.b32.xlu0 %v2425_v9, %s5546_s17  ;;  %v1060_v14 = vpop.f32.mrf.mxu0  ;;  %5159 = vmatmul.msk.bf16.gmra.mxu3 %vm788_vm1, %v5379_v7 }
 0x123   : > { %v2357_v17 = vpack.c.b16 %v2349_v13, %v2349_v13 }
 0x125   : > { %v2430_v18 = vshll.u32 %v2357_v17, 16  ;;  %v3054_v27 = vrot.slane %v2357_v17, 1 }
 0x127   : > { %v2432_v22 = vrot.slane %v2430_v18, 1  ;;  %v3055_v29 = vsel %vm3038_vm3, %v3052_v63, %v3054_v27 }
 0x129   : > { %v1062_v24 = vpop.f32.mrf.mxu0  ;;  %v2433_v25 = vsel %vm2365_vm5, %v2428_v21, %v2432_v22 }
 0x12a   : > { %2924 = vrot.lane.b32.xlu1 %v2433_v25, %s5546_s17  ;;  %v1460_v30 = vadd.f32 %v5689_v16, %v1062_v24 }
 0x12c   : > { %5123 = vmatmul.msk.bf16.gmra.mxu0 %vm788_vm1, %v5343_v23  ;;  %v1596_v37 = vmax.f32 %v1460_v30, 0.0  ;;  %v5346_v30 = vld [vmem:[%s5642_s20 + $0xa0] sm:$0xff] }
 0x12e   : > { %v1766_v10 = vsel %vm1388_vm2, %v1596_v37, 0.0 }
 0x12f   : > { %5233 = vmatmul.msk.bf16.gmra.mxu2 %vm3175_vm4, %v3055_v29  ;;  %v1902_v42 = vpack.c.bf16 %v1766_v10, %v1766_v10 }
 0x131   : > { %v1064_v31 = vpop.f32.mrf.mxu0  ;;  %v2165_v45 = vunpack.c.l.b16 %v1902_v42 }
 0x132   : > { %v1461_v32 = vadd.f32 %v5689_v16, %v1064_v31 }
 0x133   : > { %v2911_v33 = vpop.permute.xlu0 %2910 }
 0x134   : > { %v3177_v35 = vsel %vm3175_vm4, %v5701_v34, %v2911_v33  ;;  %v1597_v38 = vmax.f32 %v1461_v32, 0.0 }
 0x135   : > { %3668 = vmatmul.bf16.vlgmr.msra.gmra.mxu1 %v3177_v35 }
 0x136   : > { %v1903_v41 = vpack.c.bf16 %v1597_v38, %v1597_v38 }
 0x138   : > { %v2166_v34 = vunpack.c.l.b16 %v1903_v41 }
 0x139   : > { %v1067_v40 = vpop.f32.mrf.mxu0 }
 0x13a   : > { %v1462_v43 = vadd.f32 %v5689_v16, %v1067_v40  ;;  %v5850_v48 = vpack.c.b16 %v2166_v34, %v2165_v45 }
 0x13c   : > { %5124 = vmatmul.msk.bf16.gmra.mxu0 %vm788_vm1, %v5344_v39  ;;  %v1598_v12 = vmax.f32 %v1462_v43, 0.0  ;;  %v2437_v56 = vshll.u32 %v5850_v48, 16  ;;  %v3056_v2 = vrot.slane %v5850_v48, 1  ;;  %v2435_v4 = vshrl.u32 %v5850_v48, 16  ;;  %v5380_v39 = vld [vmem:[%s5642_s20 + $0x1b0] sm:$0xff] }
 0x13d   : > { %5160 = vmatmul.msk.bf16.gmra.mxu3 %vm788_vm1, %v5380_v39 }
 0x13e   : > { %v1904_v51 = vpack.c.bf16 %v1598_v12, %v1598_v12  ;;  %v2439_v0 = vrot.slane %v2437_v56, 1 }
 0x140   : > { %v2167_v57 = vunpack.c.l.b16 %v1904_v51  ;;  %v2440_v9 = vor.u32 %v2439_v0, %v2435_v4 }
 0x141   : > { %v1069_v46 = vpop.f32.mrf.mxu0 }
 0x142   : > { %v1463_v49 = vadd.f32 %v5689_v16, %v1069_v46  ;;  %v5853_v50 = vpop.f32.mrf.mxu2 }
 0x143   : > { %v2913_v15 = vpop.permute.xlu0 %2912 }
 0x144   : > { %v1599_v52 = vmax.f32 %v1463_v49, 0.0  ;;  %v3180_v53 = vsel %vm3175_vm4, %v5706_v44, %v2913_v15 }
 0x145   : > { %3673 = vmatmul.bf16.gmra.mxu1 %v3180_v53 }
 0x146   : > { %v1905_v54 = vpack.c.bf16 %v1599_v52, %v1599_v52 }
 0x148   : > { %v2168_v58 = vunpack.c.l.b16 %v1905_v54  ;;  %v5347_v54 = vld [vmem:[%s5642_s20 + $0xa8] sm:$0xff] }
 0x149   : > { %v1072_v61 = vpop.f32.mrf.mxu0 }
 0x14a   : > { %v5859_v62 = vpack.c.b16 %v2168_v58, %v2167_v57  ;;  %v5861_v63 = vpop.f32.mrf.mxu2  ;;  %v1464_v3 = vadd.f32 %v5689_v16, %v1072_v61 }
 0x14c   : > { %5125 = vmatmul.msk.bf16.gmra.mxu0 %vm788_vm1, %v5345_v59  ;;  %v3057_v44 = vrot.slane %v5859_v62, 1  ;;  %v2442_v6 = vshll.u32 %v5859_v62, 16  ;;  %v1600_v14 = vmax.f32 %v1464_v3, 0.0  ;;  %v2446_v38 = vshrl.u32 %v5859_v62, 16 }
 0x14e   : > { %v3058_v8 = vsel %vm3038_vm3, %v3056_v2, %v3057_v44  ;;  %v2444_v13 = vrot.slane %v2442_v6, 1  ;;  %v1906_v23 = vpack.c.bf16 %v1600_v14, %v1600_v14  ;;  %v5381_v2 = vld [vmem:[%s5642_s20 + $0x1b8] sm:$0xff] }
 0x14f   : > { %5234 = vmatmul.msk.bf16.gmra.mxu2 %vm3175_vm4, %v3058_v8  ;;  %5161 = vmatmul.msk.bf16.gmra.mxu3 %vm788_vm1, %v5381_v2 }
 0x150   : > { %v2445_v17 = vsel %vm2365_vm5, %v2440_v9, %v2444_v13  ;;  %v2169_v28 = vunpack.c.l.b16 %v1906_v23  ;;  %v2448_v40 = vor.u32 %v2446_v38, %v2444_v13 }
 0x151   : > { %2926 = vrot.lane.b32.xlu2 %v2445_v17, %s5546_s17  ;;  %v1074_v18 = vpop.f32.mrf.mxu0 }
 0x152   : > { %v1465_v19 = vadd.f32 %v5689_v16, %v1074_v18  ;;  %v5876_v21 = vpop.f32.mrf.mxu2 }
 0x153   : > { %v2915_v22 = vpop.permute.xlu1 %2914 }
 0x154   : > { %v1601_v24 = vmax.f32 %v1465_v19, 0.0  ;;  %v3183_v25 = vsel %vm3175_vm4, %v5720_v1, %v2915_v22 }
 0x155   : > { %3678 = vmatmul.bf16.gmra.mxu1 %v3183_v25  ;;  %v5348_v25 = vld [vmem:[%s5642_s20 + $0xb0] sm:$0xff] }
 0x156   : > { %v1907_v27 = vpack.c.bf16 %v1601_v24, %v1601_v24 }
 0x158   : > { %v2170_v29 = vunpack.c.l.b16 %v1907_v27 }
 0x159   : > { %v1077_v31 = vpop.f32.mrf.mxu0 }
 0x15a   : > { %v5881_v32 = vpack.c.b16 %v2170_v29, %v2169_v28  ;;  %v5883_v33 = vpop.f32.mrf.mxu2  ;;  %v1466_v35 = vadd.f32 %v5689_v16, %v1077_v31 }
 0x15b   : > { %v2919_v8 = vpop.permute.xlu2 %2918 }
 0x15c   : > { %5126 = vmatmul.msk.bf16.gmra.mxu0 %vm788_vm1, %v5346_v30  ;;  %v3059_v37 = vrot.slane %v5881_v32, 1  ;;  %v2450_v1 = vshll.u32 %v5881_v32, 16  ;;  %v1602_v42 = vmax.f32 %v1466_v35, 0.0  ;;  %v2454_v0 = vshrl.u32 %v5881_v32, 16 }
 0x15d   : > { %v3189_v19 = vsel %vm3175_vm4, %v5746_v47, %v2919_v8 }
 0x15e   : > { %v3060_v10 = vsel %vm3038_vm3, %v3057_v44, %v3059_v37  ;;  %v2452_v41 = vrot.slane %v2450_v1, 1  ;;  %v1908_v46 = vpack.c.bf16 %v1602_v42, %v1602_v42 }
 0x15f   : > { %5235 = vmatmul.msk.bf16.gmra.mxu2 %vm3175_vm4, %v3060_v10 }
 0x160   : > { %v2453_v43 = vsel %vm2365_vm5, %v2448_v40, %v2452_v41  ;;  %v2171_v52 = vunpack.c.l.b16 %v1908_v46  ;;  %v2456_v44 = vor.u32 %v2454_v0, %v2452_v41 }
 0x161   : > { %2928 = vrot.lane.b32.xlu0 %v2453_v43, %s5546_s17  ;;  %v1079_v11 = vpop.f32.mrf.mxu0 }
 0x162   : > { %v1467_v34 = vadd.f32 %v5689_v16, %v1079_v11  ;;  %v5897_v45 = vpop.f32.mrf.mxu2 }
 0x163   : > { %v2917_v12 = vpop.permute.xlu1 %2916 }
 0x164   : > { %v1603_v49 = vmax.f32 %v1467_v34, 0.0  ;;  %v3186_v15 = vsel %vm3175_vm4, %v5733_v26, %v2917_v12 }
 0x165   : > { %3683 = vmatmul.bf16.gmra.mxu1 %v3186_v15 }
 0x166   : > { %v1909_v51 = vpack.c.bf16 %v1603_v49, %v1603_v49 }
 0x168   : > { %v2172_v53 = vunpack.c.l.b16 %v1909_v51 }
 0x169   : > { %v1082_v56 = vpop.f32.mrf.mxu0 }
 0x16a   : > { %v5902_v57 = vpack.c.b16 %v2172_v53, %v2171_v52  ;;  %v5904_v58 = vpop.f32.mrf.mxu2  ;;  %v1468_v59 = vadd.f32 %v5689_v16, %v1082_v56  ;;  %v5349_v52 = vld [vmem:[%s5642_s20 + $0xb8] sm:$0xff] }
 0x16b   : > { %v2921_v41 = vpop.permute.xlu2 %2920 }
 0x16c   : > { %5127 = vmatmul.msk.bf16.gmra.mxu0 %vm788_vm1, %v5347_v54  ;;  %v3061_v61 = vrot.slane %v5902_v57, 1  ;;  %v2458_v26 = vshll.u32 %v5902_v57, 16  ;;  %v1604_v6 = vmax.f32 %v1468_v59, 0.0  ;;  %v2462_v35 = vshrl.u32 %v5902_v57, 16 }
 0x16d   : > { %v3192_v46 = vsel %vm3175_vm4, %v5765_v5, %v2921_v41 }
 0x16e   : > { %v3062_v3 = vsel %vm3038_vm3, %v3059_v37, %v3061_v61  ;;  %v2460_v4 = vrot.slane %v2458_v26, 1  ;;  %v1910_v17 = vpack.c.bf16 %v1604_v6, %v1604_v6  ;;  %v5382_v37 = vld [vmem:[%s5642_s20 + $0x1c0] sm:$0xff]  ;;  %v5383_v26 = vld [vmem:[%s5642_s20 + $0x1c8] sm:$0xff] }
 0x16f   : > { %5236 = vmatmul.msk.bf16.gmra.mxu2 %vm3175_vm4, %v3062_v3  ;;  %5162 = vmatmul.msk.bf16.gmra.mxu3 %vm788_vm1, %v5382_v37 }
 0x170   : > { %v2461_v7 = vsel %vm2365_vm5, %v2456_v44, %v2460_v4  ;;  %v2173_v23 = vunpack.c.l.b16 %v1910_v17  ;;  %v2464_v1 = vor.u32 %v2462_v35, %v2460_v4 }
 0x171   : > { %2930 = vrot.lane.b32.xlu1 %v2461_v7, %s5546_s17  ;;  %v1084_v9 = vpop.f32.mrf.mxu0 }
 0x172   : > { %v1469_v13 = vadd.f32 %v5689_v16, %v1084_v9  ;;  %v5918_v14 = vpop.f32.mrf.mxu2 }
 0x174   : > { %v1605_v18 = vmax.f32 %v1469_v13, 0.0 }
 0x175   : > { %3688 = vmatmul.bf16.gmra.mxu1 %v3189_v19 }
 0x176   : > { %v1911_v22 = vpack.c.bf16 %v1605_v18, %v1605_v18 }
 0x178   : > { %v2174_v24 = vunpack.c.l.b16 %v1911_v22 }
 0x179   : > { %v1087_v27 = vpop.f32.mrf.mxu0 }
 0x17a   : > { %v5923_v28 = vpack.c.b16 %v2174_v24, %v2173_v23  ;;  %v5925_v29 = vpop.f32.mrf.mxu2  ;;  %v1470_v30 = vadd.f32 %v5689_v16, %v1087_v27 }
 0x17c   : > { %5128 = vmatmul.msk.bf16.gmra.mxu0 %vm788_vm1, %v5348_v25  ;;  %v3063_v31 = vrot.slane %v5923_v28, 1  ;;  %v2466_v47 = vshll.u32 %v5923_v28, 16  ;;  %v1606_v10 = vmax.f32 %v1470_v30, 0.0  ;;  %v5350_v25 = vld [vmem:[%s5642_s20 + $0xc0] sm:$0xff] }
 0x17e   : > { %v3064_v38 = vsel %vm3038_vm3, %v3061_v61, %v3063_v31  ;;  %v2468_v39 = vrot.slane %v2466_v47, 1  ;;  %v1912_v11 = vpack.c.bf16 %v1606_v10, %v1606_v10  ;;  %v2470_v61 = vshrl.u32 %v5923_v28, 16 }
 0x17f   : > { %5237 = vmatmul.msk.bf16.gmra.mxu2 %vm3175_vm4, %v3064_v38  ;;  %5163 = vmatmul.msk.bf16.gmra.mxu3 %vm788_vm1, %v5383_v26 }
 0x180   : > { %v2469_v40 = vsel %vm2365_vm5, %v2464_v1, %v2468_v39  ;;  %v2175_v15 = vunpack.c.l.b16 %v1912_v11  ;;  %v2472_v3 = vor.u32 %v2470_v61, %v2468_v39 }
 0x181   : > { %2932 = vrot.lane.b32.xlu2 %v2469_v40, %s5546_s17  ;;  %v1089_v42 = vpop.f32.mrf.mxu0 }
 0x182   : > { %v1471_v43 = vadd.f32 %v5689_v16, %v1089_v42  ;;  %v5939_v12 = vpop.f32.mrf.mxu2 }
 0x184   : > { %v1607_v34 = vmax.f32 %v1471_v43, 0.0 }
 0x185   : > { %3693 = vmatmul.bf16.gmra.mxu1 %v3192_v46 }
 0x186   : > { %v1913_v49 = vpack.c.bf16 %v1607_v34, %v1607_v34 }
 0x188   : > { %v2176_v51 = vunpack.c.l.b16 %v1913_v49 }
 0x189   : > { %v1092_v53 = vpop.f32.mrf.mxu0 }
 0x18a   : > { %v5944_v54 = vpack.c.b16 %v2176_v51, %v2175_v15  ;;  %v1472_v56 = vadd.f32 %v5689_v16, %v1092_v53  ;;  %v5952_v5 = vpop.f32.mrf.mxu2  ;;  %v5384_v15 = vld [vmem:[%s5642_s20 + $0x1d0] sm:$0xff]  ;;  %v5351_v53 = vld [vmem:[%s5642_s20 + $0xc8] sm:$0xff] }
 0x18c   : > { %5129 = vmatmul.msk.bf16.gmra.mxu0 %vm788_vm1, %v5349_v52  ;;  %v3065_v59 = vrot.slane %v5944_v54, 1  ;;  %v2474_v0 = vshll.u32 %v5944_v54, 16  ;;  %v1608_v4 = vmax.f32 %v1472_v56, 0.0  ;;  %v2478_v47 = vshrl.u32 %v5944_v54, 16 }
 0x18e   : > { %v3066_v2 = vsel %vm3038_vm3, %v3063_v31, %v3065_v59  ;;  %v2476_v44 = vrot.slane %v2474_v0, 1  ;;  %v1914_v13 = vpack.c.bf16 %v1608_v4, %v1608_v4 }
 0x18f   : > { %5238 = vmatmul.msk.bf16.gmra.mxu2 %vm3175_vm4, %v3066_v2  ;;  %5164 = vmatmul.msk.bf16.gmra.mxu3 %vm788_vm1, %v5384_v15 }
 0x190   : > { %v2477_v6 = vsel %vm2365_vm5, %v2472_v3, %v2476_v44  ;;  %v2177_v22 = vunpack.c.l.b16 %v1914_v13  ;;  %v2480_v38 = vor.u32 %v2478_v47, %v2476_v44  ;;  %v5385_v47 = vld [vmem:[%s5642_s20 + $0x1d8] sm:$0xff] }
 0x191   : > { %2934 = vrot.lane.b32.xlu0 %v2477_v6, %s5546_s17  ;;  %v1094_v7 = vpop.f32.mrf.mxu0 }
 0x192   : > { %v1473_v8 = vadd.f32 %v5689_v16, %v1094_v7  ;;  %v5962_v24 = vpop.f32.mrf.mxu2 }
 0x193   : > { %v2923_v9 = vpop.permute.xlu0 %2922 }
 0x194   : > { %v1609_v17 = vmax.f32 %v1473_v8, 0.0  ;;  %v3195_v18 = vsel %vm3175_vm4, %v5790_v36, %v2923_v9 }
 0x195   : > { %3698 = vmatmul.bf16.gmra.mxu1 %v3195_v18 }
 0x196   : > { %v1915_v19 = vpack.c.bf16 %v1609_v17, %v1609_v17 }
 0x198   : > { %v2178_v23 = vunpack.c.l.b16 %v1915_v19 }
 0x199   : > { %v1097_v27 = vpop.f32.mrf.mxu0 }
 0x19a   : > { %v5965_v30 = vpack.c.b16 %v2178_v23, %v2177_v22  ;;  %v1474_v31 = vadd.f32 %v5689_v16, %v1097_v27  ;;  %v5976_v42 = vpop.f32.mrf.mxu2  ;;  %v1268_v23 = vpop.f32.mrf.mxu3 }
 0x19c   : > { %5130 = vmatmul.msk.bf16.gmra.mxu0 %vm788_vm1, %v5350_v25  ;;  %v3067_v35 = vrot.slane %v5965_v30, 1  ;;  %v2482_v36 = vshll.u32 %v5965_v30, 16  ;;  %v1610_v39 = vmax.f32 %v1474_v31, 0.0  ;;  %v2925_v40 = vpop.permute.xlu1 %2924  ;;  %v2486_v2 = vshrl.u32 %v5965_v30, 16 }
 0x19d   : > { %v3198_v46 = vsel %vm3175_vm4, %v5812_v60, %v2925_v40 }
 0x19e   : > { %v3068_v37 = vsel %vm3038_vm3, %v3065_v59, %v3067_v35  ;;  %v2484_v1 = vrot.slane %v2482_v36, 1  ;;  %v1916_v11 = vpack.c.bf16 %v1610_v39, %v1610_v39 }
 0x19f   : > { %5239 = vmatmul.msk.bf16.gmra.mxu2 %vm3175_vm4, %v3068_v37  ;;  %5165 = vmatmul.msk.bf16.gmra.mxu3 %vm788_vm1, %v5385_v47 }
 0x1a0   : > { %v2485_v10 = vsel %vm2365_vm5, %v2480_v38, %v2484_v1  ;;  %v2179_v51 = vunpack.c.l.b16 %v1916_v11  ;;  %v2488_v6 = vor.u32 %v2486_v2, %v2484_v1  ;;  %v5352_v38 = vld [vmem:[%s5642_s20 + $0xd0] sm:$0xff]  ;;  %v6010_v1 = vld [vmem:[%s7487_s4] ss:$0 sm:$0xff] }
 0x1a1   : > { %2936 = vrot.lane.b32.xlu1 %v2485_v10, %s5546_s17  ;;  %v1099_v41 = vpop.f32.mrf.mxu0 }
 0x1a2   : > { %v1475_v43 = vadd.f32 %v5689_v16, %v1099_v41  ;;  %v5987_v0 = vpop.f32.mrf.mxu2  ;;  %v1540_v41 = vadd.f32 %v5689_v16, %v1268_v23  ;;  %v1270_v11 = vpop.f32.mrf.mxu3 }
 0x1a4   : > { %v1611_v34 = vmax.f32 %v1475_v43, 0.0 }
 0x1a5   : > { %3703 = vmatmul.bf16.gmra.mxu1 %v3198_v46 }
 0x1a6   : > { %v1917_v49 = vpack.c.bf16 %v1611_v34, %v1611_v34  ;;  %v1676_v34 = vmax.f32 %v1540_v41, 0.0 }
 0x1a8   : > { %v2180_v52 = vunpack.c.l.b16 %v1917_v49 }
 0x1a9   : > { %v1102_v56 = vpop.f32.mrf.mxu0 }
 0x1aa   : > { %v5984_v59 = vpack.c.b16 %v2180_v52, %v2179_v51  ;;  %v1476_v61 = vadd.f32 %v5689_v16, %v1102_v56  ;;  %v1982_v52 = vpack.c.bf16 %v1676_v34, %v1676_v34 }
 0x1ab   : > { %v2927_v17 = vpop.permute.xlu2 %2926 }
 0x1ac   : > { %v1612_v26 = vmax.f32 %v1476_v61, 0.0  ;;  %5131 = vmatmul.msk.bf16.gmra.mxu0 %vm788_vm1, %v5351_v53  ;;  %v3069_v60 = vrot.slane %v5984_v59, 1  ;;  %v2490_v3 = vshll.u32 %v5984_v59, 16  ;;  %v3201_v25 = vsel %vm3175_vm4, %v5850_v48, %v2927_v17 }
 0x1ad   : > { %v2494_v31 = vshrl.u32 %v5984_v59, 16  ;;  %v1541_v53 = vadd.f32 %v5689_v16, %v1270_v11 }
 0x1ae   : > { %v1782_v44 = vsel %vm1421_vm6, %v1612_v26, 0.0  ;;  %v3070_v4 = vsel %vm3038_vm3, %v3067_v35, %v3069_v60  ;;  %v2492_v7 = vrot.slane %v2490_v3, 1  ;;  %v6002_v35 = vpop.f32.mrf.mxu2 }
 0x1af   : > { %v1918_v8 = vpack.c.bf16 %v1782_v44, %v1782_v44  ;;  %5240 = vmatmul.msk.bf16.gmra.mxu2 %vm3175_vm4, %v3070_v4  ;;  %v1273_v4 = vpop.f32.mrf.mxu3 }
 0x1b0   : > { %v2493_v9 = vsel %vm2365_vm5, %v2488_v6, %v2492_v7  ;;  %v2496_v36 = vor.u32 %v2494_v31, %v2492_v7  ;;  %v2241_v6 = vunpack.c.l.b16 %v1982_v52  ;;  %v1542_v23 = vadd.f32 %v5689_v16, %v1273_v4 }
 0x1b1   : > { %v2350_v13 = vunpack.c.l.b16 %v1918_v8  ;;  %2938 = vrot.lane.b32.xlu2 %v2493_v9, %s5546_s17  ;;  %v1104_v18 = vpop.f32.mrf.mxu0 }
 0x1b2   : > { %v3669_v19 = vpop.f32.mrf.mxu1  ;;  %v5386_v18 = vld [vmem:[%s5642_s20 + $0x1e0] sm:$0xff] }
 0x1b3   : > { %v2358_v22 = vpack.c.b16 %v2350_v13, %v2350_v13  ;;  %v3670_v46 = vadd.f32 %v6010_v1, %v3669_v19  ;;  %5166 = vmatmul.msk.bf16.gmra.mxu3 %vm788_vm1, %v5386_v18  ;;  %v5387_v18 = vld [vmem:[%s5642_s20 + $0x1e8] sm:$0xff] }
 0x1b5   : > { %v2498_v27 = vshll.u32 %v2358_v22, 16  ;;  %3708 = vmatmul.bf16.gmra.mxu1 %v3201_v25  ;;  %v3071_v10 = vrot.slane %v2358_v22, 1  ;;  %v3999_v56 = vadd.f32 %v5853_v50, %v3670_v46  ;;  %v5353_v25 = vld [vmem:[%s5642_s20 + $0xd8] sm:$0xff] }
 0x1b6   : > { %v6021_v51 = vpop.f32.mrf.mxu2 }
 0x1b7   : > { %v2500_v37 = vrot.slane %v2498_v27, 1  ;;  %v3072_v49 = vsel %vm3038_vm3, %v3069_v60, %v3071_v10  ;;  %v1677_v60 = vmax.f32 %v1541_v53, 0.0  ;;  %v4318_v8 = vmax.f32 %v3999_v56, 0.0  ;;  %v1275_v10 = vpop.f32.mrf.mxu3 }
 0x1b9   : > { %v1106_v39 = vpop.f32.mrf.mxu0  ;;  %v2501_v48 = vsel %vm2365_vm5, %v2496_v36, %v2500_v37  ;;  %v1983_v7 = vpack.c.bf16 %v1677_v60, %v1677_v60 }
 0x1ba   : > { %v3671_v40 = vpop.f32.mrf.mxu1  ;;  %2940 = vrot.lane.b32.xlu0 %v2501_v48, %s5546_s17  ;;  %v1477_v61 = vadd.f32 %v5689_v16, %v1106_v39  ;;  %v1678_v48 = vmax.f32 %v1542_v23, 0.0 }
 0x1bb   : > { %v3672_v43 = vadd.f32 %v6010_v1, %v3671_v40  ;;  %v2242_v17 = vunpack.c.l.b16 %v1983_v7 }
 0x1bc   : > { %5132 = vmatmul.msk.bf16.gmra.mxu0 %vm788_vm1, %v5352_v38  ;;  %v1613_v9 = vmax.f32 %v1477_v61, 0.0  ;;  %v1984_v34 = vpack.c.bf16 %v1678_v48, %v1678_v48 }
 0x1bd   : > { %v4001_v15 = vadd.f32 %v5861_v63, %v3672_v43  ;;  %v6032_v27 = vpack.c.b16 %v2242_v17, %v2241_v6 }
 0x1be   : > { %v1783_v31 = vsel %vm1388_vm2, %v1613_v9, 0.0  ;;  %v6037_v37 = vpop.f32.mrf.mxu2 }
 0x1bf   : > { %5241 = vmatmul.msk.bf16.gmra.mxu2 %vm3175_vm4, %v3072_v49  ;;  %v4319_v44 = vmax.f32 %v4001_v15, 0.0  ;;  %7508 = vst [vmem:[#allocation5_spill] sm:$0xff] %v6032_v27  ;;  %v1919_v40 = vpack.c.bf16 %v1783_v31, %v1783_v31  ;;  %v5354_v31 = vld [vmem:[%s5642_s20 + $0xe0] sm:$0xff] }
 0x1c1   : > { %v1108_v26 = vpop.f32.mrf.mxu0  ;;  %v4446_v19 = vmax.f32 %v4318_v8, %v4319_v44  ;;  %v2181_v46 = vunpack.c.l.b16 %v1919_v40 }
 0x1c2   : > { %v1478_v2 = vadd.f32 %v5689_v16, %v1108_v26  ;;  %v3674_v3 = vpop.f32.mrf.mxu1  ;;  %v6043_v16 = vld [vmem:[%s7485_s2] ss:$0 sm:$0xff] }
 0x1c3   : > { %v3675_v63 = vadd.f32 %v6010_v1, %v3674_v3  ;;  %v1543_v15 = vadd.f32 %v6043_v16, %v1275_v10  ;;  %5167 = vmatmul.msk.bf16.gmra.mxu3 %vm788_vm1, %v5387_v18  ;;  %v5388_v18 = vld [vmem:[%s5642_s20 + $0x1f0] sm:$0xff] }
 0x1c4   : > { %v1614_v50 = vmax.f32 %v1478_v2, 0.0 }
 0x1c5   : > { %v4004_v13 = vadd.f32 %v5876_v21, %v3675_v63  ;;  %v1679_v2 = vmax.f32 %v1543_v15, 0.0  ;;  %v6055_v63 = vpop.f32.mrf.mxu3 }
 0x1c6   : > { %v1920_v21 = vpack.c.bf16 %v1614_v50, %v1614_v50  ;;  %7509 = vst [vmem:[#allocation6_spill] sm:$0xff] %v6055_v63 }
 0x1c7   : > { %v4320_v22 = vmax.f32 %v4004_v13, 0.0  ;;  %v1985_v8 = vpack.c.bf16 %v1679_v2, %v1679_v2 }
 0x1c8   : > { %v2182_v43 = vunpack.c.l.b16 %v1920_v21 }
 0x1c9   : > { %v4447_v47 = vmax.f32 %v4446_v19, %v4320_v22  ;;  %v1111_v36 = vpop.f32.mrf.mxu0  ;;  %v2244_v17 = vunpack.c.l.b16 %v1985_v8 }
 0x1ca   : > { %v3676_v38 = vpop.f32.mrf.mxu1  ;;  %v1479_v41 = vadd.f32 %v6043_v16, %v1111_v36  ;;  %v6049_v53 = vpack.c.b16 %v2182_v43, %v2181_v46 }
 0x1cb   : > { %v3677_v39 = vadd.f32 %v6010_v1, %v3676_v38 }
 0x1cc   : > { %5133 = vmatmul.msk.bf16.gmra.mxu0 %vm788_vm1, %v5353_v25  ;;  %v1615_v49 = vmax.f32 %v1479_v41, 0.0  ;;  %v2505_v50 = vshll.u32 %v6049_v53, 16 }
 0x1cd   : > { %v4006_v11 = vadd.f32 %v5883_v33, %v3677_v39  ;;  %v2243_v33 = vunpack.c.l.b16 %v1984_v34  ;;  %v1280_v40 = vpop.f32.mrf.mxu3 }
 0x1ce   : > { %v1921_v4 = vpack.c.bf16 %v1615_v49, %v1615_v49  ;;  %v2507_v48 = vrot.slane %v2505_v50, 1 }
 0x1cf   : > { %v4321_v3 = vmax.f32 %v4006_v11, 0.0  ;;  %v6063_v36 = vpack.c.b16 %v2244_v17, %v2243_v33  ;;  %v2503_v11 = vshrl.u32 %v6049_v53, 16 }
 0x1d0   : > { %v2183_v23 = vunpack.c.l.b16 %v1921_v4 }
 0x1d1   : > { %v1113_v52 = vpop.f32.mrf.mxu0  ;;  %v4448_v19 = vmax.f32 %v4447_v47, %v4321_v3  ;;  %7510 = vst [vmem:[#allocation7_spill] sm:$0xff] %v6063_v36  ;;  %v3073_v47 = vrot.slane %v6049_v53, 1  ;;  %v2508_v49 = vor.u32 %v2507_v48, %v2503_v11 }
 0x1d2   : > { %v1480_v56 = vadd.f32 %v6043_v16, %v1113_v52  ;;  %v3679_v61 = vpop.f32.mrf.mxu1  ;;  %v6052_v26 = vpop.f32.mrf.mxu2 }
 0x1d3   : > { %v3680_v60 = vadd.f32 %v6010_v1, %v3679_v61  ;;  %v2929_v44 = vpop.permute.xlu0 %2928  ;;  %5168 = vmatmul.msk.bf16.gmra.mxu3 %vm788_vm1, %v5388_v18 }
 0x1d4   : > { %v1616_v6 = vmax.f32 %v1480_v56, 0.0  ;;  %v3204_v7 = vsel %vm3175_vm4, %v5859_v62, %v2929_v44 }
 0x1d5   : > { %v4009_v9 = vadd.f32 %v5897_v45, %v3680_v60  ;;  %3713 = vmatmul.bf16.gmra.mxu1 %v3204_v7 }
 0x1d6   : > { %v1922_v13 = vpack.c.bf16 %v1616_v6, %v1616_v6 }
 0x1d7   : > { %v4322_v22 = vmax.f32 %v4009_v9, 0.0 }
 0x1d8   : > { %v2184_v25 = vunpack.c.l.b16 %v1922_v13 }
 0x1d9   : > { %v4449_v21 = vmax.f32 %v4448_v19, %v4322_v22  ;;  %v1116_v62 = vpop.f32.mrf.mxu0 }
 0x1da   : > { %v6066_v38 = vpack.c.b16 %v2184_v25, %v2183_v23  ;;  %v3681_v45 = vpop.f32.mrf.mxu1  ;;  %v6068_v39 = vpop.f32.mrf.mxu2  ;;  %v1481_v41 = vadd.f32 %v6043_v16, %v1116_v62 }
 0x1db   : > { %v3682_v10 = vadd.f32 %v6010_v1, %v3681_v45 }
 0x1dc   : > { %5134 = vmatmul.msk.bf16.gmra.mxu0 %vm788_vm1, %v5354_v31  ;;  %v3074_v43 = vrot.slane %v6066_v38, 1  ;;  %v2510_v34 = vshll.u32 %v6066_v38, 16  ;;  %v1617_v56 = vmax.f32 %v1481_v41, 0.0  ;;  %v5355_v31 = vld [vmem:[%s5642_s20 + $0xe8] sm:$0xff]  ;;  %v2514_v11 = vshrl.u32 %v6066_v38, 16 }
 0x1dd   : > { %v4011_v52 = vadd.f32 %v5904_v58, %v3682_v10  ;;  %v1282_v58 = vpop.f32.mrf.mxu3 }
 0x1de   : > { %v3075_v46 = vsel %vm3038_vm3, %v3073_v47, %v3074_v43  ;;  %v2512_v15 = vrot.slane %v2510_v34, 1  ;;  %v1923_v7 = vpack.c.bf16 %v1617_v56, %v1617_v56  ;;  %v1545_v50 = vadd.f32 %v6043_v16, %v1282_v58 }
 0x1df   : > { %5242 = vmatmul.msk.bf16.gmra.mxu2 %vm3175_vm4, %v3075_v46  ;;  %v4323_v33 = vmax.f32 %v4011_v52, 0.0 }
 0x1e0   : > { %v2513_v61 = vsel %vm2365_vm5, %v2508_v49, %v2512_v15  ;;  %v2185_v23 = vunpack.c.l.b16 %v1923_v7  ;;  %v1681_v48 = vmax.f32 %v1545_v50, 0.0  ;;  %v2516_v52 = vor.u32 %v2514_v11, %v2512_v15 }
 0x1e1   : > { %2942 = vrot.lane.b32.xlu1 %v2513_v61, %s5546_s17  ;;  %v1118_v2 = vpop.f32.mrf.mxu0  ;;  %v4450_v19 = vmax.f32 %v4449_v21, %v4323_v33 }
 0x1e2   : > { %v1482_v3 = vadd.f32 %v6043_v16, %v1118_v2  ;;  %v3684_v60 = vpop.f32.mrf.mxu1  ;;  %v6083_v44 = vpop.f32.mrf.mxu2  ;;  %v1851_v46 = vsel %vm1388_vm2, %v1681_v48, 0.0 }
 0x1e3   : > { %v3685_v4 = vadd.f32 %v6010_v1, %v3684_v60  ;;  %v2931_v6 = vpop.permute.xlu1 %2930  ;;  %v2933_v2 = vpop.permute.xlu2 %2932  ;;  %v1987_v33 = vpack.c.bf16 %v1851_v46, %v1851_v46 }
 0x1e4   : > { %v1618_v8 = vmax.f32 %v1482_v3, 0.0  ;;  %v3207_v9 = vsel %vm3175_vm4, %v5881_v32, %v2931_v6 }
 0x1e5   : > { %v4014_v13 = vadd.f32 %v5918_v14, %v3685_v4  ;;  %3718 = vmatmul.bf16.gmra.mxu1 %v3207_v9  ;;  %v1284_v40 = vpop.f32.mrf.mxu3  ;;  %v3210_v9 = vsel %vm3175_vm4, %v5902_v57, %v2933_v2  ;;  %v2245_v18 = vunpack.c.l.b16 %v1987_v33 }
 0x1e6   : > { %v1924_v17 = vpack.c.bf16 %v1618_v8, %v1618_v8  ;;  %v1546_v4 = vadd.f32 %v6043_v16, %v1284_v40 }
 0x1e7   : > { %v4324_v22 = vmax.f32 %v4014_v13, 0.0 }
 0x1e8   : > { %v2186_v25 = vunpack.c.l.b16 %v1924_v17  ;;  %v1682_v7 = vmax.f32 %v1546_v4, 0.0 }
 0x1e9   : > { %v4451_v62 = vmax.f32 %v4450_v19, %v4324_v22  ;;  %v1121_v45 = vpop.f32.mrf.mxu0 }
 0x1ea   : > { %v6093_v10 = vpack.c.b16 %v2186_v25, %v2185_v23  ;;  %v3686_v32 = vpop.f32.mrf.mxu1  ;;  %v6095_v47 = vpop.f32.mrf.mxu2  ;;  %v1483_v41 = vadd.f32 %v6043_v16, %v1121_v45  ;;  %v1988_v19 = vpack.c.bf16 %v1682_v7, %v1682_v7 }
 0x1eb   : > { %v3687_v14 = vadd.f32 %v6010_v1, %v3686_v32 }
 0x1ec   : > { %5135 = vmatmul.msk.bf16.gmra.mxu0 %vm788_vm1, %v5355_v31  ;;  %v3076_v21 = vrot.slane %v6093_v10, 1  ;;  %v2518_v34 = vshll.u32 %v6093_v10, 16  ;;  %v1619_v3 = vmax.f32 %v1483_v41, 0.0  ;;  %v2246_v25 = vunpack.c.l.b16 %v1988_v19  ;;  %v5389_v31 = vld [vmem:[%s5642_s20 + $0x1f8] sm:$0xff]  ;;  %v5356_v41 = vld [vmem:[%s5642_s20 + $0xf0] sm:$0xff] }
 0x1ed   : > { %v4016_v61 = vadd.f32 %v5925_v29, %v3687_v14  ;;  %v1287_v13 = vpop.f32.mrf.mxu3  ;;  %5169 = vmatmul.msk.bf16.gmra.mxu3 %vm788_vm1, %v5389_v31 }
 0x1ee   : > { %v3077_v49 = vsel %vm3038_vm3, %v3074_v43, %v3076_v21  ;;  %v2520_v56 = vrot.slane %v2518_v34, 1  ;;  %v1925_v50 = vpack.c.bf16 %v1619_v3, %v1619_v3  ;;  %v1547_v32 = vadd.f32 %v6043_v16, %v1287_v13 }
 0x1ef   : > { %5243 = vmatmul.msk.bf16.gmra.mxu2 %vm3175_vm4, %v3077_v49  ;;  %v4325_v29 = vmax.f32 %v4016_v61, 0.0  ;;  %v6121_v57 = vpack.c.b16 %v2246_v25, %v2245_v18 }
 0x1f0   : > { %v2521_v60 = vsel %vm2365_vm5, %v2516_v52, %v2520_v56  ;;  %v2187_v14 = vunpack.c.l.b16 %v1925_v50 }
 0x1f1   : > { %2944 = vrot.lane.b32.xlu2 %v2521_v60, %s5546_s17  ;;  %v1123_v6 = vpop.f32.mrf.mxu0  ;;  %v4452_v45 = vmax.f32 %v4451_v62, %v4325_v29  ;;  %7511 = vst [vmem:[#allocation8_spill] sm:$0xff] %v6121_v57  ;;  %v1683_v62 = vmax.f32 %v1547_v32, 0.0  ;;  %v2522_v60 = vshrl.u32 %v6093_v10, 16 }
 0x1f2   : > { %v1484_v58 = vadd.f32 %v6043_v16, %v1123_v6  ;;  %v3689_v43 = vpop.f32.mrf.mxu1  ;;  %v6112_v15 = vpop.f32.mrf.mxu2 }
 0x1f3   : > { %v3690_v8 = vadd.f32 %v6010_v1, %v3689_v43  ;;  %v2524_v6 = vor.u32 %v2522_v60, %v2520_v56  ;;  %v1989_v7 = vpack.c.bf16 %v1683_v62, %v1683_v62 }
 0x1f4   : > { %v1620_v17 = vmax.f32 %v1484_v58, 0.0 }
 0x1f5   : > { %v4019_v22 = vadd.f32 %v5939_v12, %v3690_v8  ;;  %3723 = vmatmul.bf16.gmra.mxu1 %v3210_v9  ;;  %v1289_v61 = vpop.f32.mrf.mxu3 }
 0x1f6   : > { %v1926_v23 = vpack.c.bf16 %v1620_v17, %v1620_v17  ;;  %v1548_v9 = vadd.f32 %v6043_v16, %v1289_v61  ;;  %v5357_v61 = vld [vmem:[%s5642_s20 + $0xf8] sm:$0xff] }
 0x1f7   : > { %v4326_v48 = vmax.f32 %v4019_v22, 0.0  ;;  %v2247_v22 = vunpack.c.l.b16 %v1989_v7 }
 0x1f8   : > { %v2188_v40 = vunpack.c.l.b16 %v1926_v23  ;;  %v1684_v56 = vmax.f32 %v1548_v9, 0.0 }
 0x1f9   : > { %v4453_v11 = vmax.f32 %v4452_v45, %v4326_v48  ;;  %v1126_v34 = vpop.f32.mrf.mxu0 }
 0x1fa   : > { %v6124_v46 = vpack.c.b16 %v2188_v40, %v2187_v14  ;;  %v3691_v12 = vpop.f32.mrf.mxu1  ;;  %v6126_v49 = vpop.f32.mrf.mxu2  ;;  %v1485_v2 = vadd.f32 %v6043_v16, %v1126_v34  ;;  %v1990_v45 = vpack.c.bf16 %v1684_v56, %v1684_v56 }
 0x1fb   : > { %v3692_v52 = vadd.f32 %v6010_v1, %v3691_v12 }
 0x1fc   : > { %5136 = vmatmul.msk.bf16.gmra.mxu0 %vm788_vm1, %v5356_v41  ;;  %v3078_v3 = vrot.slane %v6124_v46, 1  ;;  %v2526_v33 = vshll.u32 %v6124_v46, 16  ;;  %v1621_v29 = vmax.f32 %v1485_v2, 0.0  ;;  %v2248_v40 = vunpack.c.l.b16 %v1990_v45  ;;  %v5390_v41 = vld [vmem:[%s5642_s20 + $0x200] sm:$0xff] }
 0x1fd   : > { %v4021_v43 = vadd.f32 %v5952_v5, %v3692_v52  ;;  %v6147_v32 = vpop.f32.mrf.mxu3  ;;  %5170 = vmatmul.msk.bf16.gmra.mxu3 %vm788_vm1, %v5390_v41  ;;  %v2530_v7 = vshrl.u32 %v6124_v46, 16 }
 0x1fe   : > { %v3079_v4 = vsel %vm3038_vm3, %v3076_v21, %v3078_v3  ;;  %v2528_v58 = vrot.slane %v2526_v33, 1  ;;  %v1927_v23 = vpack.c.bf16 %v1621_v29, %v1621_v29  ;;  %v6151_v2 = vpack.c.b16 %v2248_v40, %v2247_v22  ;;  %v5391_v40 = vld [vmem:[%s5642_s20 + $0x208] sm:$0xff] }
 0x1ff   : > { %5244 = vmatmul.msk.bf16.gmra.mxu2 %vm3175_vm4, %v3079_v4  ;;  %v4327_v18 = vmax.f32 %v4021_v43, 0.0 }
 0x200   : > { %v2529_v8 = vsel %vm2365_vm5, %v2524_v6, %v2528_v58  ;;  %v2189_v52 = vunpack.c.l.b16 %v1927_v23  ;;  %7512 = vst [vmem:[#allocation9_spill] sm:$0xff] %v6151_v2  ;;  %v2532_v9 = vor.u32 %v2530_v7, %v2528_v58 }
 0x201   : > { %2946 = vrot.lane.b32.xlu0 %v2529_v8, %s5546_s17  ;;  %v1128_v13 = vpop.f32.mrf.mxu0  ;;  %v4454_v34 = vmax.f32 %v4453_v11, %v4327_v18 }
 0x202   : > { %v1486_v50 = vadd.f32 %v6043_v16, %v1128_v13  ;;  %v3694_v17 = vpop.f32.mrf.mxu1  ;;  %v6141_v21 = vpop.f32.mrf.mxu2 }
 0x203   : > { %v3695_v5 = vadd.f32 %v6010_v1, %v3694_v17  ;;  %v2935_v19 = vpop.permute.xlu0 %2934 }
 0x204   : > { %v1622_v25 = vmax.f32 %v1486_v50, 0.0  ;;  %v3213_v31 = vsel %vm3175_vm4, %v5923_v28, %v2935_v19 }
 0x205   : > { %v4024_v48 = vadd.f32 %v5962_v24, %v3695_v5  ;;  %3728 = vmatmul.bf16.gmra.mxu1 %v3213_v31  ;;  %v1294_v17 = vpop.f32.mrf.mxu3 }
 0x206   : > { %v1928_v14 = vpack.c.bf16 %v1622_v25, %v1622_v25 }
 0x207   : > { %v4328_v12 = vmax.f32 %v4024_v48, 0.0 }
 0x208   : > { %v2190_v62 = vunpack.c.l.b16 %v1928_v14 }
 0x209   : > { %v4455_v60 = vmax.f32 %v4454_v34, %v4328_v12  ;;  %v1131_v28 = vpop.f32.mrf.mxu0 }
 0x20a   : > { %v6154_v33 = vpack.c.b16 %v2190_v62, %v2189_v52  ;;  %v3696_v24 = vpop.f32.mrf.mxu1  ;;  %v6156_v4 = vpop.f32.mrf.mxu2  ;;  %v1487_v43 = vadd.f32 %v6043_v16, %v1131_v28  ;;  %v5358_v62 = vld [vmem:[%s5642_s20 + $0x100] sm:$0xff] }
 0x20b   : > { %v3697_v6 = vadd.f32 %v6010_v1, %v3696_v24 }
 0x20c   : > { %5137 = vmatmul.msk.bf16.gmra.mxu0 %vm788_vm1, %v5357_v61  ;;  %v3080_v11 = vrot.slane %v6154_v33, 1  ;;  %v2534_v29 = vshll.u32 %v6154_v33, 16  ;;  %v1623_v56 = vmax.f32 %v1487_v43, 0.0  ;;  %v2538_v7 = vshrl.u32 %v6154_v33, 16 }
 0x20d   : > { %v4026_v50 = vadd.f32 %v5976_v42, %v3697_v6  ;;  %5171 = vmatmul.msk.bf16.gmra.mxu3 %vm788_vm1, %v5391_v40  ;;  %v1297_v24 = vpop.f32.mrf.mxu3  ;;  %v1550_v40 = vadd.f32 %v6043_v16, %v1294_v17 }
 0x20e   : > { %v3081_v8 = vsel %vm3038_vm3, %v3078_v3, %v3080_v11  ;;  %v2536_v13 = vrot.slane %v2534_v29, 1  ;;  %v1929_v25 = vpack.c.bf16 %v1623_v56, %v1623_v56 }
 0x20f   : > { %5245 = vmatmul.msk.bf16.gmra.mxu2 %vm3175_vm4, %v3081_v8  ;;  %v4329_v23 = vmax.f32 %v4026_v50, 0.0 }
 0x210   : > { %v2537_v18 = vsel %vm2365_vm5, %v2532_v9, %v2536_v13  ;;  %v2191_v12 = vunpack.c.l.b16 %v1929_v25  ;;  %v2540_v50 = vor.u32 %v2538_v7, %v2536_v13  ;;  %v1686_v7 = vmax.f32 %v1550_v40, 0.0 }
 0x211   : > { %2948 = vrot.lane.b32.xlu1 %v2537_v18, %s5546_s17  ;;  %v1133_v5 = vpop.f32.mrf.mxu0  ;;  %v4456_v41 = vmax.f32 %v4455_v60, %v4329_v23 }
 0x212   : > { %v1488_v19 = vadd.f32 %v6043_v16, %v1133_v5  ;;  %v3699_v22 = vpop.f32.mrf.mxu1  ;;  %v6171_v31 = vpop.f32.mrf.mxu2 }
 0x213   : > { %v3700_v3 = vadd.f32 %v6010_v1, %v3699_v22  ;;  %v2937_v58 = vpop.permute.xlu1 %2936  ;;  %v2939_v22 = vpop.permute.xlu2 %2938 }
 0x214   : > { %v1624_v42 = vmax.f32 %v1488_v19, 0.0  ;;  %v3216_v45 = vsel %vm3175_vm4, %v5944_v54, %v2937_v58 }
 0x215   : > { %v4029_v48 = vadd.f32 %v5987_v0, %v3700_v3  ;;  %3733 = vmatmul.bf16.gmra.mxu1 %v3216_v45  ;;  %v1299_v13 = vpop.f32.mrf.mxu3 }
 0x216   : > { %v1930_v14 = vpack.c.bf16 %v1624_v42, %v1624_v42  ;;  %v1552_v17 = vadd.f32 %v6043_v16, %v1299_v13 }
 0x217   : > { %v4330_v34 = vmax.f32 %v4029_v48, 0.0  ;;  %v3219_v48 = vsel %vm3175_vm4, %v5965_v30, %v2939_v22  ;;  %v1992_v22 = vpack.c.bf16 %v1686_v7, %v1686_v7 }
 0x218   : > { %v2192_v52 = vunpack.c.l.b16 %v1930_v14 }
 0x219   : > { %v4457_v61 = vmax.f32 %v4456_v41, %v4330_v34  ;;  %v1136_v28 = vpop.f32.mrf.mxu0  ;;  %v5392_v41 = vld [vmem:[%s5642_s20 + $0x210] sm:$0xff] }
 0x21a   : > { %v6179_v6 = vpack.c.b16 %v2192_v52, %v2191_v12  ;;  %v3701_v43 = vpop.f32.mrf.mxu1  ;;  %v1489_v0 = vadd.f32 %v6043_v16, %v1136_v28  ;;  %v6187_v8 = vpop.f32.mrf.mxu2 }
 0x21b   : > { %v3702_v54 = vadd.f32 %v6010_v1, %v3701_v43 }
 0x21c   : > { %5138 = vmatmul.msk.bf16.gmra.mxu0 %vm788_vm1, %v5358_v62  ;;  %v3082_v60 = vrot.slane %v6179_v6, 1  ;;  %v2542_v29 = vshll.u32 %v6179_v6, 16  ;;  %v1625_v5 = vmax.f32 %v1489_v0, 0.0  ;;  %v5359_v0 = vld [vmem:[%s5642_s20 + $0x108] sm:$0xff] }
 0x21d   : > { %v4031_v18 = vadd.f32 %v6002_v35, %v3702_v54  ;;  %v1549_v35 = vadd.f32 %v6043_v16, %v6147_v32  ;;  %5172 = vmatmul.msk.bf16.gmra.mxu3 %vm788_vm1, %v5392_v41 }
 0x21e   : > { %v3083_v9 = vsel %vm3038_vm3, %v3080_v11, %v3082_v60  ;;  %v2544_v56 = vrot.slane %v2542_v29, 1  ;;  %v1931_v42 = vpack.c.bf16 %v1625_v5, %v1625_v5 }
 0x21f   : > { %5246 = vmatmul.msk.bf16.gmra.mxu2 %vm3175_vm4, %v3083_v9  ;;  %v4331_v25 = vmax.f32 %v4031_v18, 0.0  ;;  %v1685_v28 = vmax.f32 %v1549_v35, 0.0  ;;  %v2546_v18 = vshrl.u32 %v6179_v6, 16  ;;  %v2250_v35 = vunpack.c.l.b16 %v1992_v22 }
 0x220   : > { %v2545_v19 = vsel %vm2365_vm5, %v2540_v50, %v2544_v56  ;;  %v2193_v62 = vunpack.c.l.b16 %v1931_v42 }
 0x221   : > { %2950 = vrot.lane.b32.xlu2 %v2545_v19, %s5546_s17  ;;  %v1138_v23 = vpop.f32.mrf.mxu0  ;;  %v4458_v12 = vmax.f32 %v4457_v61, %v4331_v25  ;;  %v6213_v61 = vpop.f32.mrf.mxu3  ;;  %v1991_v19 = vpack.c.bf16 %v1685_v28, %v1685_v28 }
 0x222   : > { %v1490_v3 = vadd.f32 %v6043_v16, %v1138_v23  ;;  %v3704_v58 = vpop.f32.mrf.mxu1  ;;  %v6203_v54 = vpop.f32.mrf.mxu2 }
 0x223   : > { %v3705_v11 = vadd.f32 %v6010_v1, %v3704_v58  ;;  %v2548_v58 = vor.u32 %v2546_v18, %v2544_v56  ;;  %v2249_v42 = vunpack.c.l.b16 %v1991_v19 }
 0x224   : > { %v1626_v45 = vmax.f32 %v1490_v3, 0.0 }
 0x225   : > { %v4034_v14 = vadd.f32 %v6021_v51, %v3705_v11  ;;  %3738 = vmatmul.bf16.gmra.mxu1 %v3219_v48  ;;  %v1551_v51 = vadd.f32 %v6043_v16, %v1297_v24  ;;  %v1688_v24 = vmax.f32 %v1552_v17, 0.0  ;;  %v6233_v28 = vpack.c.b16 %v2250_v35, %v2249_v42  ;;  %v5360_v17 = vld [vmem:[%s5642_s20 + $0x110] sm:$0xff] }
 0x226   : > { %v1932_v34 = vpack.c.bf16 %v1626_v45, %v1626_v45 }
 0x227   : > { %v4332_v52 = vmax.f32 %v4034_v14, 0.0  ;;  %v1687_v23 = vmax.f32 %v1551_v51, 0.0  ;;  %v1994_v40 = vpack.c.bf16 %v1688_v24, %v1688_v24  ;;  %7513 = vst [vmem:[#allocation10_spill] sm:$0xff] %v6233_v28  ;;  %v2794_v35 = vshrl.u32 %v6233_v28, 16 }
 0x228   : > { %v2194_v43 = vunpack.c.l.b16 %v1932_v34 }
 0x229   : > { %v6207_v32 = vmax.f32 %v4458_v12, %v4332_v52  ;;  %v1141_v30 = vpop.f32.mrf.mxu0  ;;  %v1993_v48 = vpack.c.bf16 %v1687_v23, %v1687_v23  ;;  %v6227_v56 = vpop.f32.mrf.mxu3 }
 0x22a   : > { %v6211_v29 = vpack.c.b16 %v2194_v43, %v2193_v62  ;;  %v1491_v9 = vadd.f32 %v6043_v16, %v1141_v30  ;;  %v6224_v41 = vpop.f32.mrf.mxu2  ;;  %v6229_v12 = vpop.f32.mrf.mxu1 }
 0x22b   : > { %v2251_v43 = vunpack.c.l.b16 %v1993_v48 }
 0x22c   : > { %5139 = vmatmul.msk.bf16.gmra.mxu0 %vm788_vm1, %v5359_v0  ;;  %v3084_v50 = vrot.slane %v6211_v29, 1  ;;  %v2550_v5 = vshll.u32 %v6211_v29, 16  ;;  %v1627_v11 = vmax.f32 %v1491_v9, 0.0  ;;  %v2941_v45 = vpop.permute.xlu0 %2940  ;;  %v2252_v0 = vunpack.c.l.b16 %v1994_v40 }
 0x22d   : > { %v3222_v62 = vsel %vm3175_vm4, %v5984_v59, %v2941_v45 }
 0x22e   : > { %v3085_v3 = vsel %vm3038_vm3, %v3082_v60, %v3084_v50  ;;  %v2552_v25 = vrot.slane %v2550_v5, 1  ;;  %v1933_v34 = vpack.c.bf16 %v1627_v11, %v1627_v11  ;;  %v6236_v18 = vpack.c.b16 %v2252_v0, %v2251_v43 }
 0x22f   : > { %5247 = vmatmul.msk.bf16.gmra.mxu2 %vm3175_vm4, %v3085_v3  ;;  %v2790_v5 = vshll.u32 %v6233_v28, 16 }
 0x230   : > { %v2553_v13 = vsel %vm2365_vm5, %v2548_v58, %v2552_v25  ;;  %v2195_v7 = vunpack.c.l.b16 %v1933_v34  ;;  %7514 = vst [vmem:[#allocation11_spill] sm:$0xff] %v6236_v18  ;;  %v2554_v58 = vshrl.u32 %v6211_v29, 16  ;;  %v2798_v45 = vshll.u32 %v6236_v18, 16 }
 0x231   : > { %2952 = vrot.lane.b32.xlu0 %v2553_v13, %s5546_s17  ;;  %v1143_v14 = vpop.f32.mrf.mxu0  ;;  %v6242_v59 = vpop.f32.mrf.mxu3  ;;  %v5393_v13 = vld [vmem:[%s5642_s20 + $0x218] sm:$0xff]  ;;  %v6251_v42 = vrot.slane %v2790_v5, 1 }
 0x232   : > { %v1492_v60 = vadd.f32 %v6043_v16, %v1143_v14  ;;  %v6244_v23 = vpop.f32.mrf.mxu2  ;;  %v3709_v48 = vpop.f32.mrf.mxu1  ;;  %5173 = vmatmul.msk.bf16.gmra.mxu3 %vm788_vm1, %v5393_v13 }
 0x233   : > { %7515 = vst [vmem:[#allocation12_spill] sm:$0xff] %v6251_v42 }
 0x234   : > { %v1628_v52 = vmax.f32 %v1492_v60, 0.0  ;;  %v2556_v60 = vor.u32 %v2554_v58, %v2552_v25 }
 0x235   : > { %3743 = vmatmul.bf16.gmra.mxu1 %v3222_v62 }
 0x236   : > { %v1934_v30 = vpack.c.bf16 %v1628_v52, %v1628_v52 }
 0x238   : > { %v2196_v51 = vunpack.c.l.b16 %v1934_v30  ;;  %v2796_v30 = vor.u32 %v2794_v35, %v6251_v42 }
 0x239   : > { %v1146_v9 = vpop.f32.mrf.mxu0 }
 0x23a   : > { %v6239_v19 = vpack.c.b16 %v2196_v51, %v2195_v7  ;;  %v1493_v22 = vadd.f32 %v6043_v16, %v1146_v9  ;;  %v6263_v7 = vrot.slane %v2798_v45, 1  ;;  %v6268_v9 = vpop.f32.mrf.mxu2  ;;  %v3711_v58 = vpop.f32.mrf.mxu1 }
 0x23c   : > { %v1629_v24 = vmax.f32 %v1493_v22, 0.0  ;;  %5140 = vmatmul.msk.bf16.gmra.mxu0 %vm788_vm1, %v5360_v17  ;;  %v3086_v3 = vrot.slane %v6239_v19, 1  ;;  %v2558_v11 = vshll.u32 %v6239_v19, 16  ;;  %v2562_v17 = vshrl.u32 %v6239_v19, 16 }
 0x23d   : > { %v2801_v5 = vsel %vm2365_vm5, %v2796_v30, %v6263_v7 }
 0x23e   : > { %v1799_v14 = vsel %vm1421_vm6, %v1629_v24, 0.0  ;;  %v3087_v40 = vsel %vm3038_vm3, %v3084_v50, %v3086_v3  ;;  %v2560_v34 = vrot.slane %v2558_v11, 1  ;;  %v6265_v50 = vpop.f32.mrf.mxu3  ;;  %v5361_v11 = vld [vmem:[%s5642_s20 + $0x118] sm:$0xff] }
 0x23f   : > { %v1935_v52 = vpack.c.bf16 %v1799_v14, %v1799_v14  ;;  %5248 = vmatmul.msk.bf16.gmra.mxu2 %vm3175_vm4, %v3087_v40  ;;  %v3712_v14 = vadd.f32 %v6010_v1, %v3711_v58 }
 0x240   : > { %v2561_v62 = vsel %vm2365_vm5, %v2556_v60, %v2560_v34  ;;  %v2564_v22 = vor.u32 %v2562_v17, %v2560_v34  ;;  %v5394_v60 = vld [vmem:[%s5642_s20 + $0x220] sm:$0xff]  ;;  %v3710_v34 = vadd.f32 %v6010_v1, %v3709_v48 }
 0x241   : > { %v2351_v43 = vunpack.c.l.b16 %v1935_v52  ;;  %2954 = vrot.lane.b32.xlu1 %v2561_v62, %s5546_s17  ;;  %v1148_v0 = vpop.f32.mrf.mxu0  ;;  %v4041_v62 = vadd.f32 %v6068_v39, %v3712_v14 }
 0x242   : > { %5174 = vmatmul.msk.bf16.gmra.mxu3 %vm788_vm1, %v5394_v60  ;;  %v4039_v0 = vadd.f32 %v6052_v26, %v3710_v34 }
 0x243   : > { %v2359_v51 = vpack.c.b16 %v2351_v43, %v2351_v43  ;;  %v6286_v43 = vpop.f32.mrf.mxu2  ;;  %v4335_v48 = vmax.f32 %v4041_v62, 0.0 }
 0x245   : > { %v2566_v25 = vshll.u32 %v2359_v51, 16  ;;  %v3088_v45 = vrot.slane %v2359_v51, 1 }
 0x246   : > { %v6277_v40 = vpop.f32.mrf.mxu3 }
 0x247   : > { %v2568_v24 = vrot.slane %v2566_v25, 1  ;;  %v3089_v52 = vsel %vm3038_vm3, %v3086_v3, %v3088_v45  ;;  %v5362_v45 = vld [vmem:[%s5642_s20 + $0x120] sm:$0xff] }
 0x249   : > { %3010 = vrot.lane.b32.xlu1 %v2801_v5, %s5546_s17  ;;  %v1150_v13 = vpop.f32.mrf.mxu0  ;;  %v2569_v35 = vsel %vm2365_vm5, %v2564_v22, %v2568_v24  ;;  %v4334_v24 = vmax.f32 %v4039_v0, 0.0 }
 0x24a   : > { %2956 = vrot.lane.b32.xlu2 %v2569_v35, %s5546_s17  ;;  %v1494_v30 = vadd.f32 %v6043_v16, %v1150_v13 }
 0x24b   : > { %v4467_v13 = vmax.f32 %v4334_v24, %v4335_v48  ;;  %v5395_v48 = vld [vmem:[%s5642_s20 + $0x228] sm:$0xff] }
 0x24c   : > { %5141 = vmatmul.msk.bf16.gmra.mxu0 %vm788_vm1, %v5361_v11  ;;  %v1630_v58 = vmax.f32 %v1494_v30, 0.0 }
 0x24e   : > { %v6292_v22 = vpop.f32.mrf.mxu3  ;;  %v1800_v14 = vsel %vm1388_vm2, %v1630_v58, 0.0 }
 0x24f   : > { %5249 = vmatmul.msk.bf16.gmra.mxu2 %vm3175_vm4, %v3089_v52  ;;  %v6300_v52 = vpop.f32.mrf.mxu2 }
 0x251   : > { %v1152_v51 = vpop.f32.mrf.mxu0 }
 0x252   : > { %v1495_v25 = vadd.f32 %v6043_v16, %v1152_v51  ;;  %v3714_v17 = vpop.f32.mrf.mxu1  ;;  %5175 = vmatmul.msk.bf16.gmra.mxu3 %vm788_vm1, %v5395_v48 }
 0x253   : > { %v3715_v3 = vadd.f32 %v6010_v1, %v3714_v17  ;;  %v2943_v5 = vpop.permute.xlu1 %2942 }
 0x254   : > { %v3225_v39 = vsel %vm3175_vm4, %v6049_v53, %v2943_v5  ;;  %v1631_v11 = vmax.f32 %v1495_v25, 0.0  ;;  %v1553_v53 = vadd.f32 %v6043_v16, %v6213_v61  ;;  %v1936_v25 = vpack.c.bf16 %v1800_v14, %v1800_v14 }
 0x255   : > { %v4044_v26 = vadd.f32 %v6083_v44, %v3715_v3  ;;  %3748 = vmatmul.bf16.gmra.mxu1 %v3225_v39  ;;  %v1554_v44 = vadd.f32 %v6043_v16, %v6227_v56  ;;  %v2945_v56 = vpop.permute.xlu2 %2944 }
 0x256   : > { %v1937_v62 = vpack.c.bf16 %v1631_v11, %v1631_v11  ;;  %v6307_v30 = vpop.f32.mrf.mxu3  ;;  %v1689_v5 = vmax.f32 %v1553_v53, 0.0  ;;  %v2197_v24 = vunpack.c.l.b16 %v1936_v25 }
 0x257   : > { %v4336_v35 = vmax.f32 %v4044_v26, 0.0  ;;  %v1690_v39 = vmax.f32 %v1554_v44, 0.0 }
 0x258   : > { %v2198_v3 = vunpack.c.l.b16 %v1937_v62 }
 0x259   : > { %v4468_v60 = vmax.f32 %v4467_v13, %v4336_v35  ;;  %v1155_v34 = vpop.f32.mrf.mxu0 }
 0x25a   : > { %v3716_v51 = vpop.f32.mrf.mxu1  ;;  %v1496_v17 = vadd.f32 %v6043_v16, %v1155_v34  ;;  %v6314_v11 = vpack.c.b16 %v2198_v3, %v2197_v24  ;;  %v1996_v34 = vpack.c.bf16 %v1690_v39, %v1690_v39 }
 0x25b   : > { %v3717_v0 = vadd.f32 %v6010_v1, %v3716_v51 }
 0x25c   : > { %5142 = vmatmul.msk.bf16.gmra.mxu0 %vm788_vm1, %v5362_v45  ;;  %v1632_v58 = vmax.f32 %v1496_v17, 0.0  ;;  %v1995_v45 = vpack.c.bf16 %v1689_v5, %v1689_v5  ;;  %v2573_v48 = vshll.u32 %v6314_v11, 16  ;;  %v2254_v5 = vunpack.c.l.b16 %v1996_v34 }
 0x25d   : > { %v4046_v61 = vadd.f32 %v6095_v47, %v3717_v0  ;;  %v3228_v0 = vsel %vm3175_vm4, %v6066_v38, %v2945_v56  ;;  %v3090_v34 = vrot.slane %v6314_v11, 1 }
 0x25e   : > { %v6320_v53 = vpop.f32.mrf.mxu3  ;;  %v1938_v47 = vpack.c.bf16 %v1632_v58, %v1632_v58  ;;  %v2253_v3 = vunpack.c.l.b16 %v1995_v45  ;;  %v1555_v58 = vadd.f32 %v6043_v16, %v6242_v59 }
 0x25f   : > { %v4337_v62 = vmax.f32 %v4046_v61, 0.0 }
 0x260   : > { %v2199_v24 = vunpack.c.l.b16 %v1938_v47 }
 0x261   : > { %v1157_v26 = vpop.f32.mrf.mxu0  ;;  %v4469_v39 = vmax.f32 %v4468_v60, %v4337_v62  ;;  %v1556_v60 = vadd.f32 %v6043_v16, %v6265_v50 }
 0x262   : > { %v1497_v13 = vadd.f32 %v6043_v16, %v1157_v26  ;;  %v3719_v35 = vpop.f32.mrf.mxu1  ;;  %v6317_v14 = vpop.f32.mrf.mxu2 }
 0x263   : > { %v3720_v51 = vadd.f32 %v6010_v1, %v3719_v35  ;;  %v5363_v35 = vld [vmem:[%s5642_s20 + $0x128] sm:$0xff] }
 0x264   : > { %v1633_v44 = vmax.f32 %v1497_v13, 0.0  ;;  %v2575_v13 = vrot.slane %v2573_v48, 1 }
 0x265   : > { %v4049_v25 = vadd.f32 %v6112_v15, %v3720_v51  ;;  %3753 = vmatmul.bf16.gmra.mxu1 %v3228_v0  ;;  %v6333_v51 = vpack.c.b16 %v2254_v5, %v2253_v3  ;;  %v1692_v3 = vmax.f32 %v1556_v60, 0.0 }
 0x266   : > { %v1939_v17 = vpack.c.bf16 %v1633_v44, %v1633_v44  ;;  %v6339_v62 = vpop.f32.mrf.mxu3  ;;  %v2571_v44 = vshrl.u32 %v6314_v11, 16 }
 0x267   : > { %v4338_v61 = vmax.f32 %v4049_v25, 0.0  ;;  %7516 = vst [vmem:[#allocation13_spill] sm:$0xff] %v6333_v51  ;;  %v5396_v25 = vld [vmem:[%s5642_s20 + $0x230] sm:$0xff]  ;;  %v1998_v60 = vpack.c.bf16 %v1692_v3, %v1692_v3 }
 0x268   : > { %v2200_v26 = vunpack.c.l.b16 %v1939_v17  ;;  %v1691_v17 = vmax.f32 %v1555_v58, 0.0  ;;  %v2576_v48 = vor.u32 %v2575_v13, %v2571_v44  ;;  %5176 = vmatmul.msk.bf16.gmra.mxu3 %vm788_vm1, %v5396_v25 }
 0x269   : > { %v4470_v42 = vmax.f32 %v4469_v39, %v4338_v61  ;;  %v1160_v57 = vpop.f32.mrf.mxu0 }
 0x26a   : > { %v6329_v38 = vpack.c.b16 %v2200_v26, %v2199_v24  ;;  %v3721_v15 = vpop.f32.mrf.mxu1  ;;  %v6331_v56 = vpop.f32.mrf.mxu2  ;;  %v1498_v47 = vadd.f32 %v6043_v16, %v1160_v57  ;;  %v2802_v57 = vshrl.u32 %v6236_v18, 16  ;;  %v2806_v24 = vshll.u32 %v6333_v51, 16 }
 0x26b   : > { %v3722_v45 = vadd.f32 %v6010_v1, %v3721_v15 }
 0x26c   : > { %5143 = vmatmul.msk.bf16.gmra.mxu0 %vm788_vm1, %v5363_v35  ;;  %v3091_v59 = vrot.slane %v6329_v38, 1  ;;  %v2578_v0 = vshll.u32 %v6329_v38, 16  ;;  %v1634_v39 = vmax.f32 %v1498_v47, 0.0  ;;  %v1997_v35 = vpack.c.bf16 %v1691_v17, %v1691_v17 }
 0x26d   : > { %v4051_v5 = vadd.f32 %v6126_v49, %v3722_v45  ;;  %v6361_v45 = vld [vmem:[%s7487_s4] ss:$0 sm:$0xff]  ;;  %v2804_v44 = vor.u32 %v2802_v57, %v6263_v7  ;;  %v5364_v57 = vld [vmem:[%s5642_s20 + $0x130] sm:$0xff] }
 0x26e   : > { %v3092_v50 = vsel %vm3038_vm3, %v3090_v34, %v3091_v59  ;;  %v2580_v1 = vrot.slane %v2578_v0, 1  ;;  %v1324_v0 = vpop.f32.mrf.mxu3  ;;  %v1940_v25 = vpack.c.bf16 %v1634_v39, %v1634_v39 }
 0x26f   : > { %5250 = vmatmul.msk.bf16.gmra.mxu2 %vm3175_vm4, %v3092_v50  ;;  %v4339_v49 = vmax.f32 %v4051_v5, 0.0 }
 0x270   : > { %v2581_v61 = vsel %vm2365_vm5, %v2576_v48, %v2580_v1  ;;  %v2808_v48 = vrot.slane %v2806_v24, 1 }
 0x271   : > { %2958 = vrot.lane.b32.xlu0 %v2581_v61, %s5546_s17  ;;  %v1162_v26 = vpop.f32.mrf.mxu0  ;;  %v2255_v61 = vunpack.c.l.b16 %v1997_v35  ;;  %v4471_v2 = vmax.f32 %v4470_v42, %v4339_v49  ;;  %v1558_v42 = vadd.f32 %v6043_v16, %v6292_v22 }
 0x272   : > { %v1499_v58 = vadd.f32 %v6043_v16, %v1162_v26  ;;  %v3724_v15 = vpop.f32.mrf.mxu1  ;;  %v6356_v13 = vpop.f32.mrf.mxu2  ;;  %v2256_v26 = vunpack.c.l.b16 %v1998_v60  ;;  %v2809_v7 = vsel %vm2365_vm5, %v2804_v44, %v2808_v48 }
 0x273   : > { %v3725_v34 = vadd.f32 %v6361_v45, %v3724_v15  ;;  %v2947_v47 = vpop.permute.xlu0 %2946  ;;  %v2201_v15 = vunpack.c.l.b16 %v1940_v25  ;;  %v1694_v22 = vmax.f32 %v1558_v42, 0.0 }
 0x274   : > { %v1635_v17 = vmax.f32 %v1499_v58, 0.0  ;;  %v3231_v50 = vsel %vm3175_vm4, %v6093_v10, %v2947_v47  ;;  %v1557_v10 = vadd.f32 %v6043_v16, %v6277_v40  ;;  %v6377_v35 = vpack.c.b16 %v2256_v26, %v2255_v61 }
 0x275   : > { %v4054_v3 = vadd.f32 %v6141_v21, %v3725_v34  ;;  %3758 = vmatmul.bf16.gmra.mxu1 %v3231_v50 }
 0x276   : > { %v1941_v5 = vpack.c.bf16 %v1635_v17, %v1635_v17  ;;  %v6382_v49 = vpop.f32.mrf.mxu3  ;;  %v1693_v34 = vmax.f32 %v1557_v10, 0.0 }
 0x277   : > { %v4340_v36 = vmax.f32 %v4054_v3, 0.0 }
 0x278   : > { %v2202_v27 = vunpack.c.l.b16 %v1941_v5  ;;  %v2814_v5 = vshll.u32 %v6377_v35, 16  ;;  %v1999_v26 = vpack.c.bf16 %v1693_v34, %v1693_v34 }
 0x279   : > { %v4472_v0 = vmax.f32 %v4471_v2, %v4340_v36  ;;  %3012 = vrot.lane.b32.xlu0 %v2809_v7, %s5546_s17  ;;  %v1165_v39 = vpop.f32.mrf.mxu0  ;;  %v2000_v7 = vpack.c.bf16 %v1694_v22, %v1694_v22 }
 0x27a   : > { %v6373_v24 = vpack.c.b16 %v2202_v27, %v2201_v15  ;;  %v3726_v21 = vpop.f32.mrf.mxu1  ;;  %v6375_v58 = vpop.f32.mrf.mxu2  ;;  %v1500_v36 = vadd.f32 %v6043_v16, %v1165_v39  ;;  %v2582_v27 = vshrl.u32 %v6329_v38, 16  ;;  %v2810_v16 = vshrl.u32 %v6333_v51, 16 }
 0x27b   : > { %v3727_v60 = vadd.f32 %v6361_v45, %v3726_v21  ;;  %v2816_v34 = vrot.slane %v2814_v5, 1  ;;  %v2257_v22 = vunpack.c.l.b16 %v1999_v26 }
 0x27c   : > { %5144 = vmatmul.msk.bf16.gmra.mxu0 %vm788_vm1, %v5364_v57  ;;  %v3093_v2 = vrot.slane %v6373_v24, 1  ;;  %v2586_v40 = vshll.u32 %v6373_v24, 16  ;;  %v2584_v44 = vor.u32 %v2582_v27, %v2580_v1  ;;  %v1636_v50 = vmax.f32 %v1500_v36, 0.0 }
 0x27d   : > { %v4056_v17 = vadd.f32 %v6156_v4, %v3727_v60  ;;  %v2812_v21 = vor.u32 %v2810_v16, %v2808_v48  ;;  %v5397_v60 = vld [vmem:[%s5642_s20 + $0x238] sm:$0xff] }
 0x27e   : > { %v3094_v47 = vsel %vm3038_vm3, %v3091_v59, %v3093_v2  ;;  %v2588_v25 = vrot.slane %v2586_v40, 1  ;;  %v6399_v59 = vld [vmem:[%s7485_s2] ss:$0 sm:$0xff]  ;;  %v6405_v42 = vpop.f32.mrf.mxu3  ;;  %v1942_v36 = vpack.c.bf16 %v1636_v50, %v1636_v50  ;;  %5177 = vmatmul.msk.bf16.gmra.mxu3 %vm788_vm1, %v5397_v60  ;;  %v5365_v50 = vld [vmem:[%s5642_s20 + $0x138] sm:$0xff]  ;;  %v2590_v60 = vshrl.u32 %v6373_v24, 16 }
 0x27f   : > { %5251 = vmatmul.msk.bf16.gmra.mxu2 %vm3175_vm4, %v3094_v47  ;;  %v4341_v57 = vmax.f32 %v4056_v17, 0.0  ;;  %v2258_v17 = vunpack.c.l.b16 %v2000_v7 }
 0x280   : > { %v2589_v3 = vsel %vm2365_vm5, %v2584_v44, %v2588_v25  ;;  %v2203_v16 = vunpack.c.l.b16 %v1942_v36 }
 0x281   : > { %2960 = vrot.lane.b32.xlu2 %v2589_v3, %s5546_s17  ;;  %v1167_v61 = vpop.f32.mrf.mxu0  ;;  %v4473_v3 = vmax.f32 %v4472_v0, %v4341_v57  ;;  %v6421_v26 = vpack.c.b16 %v2258_v17, %v2257_v22  ;;  %v1560_v0 = vadd.f32 %v6399_v59, %v6320_v53  ;;  %v2818_v17 = vshrl.u32 %v6377_v35, 16 }
 0x282   : > { %v1501_v4 = vadd.f32 %v6399_v59, %v1167_v61  ;;  %v3729_v1 = vpop.f32.mrf.mxu1  ;;  %v6402_v15 = vpop.f32.mrf.mxu2 }
 0x283   : > { %v3730_v39 = vadd.f32 %v6361_v45, %v3729_v1  ;;  %v2949_v10 = vpop.permute.xlu1 %2948  ;;  %v2817_v1 = vsel %vm2365_vm5, %v2812_v21, %v2816_v34  ;;  %v1696_v53 = vmax.f32 %v1560_v0, 0.0  ;;  %v2820_v0 = vor.u32 %v2818_v17, %v2816_v34 }
 0x284   : > { %v1637_v27 = vmax.f32 %v1501_v4, 0.0  ;;  %v3234_v40 = vsel %vm3175_vm4, %v6124_v46, %v2949_v10 }
 0x285   : > { %v4059_v47 = vadd.f32 %v6171_v31, %v3730_v39  ;;  %3763 = vmatmul.bf16.gmra.mxu1 %v3234_v40  ;;  %v1559_v31 = vadd.f32 %v6399_v59, %v6307_v30 }
 0x286   : > { %v1943_v44 = vpack.c.bf16 %v1637_v27, %v1637_v27  ;;  %v6426_v57 = vpop.f32.mrf.mxu3 }
 0x287   : > { %v4342_v48 = vmax.f32 %v4059_v47, 0.0  ;;  %v1695_v27 = vmax.f32 %v1559_v31, 0.0  ;;  %v2592_v47 = vor.u32 %v2590_v60, %v2588_v25 }
 0x288   : > { %v2204_v61 = vunpack.c.l.b16 %v1943_v44 }
 0x289   : > { %v4474_v4 = vmax.f32 %v4473_v3, %v4342_v48  ;;  %3014 = vrot.lane.b32.xlu2 %v2817_v1, %s5546_s17  ;;  %v1170_v46 = vpop.f32.mrf.mxu0 }
 0x28a   : > { %v6417_v5 = vpack.c.b16 %v2204_v61, %v2203_v16  ;;  %v3731_v39 = vpop.f32.mrf.mxu1  ;;  %v6419_v10 = vpop.f32.mrf.mxu2  ;;  %v1502_v21 = vadd.f32 %v6399_v59, %v1170_v46  ;;  %v2822_v16 = vshll.u32 %v6421_v26, 16 }
 0x28b   : > { %v3732_v7 = vadd.f32 %v6361_v45, %v3731_v39  ;;  %v2951_v61 = vpop.permute.xlu2 %2950 }
 0x28c   : > { %5145 = vmatmul.msk.bf16.gmra.mxu0 %vm788_vm1, %v5365_v50  ;;  %v3095_v30 = vrot.slane %v6417_v5, 1  ;;  %v2594_v36 = vshll.u32 %v6417_v5, 16  ;;  %v1638_v3 = vmax.f32 %v1502_v21, 0.0  ;;  %v2001_v50 = vpack.c.bf16 %v1695_v27, %v1695_v27 }
 0x28d   : > { %v4061_v22 = vadd.f32 %v6187_v8, %v3732_v7  ;;  %v2002_v8 = vpack.c.bf16 %v1696_v53, %v1696_v53  ;;  %v1561_v53 = vadd.f32 %v6399_v59, %v6339_v62 }
 0x28e   : > { %v3096_v40 = vsel %vm3038_vm3, %v3093_v2, %v3095_v30  ;;  %v2596_v44 = vrot.slane %v2594_v36, 1  ;;  %v6444_v7 = vpop.f32.mrf.mxu3  ;;  %v1944_v21 = vpack.c.bf16 %v1638_v3, %v1638_v3  ;;  %v3237_v36 = vsel %vm3175_vm4, %v6154_v33, %v2951_v61 }
 0x28f   : > { %5252 = vmatmul.msk.bf16.gmra.mxu2 %vm3175_vm4, %v3096_v40  ;;  %v4343_v31 = vmax.f32 %v4061_v22, 0.0  ;;  %v2824_v40 = vrot.slane %v2822_v16, 1 }
 0x290   : > { %v2597_v48 = vsel %vm2365_vm5, %v2592_v47, %v2596_v44  ;;  %v2259_v47 = vunpack.c.l.b16 %v2001_v50  ;;  %v2205_v17 = vunpack.c.l.b16 %v1944_v21 }
 0x291   : > { %2962 = vrot.lane.b32.xlu1 %v2597_v48, %s5546_s17  ;;  %v1172_v1 = vpop.f32.mrf.mxu0  ;;  %v4475_v22 = vmax.f32 %v4474_v4, %v4343_v31  ;;  %v2825_v3 = vsel %vm2365_vm5, %v2820_v0, %v2824_v40  ;;  %v2598_v0 = vshrl.u32 %v6417_v5, 16 }
 0x292   : > { %v1503_v2 = vadd.f32 %v6399_v59, %v1172_v1  ;;  %v3734_v25 = vpop.f32.mrf.mxu1  ;;  %v6441_v46 = vpop.f32.mrf.mxu2  ;;  %v2260_v1 = vunpack.c.l.b16 %v2002_v8  ;;  %v1697_v8 = vmax.f32 %v1561_v53, 0.0 }
 0x293   : > { %v3735_v39 = vadd.f32 %v6361_v45, %v3734_v25 }
 0x294   : > { %v1639_v60 = vmax.f32 %v1503_v2, 0.0  ;;  %v5366_v2 = vld [vmem:[%s5642_s20 + $0x140] sm:$0xff]  ;;  %v6458_v50 = vpack.c.b16 %v2260_v1, %v2259_v47  ;;  %v1867_v1 = vsel %vm1421_vm6, %v1697_v8, 0.0 }
 0x295   : > { %v4064_v27 = vadd.f32 %v6203_v54, %v3735_v39  ;;  %3768 = vmatmul.bf16.gmra.mxu1 %v3237_v36  ;;  %v2600_v36 = vor.u32 %v2598_v0, %v2596_v44 }
 0x296   : > { %v1945_v48 = vpack.c.bf16 %v1639_v60, %v1639_v60  ;;  %v6461_v4 = vpop.f32.mrf.mxu3 }
 0x297   : > { %v4344_v34 = vmax.f32 %v4064_v27, 0.0 }
 0x298   : > { %v2206_v25 = vunpack.c.l.b16 %v1945_v48  ;;  %v2826_v48 = vshrl.u32 %v6421_v26, 16 }
 0x299   : > { %v4476_v63 = vmax.f32 %v4475_v22, %v4344_v34  ;;  %3016 = vrot.lane.b32.xlu1 %v2825_v3, %s5546_s17  ;;  %v1175_v33 = vpop.f32.mrf.mxu0  ;;  %v2830_v34 = vshll.u32 %v6458_v50, 16  ;;  %v2003_v3 = vpack.c.bf16 %v1867_v1, %v1867_v1 }
 0x29a   : > { %v6454_v16 = vpack.c.b16 %v2206_v25, %v2205_v17  ;;  %v3736_v54 = vpop.f32.mrf.mxu1  ;;  %v6456_v61 = vpop.f32.mrf.mxu2  ;;  %v1504_v31 = vadd.f32 %v6399_v59, %v1175_v33  ;;  %v2828_v8 = vor.u32 %v2826_v48, %v2824_v40 }
 0x29b   : > { %v3737_v62 = vadd.f32 %v6361_v45, %v3736_v54  ;;  %v2355_v48 = vunpack.c.l.b16 %v2003_v3 }
 0x29c   : > { %5146 = vmatmul.msk.bf16.gmra.mxu0 %vm788_vm1, %v5366_v2  ;;  %v3097_v39 = vrot.slane %v6454_v16, 1  ;;  %v2602_v21 = vshll.u32 %v6454_v16, 16  ;;  %v1640_v53 = vmax.f32 %v1504_v31, 0.0 }
 0x29d   : > { %v4066_v47 = vadd.f32 %v6224_v41, %v3737_v62  ;;  %v1562_v41 = vadd.f32 %v6399_v59, %v6382_v49  ;;  %v1563_v49 = vadd.f32 %v6399_v59, %v6405_v42  ;;  %v1564_v42 = vadd.f32 %v6399_v59, %v6426_v57 }
 0x29e   : > { %v3098_v60 = vsel %vm3038_vm3, %v3095_v30, %v3097_v39  ;;  %v2604_v27 = vrot.slane %v2602_v21, 1  ;;  %v3707_v30 = vadd.f32 %v6361_v45, %v6229_v12  ;;  %v1946_v62 = vpack.c.bf16 %v1640_v53, %v1640_v53 }
 0x29f   : > { %5253 = vmatmul.msk.bf16.gmra.mxu2 %vm3175_vm4, %v3098_v60  ;;  %v4345_v2 = vmax.f32 %v4066_v47, 0.0  ;;  %v2832_v21 = vrot.slane %v2830_v34, 1  ;;  %v1698_v47 = vmax.f32 %v1562_v41, 0.0  ;;  %v5367_v34 = vld [vmem:[%s5642_s20 + $0x148] sm:$0xff] }
 0x2a0   : > { %v2605_v22 = vsel %vm2365_vm5, %v2600_v36, %v2604_v27  ;;  %v6492_v36 = vpop.f32.mrf.mxu3  ;;  %v4036_v40 = vadd.f32 %v6037_v37, %v3707_v30  ;;  %v1565_v30 = vadd.f32 %v6399_v59, %v6444_v7 }
 0x2a1   : > { %2964 = vrot.lane.b32.xlu0 %v2605_v22, %s5546_s17  ;;  %v1177_v17 = vpop.f32.mrf.mxu0  ;;  %v4477_v53 = vmax.f32 %v4476_v63, %v4345_v2  ;;  %v1868_v41 = vsel %vm1388_vm2, %v1698_v47, 0.0  ;;  %v6506_v2 = vpack.c.b16 %v2355_v48, %v2355_v48 }
 0x2a2   : > { %v1505_v44 = vadd.f32 %v6399_v59, %v1177_v17  ;;  %v3739_v25 = vpop.f32.mrf.mxu1  ;;  %v6485_v0 = vpop.f32.mrf.mxu2  ;;  %v2207_v17 = vunpack.c.l.b16 %v1946_v62  ;;  %v4333_v3 = vmax.f32 %v4036_v40, 0.0  ;;  %v2606_v62 = vshrl.u32 %v6454_v16, 16 }
 0x2a3   : > { %v3740_v33 = vadd.f32 %v6361_v45, %v3739_v25  ;;  %v2953_v54 = vpop.permute.xlu0 %2952  ;;  %v1699_v25 = vmax.f32 %v1563_v49, 0.0  ;;  %7517 = vst [vmem:[#allocation14_spill] sm:$0xff] %v6506_v2  ;;  %v1701_v48 = vmax.f32 %v1565_v30, 0.0 }
 0x2a4   : > { %v1641_v31 = vmax.f32 %v1505_v44, 0.0  ;;  %v3240_v12 = vsel %vm3175_vm4, %v6179_v6, %v2953_v54  ;;  %v2833_v6 = vsel %vm2365_vm5, %v2828_v8, %v2832_v21 }
 0x2a5   : > { %v4069_v60 = vadd.f32 %v6244_v23, %v3740_v33  ;;  %3773 = vmatmul.bf16.gmra.mxu1 %v3240_v12  ;;  %v2004_v12 = vpack.c.bf16 %v1868_v41, %v1868_v41  ;;  %v2005_v49 = vpack.c.bf16 %v1699_v25, %v1699_v25 }
 0x2a6   : > { %v1947_v1 = vpack.c.bf16 %v1641_v31, %v1641_v31 }
 0x2a7   : > { %v4346_v22 = vmax.f32 %v4069_v60, 0.0  ;;  %v1700_v60 = vmax.f32 %v1564_v42, 0.0  ;;  %v2262_v25 = vunpack.c.l.b16 %v2005_v49  ;;  %v2007_v42 = vpack.c.bf16 %v1701_v48, %v1701_v48 }
 0x2a8   : > { %v2208_v44 = vunpack.c.l.b16 %v1947_v1  ;;  %v2608_v1 = vor.u32 %v2606_v62, %v2604_v27  ;;  %v2261_v27 = vunpack.c.l.b16 %v2004_v12 }
 0x2a9   : > { %v4478_v54 = vmax.f32 %v4477_v53, %v4346_v22  ;;  %3018 = vrot.lane.b32.xlu0 %v2833_v6, %s5546_s17  ;;  %v1180_v23 = vpop.f32.mrf.mxu0  ;;  %v4460_v53 = vmax.f32 %v6207_v32, %v4333_v3  ;;  %v2838_v6 = vshll.u32 %v6506_v2, 16  ;;  %v2006_v32 = vpack.c.bf16 %v1700_v60, %v1700_v60 }
 0x2aa   : > { %v6502_v37 = vpack.c.b16 %v2208_v44, %v2207_v17  ;;  %v3741_v63 = vpop.f32.mrf.mxu1  ;;  %v1506_v8 = vadd.f32 %v6399_v59, %v1180_v23  ;;  %v6514_v47 = vpop.f32.mrf.mxu2  ;;  %v2834_v17 = vshrl.u32 %v6458_v50, 16 }
 0x2ab   : > { %v3742_v33 = vadd.f32 %v6361_v45, %v3741_v63  ;;  %v6527_v44 = vpop.f32.mrf.mxu3  ;;  %v4461_v63 = vrot.slane %v4460_v53, 4  ;;  %v2840_v49 = vrot.slane %v2838_v6, 1  ;;  %v5368_v6 = vld [vmem:[%s5642_s20 + $0x150] sm:$0xff] }
 0x2ac   : > { %5147 = vmatmul.msk.bf16.gmra.mxu0 %vm788_vm1, %v5367_v34  ;;  %v3099_v57 = vrot.slane %v6502_v37, 1  ;;  %v2610_v31 = vshll.u32 %v6502_v37, 16  ;;  %v1642_v34 = vmax.f32 %v1506_v8, 0.0  ;;  %v2836_v62 = vor.u32 %v2834_v17, %v2832_v21 }
 0x2ad   : > { %v4071_v22 = vadd.f32 %v6268_v9, %v3742_v33  ;;  %v1566_v21 = vadd.f32 %v6399_v59, %v6461_v4 }
 0x2ae   : > { %v3100_v7 = vsel %vm3038_vm3, %v3097_v39, %v3099_v57  ;;  %v6521_v40 = vrot.slane %v2610_v31, 1  ;;  %v1948_v8 = vpack.c.bf16 %v1642_v34, %v1642_v34 }
 0x2af   : > { %5254 = vmatmul.msk.bf16.gmra.mxu2 %vm3175_vm4, %v3100_v7  ;;  %v4347_v30 = vmax.f32 %v4071_v22, 0.0  ;;  %v6537_v7 = vpack.c.b16 %v2262_v25, %v2261_v27  ;;  %v4462_v22 = vmax.f32 %v4460_v53, %v4461_v63  ;;  %v1567_v25 = vadd.f32 %v6399_v59, %v6492_v36 }
 0x2b0   : > { %v2613_v39 = vsel %vm2365_vm5, %v2608_v1, %v6521_v40  ;;  %v2263_v1 = vunpack.c.l.b16 %v2006_v32  ;;  %v2209_v17 = vunpack.c.l.b16 %v1948_v8 }
 0x2b1   : > { %2966 = vrot.lane.b32.xlu2 %v2613_v39, %s5546_s17  ;;  %v1182_v23 = vpop.f32.mrf.mxu0  ;;  %v2264_v39 = vunpack.c.l.b16 %v2007_v42  ;;  %v4463_v63 = vrot.slane %v4462_v22, 2 }
 0x2b2   : > { %v1507_v9 = vadd.f32 %v6399_v59, %v1182_v23  ;;  %v3744_v41 = vpop.f32.mrf.mxu1  ;;  %v4479_v23 = vmax.f32 %v4478_v54, %v4347_v30  ;;  %v2845_v54 = vshll.u32 %v6537_v7, 16  ;;  %v1702_v30 = vmax.f32 %v1566_v21, 0.0 }
 0x2b3   : > { %v3745_v3 = vadd.f32 %v6361_v45, %v3744_v41  ;;  %v2955_v33 = vpop.permute.xlu1 %2954  ;;  %v1343_v53 = vpop.f32.mrf.mxu3  ;;  %v6552_v4 = vpack.c.b16 %v2264_v39, %v2263_v1  ;;  %v2843_v1 = vshrl.u32 %v6537_v7, 16 }
 0x2b4   : > { %v1643_v31 = vmax.f32 %v1507_v9, 0.0  ;;  %v3243_v12 = vsel %vm3175_vm4, %v6211_v29, %v2955_v33  ;;  %v6542_v9 = vpop.f32.mrf.mxu2  ;;  %v2841_v29 = vsel %vm2365_vm5, %v2836_v62, %v2840_v49  ;;  %v2614_v62 = vshrl.u32 %v6502_v37, 16 }
 0x2b5   : > { %v4074_v60 = vadd.f32 %v6286_v43, %v3745_v3  ;;  %3778 = vmatmul.bf16.gmra.mxu1 %v3243_v12  ;;  %v2850_v21 = vshll.u32 %v6552_v4, 16 }
 0x2b6   : > { %v1949_v48 = vpack.c.bf16 %v1643_v31, %v1643_v31 }
 0x2b7   : > { %v4348_v41 = vmax.f32 %v4074_v60, 0.0  ;;  %v1703_v60 = vmax.f32 %v1567_v25, 0.0 }
 0x2b8   : > { %v2210_v34 = vunpack.c.l.b16 %v1949_v48  ;;  %v2847_v48 = vrot.slane %v2845_v54, 1 }
 0x2b9   : > { %v4480_v27 = vmax.f32 %v4479_v23, %v4348_v41  ;;  %3020 = vrot.lane.b32.xlu2 %v2841_v29, %s5546_s17  ;;  %v1185_v43 = vpop.f32.mrf.mxu0  ;;  %v2616_v23 = vor.u32 %v2614_v62, %v6521_v40  ;;  %v2852_v62 = vrot.slane %v2850_v21, 1 }
 0x2ba   : > { %v6550_v32 = vpack.c.b16 %v2210_v34, %v2209_v17  ;;  %v3746_v42 = vpop.f32.mrf.mxu1  ;;  %v1508_v8 = vadd.f32 %v6399_v59, %v1185_v43  ;;  %v2008_v43 = vpack.c.bf16 %v1702_v30, %v1702_v30 }
 0x2bb   : > { %v3747_v3 = vadd.f32 %v6361_v45, %v3746_v42  ;;  %v3011_v33 = vpop.permute.xlu1 %3010  ;;  %v2009_v42 = vpack.c.bf16 %v1703_v60, %v1703_v60 }
 0x2bc   : > { %v3327_v36 = vsel %vm3175_vm4, %v6233_v28, %v3011_v33  ;;  %5148 = vmatmul.msk.bf16.gmra.mxu0 %vm788_vm1, %v5368_v6  ;;  %v3101_v31 = vrot.slane %v6550_v32, 1  ;;  %v2618_v12 = vshll.u32 %v6550_v32, 16  ;;  %v1644_v34 = vmax.f32 %v1508_v8, 0.0  ;;  %v6576_v40 = vpop.f32.mrf.mxu2 }
 0x2bd   : > { %v4076_v49 = vadd.f32 %v6300_v52, %v3747_v3  ;;  %3918 = vmatmul.bf16.vlgmr.msrb.gmra.mxu3 %v3327_v36  ;;  %v2957_v52 = vpop.permute.xlu2 %2956  ;;  %v4464_v6 = vmax.f32 %v4462_v22, %v4463_v63  ;;  %v2848_v33 = vor.u32 %v2847_v48, %v2843_v1  ;;  %v1568_v8 = vadd.f32 %v6399_v59, %v6527_v44 }
 0x2be   : > { %v3102_v39 = vsel %vm3038_vm3, %v3099_v57, %v3101_v31  ;;  %v2620_v41 = vrot.slane %v2618_v12, 1  ;;  %v6574_v57 = vpop.f32.mrf.mxu3  ;;  %v1569_v22 = vadd.f32 %v6399_v59, %v1343_v53  ;;  %v3246_v30 = vsel %vm3175_vm4, %v6239_v19, %v2957_v52  ;;  %v5369_v53 = vld [vmem:[%s5642_s20 + $0x158] sm:$0xff] }
 0x2bf   : > { %v4349_v17 = vmax.f32 %v4076_v49, 0.0  ;;  %5255 = vmatmul.msk.bf16.gmra.mxu2 %vm3175_vm4, %v3102_v39  ;;  %v4465_v12 = vrot.slane %v4464_v6, 1  ;;  %v2265_v49 = vunpack.c.l.b16 %v2008_v43  ;;  %v2266_v39 = vunpack.c.l.b16 %v2009_v42 }
 0x2c0   : > { %v2621_v29 = vsel %vm2365_vm5, %v2616_v23, %v2620_v41  ;;  %v2853_v1 = vsel %vm2365_vm5, %v2848_v33, %v2852_v62  ;;  %v1704_v21 = vmax.f32 %v1568_v8, 0.0 }
 0x2c1   : > { %v4481_v25 = vmax.f32 %v4480_v27, %v4349_v17  ;;  %2968 = vrot.lane.b32.xlu1 %v2621_v29, %s5546_s17  ;;  %v1187_v54 = vpop.f32.mrf.mxu0  ;;  %v1950_v27 = vpack.c.bf16 %v1644_v34, %v1644_v34  ;;  %v1705_v17 = vmax.f32 %v1569_v22, 0.0 }
 0x2c2   : > { %v1509_v3 = vadd.f32 %v6399_v59, %v1187_v54  ;;  %v4466_v54 = vmax.f32 %v4464_v6, %v4465_v12  ;;  %v2010_v33 = vpack.c.bf16 %v1704_v21, %v1704_v21 }
 0x2c3   : > { %v4482_v36 = vrot.slane %v4481_v25, 4  ;;  %v2211_v44 = vunpack.c.l.b16 %v1950_v27  ;;  %v2622_v27 = vshrl.u32 %v6550_v32, 16 }
 0x2c4   : > { %v1645_v63 = vmax.f32 %v1509_v3, 0.0  ;;  %v6586_v3 = vpack.c.b16 %v2266_v39, %v2265_v49  ;;  %v6594_v8 = vpop.f32.mrf.mxu2  ;;  %v2854_v49 = vshrl.u32 %v6552_v4, 16 }
 0x2c5   : > { %v4483_v60 = vmax.f32 %v4481_v25, %v4482_v36  ;;  %3783 = vmatmul.bf16.gmra.mxu1 %v3246_v30  ;;  %v2011_v36 = vpack.c.bf16 %v1705_v17, %v1705_v17  ;;  %v4614_v30 = vpack.c.bf16 %v4466_v54, %v4466_v54 }
 0x2c6   : > { %v1951_v23 = vpack.c.bf16 %v1645_v63, %v1645_v63  ;;  %v6589_v52 = vpop.f32.mrf.mxu3 }
 0x2c7   : > { %v4484_v48 = vrot.slane %v4483_v60, 2  ;;  %v4650_v54 = vunpack.c.l.b16 %v4614_v30 }
 0x2c8   : > { %v2212_v29 = vunpack.c.l.b16 %v1951_v23 }
 0x2c9   : > { %v4485_v34 = vmax.f32 %v4483_v60, %v4484_v48  ;;  %3022 = vrot.lane.b32.xlu1 %v2853_v1, %s5546_s17  ;;  %v1190_v19 = vpop.f32.mrf.mxu0  ;;  %v2858_v60 = vshll.u32 %v6586_v3, 16  ;;  %v2624_v1 = vor.u32 %v2622_v27, %v2620_v41  ;;  %v2856_v41 = vor.u32 %v2854_v49, %v2852_v62  ;;  %v5370_v62 = vld [vmem:[%s5642_s20 + $0x160] sm:$0xff] }
 0x2ca   : > { %v6591_v43 = vpack.c.b16 %v2212_v29, %v2211_v44  ;;  %v1510_v25 = vadd.f32 %v6399_v59, %v1190_v19  ;;  %v2267_v44 = vunpack.c.l.b16 %v2010_v33  ;;  %v2268_v29 = vunpack.c.l.b16 %v2011_v36 }
 0x2cb   : > { %v4486_v42 = vrot.slane %v4485_v34, 1 }
 0x2cc   : > { %v1646_v22 = vmax.f32 %v1510_v25, 0.0  ;;  %5149 = vmatmul.msk.bf16.gmra.mxu0 %vm788_vm1, %v5369_v53  ;;  %v3103_v6 = vrot.slane %v6591_v43, 1  ;;  %v2626_v63 = vshll.u32 %v6591_v43, 16  ;;  %v6617_v30 = vpop.f32.mrf.mxu2 }
 0x2cd   : > { %v4487_v12 = vmax.f32 %v4485_v34, %v4486_v42 }
 0x2ce   : > { %v1816_v39 = vsel %vm1421_vm6, %v1646_v22, 0.0  ;;  %v3104_v23 = vsel %vm3038_vm3, %v3101_v31, %v3103_v6  ;;  %v2628_v48 = vrot.slane %v2626_v63, 1  ;;  %v6610_v42 = vpop.f32.mrf.mxu3  ;;  %v2860_v22 = vrot.slane %v2858_v60, 1 }
 0x2cf   : > { %v4615_v21 = vpack.c.bf16 %v4487_v12, %v4487_v12  ;;  %v1952_v17 = vpack.c.bf16 %v1816_v39, %v1816_v39  ;;  %5256 = vmatmul.msk.bf16.gmra.mxu2 %vm3175_vm4, %v3104_v23  ;;  %v6614_v63 = vpack.c.b16 %v2268_v29, %v2267_v44  ;;  %v2630_v12 = vshrl.u32 %v6591_v43, 16 }
 0x2d0   : > { %v2629_v53 = vsel %vm2365_vm5, %v2624_v1, %v2628_v48  ;;  %v2861_v39 = vsel %vm2365_vm5, %v2856_v41, %v2860_v22 }
 0x2d1   : > { %v4651_v34 = vunpack.c.l.b16 %v4615_v21  ;;  %v2352_v19 = vunpack.c.l.b16 %v1952_v17  ;;  %2970 = vrot.lane.b32.xlu0 %v2629_v53, %s5546_s17  ;;  %v1192_v25 = vpop.f32.mrf.mxu0  ;;  %v2632_v23 = vor.u32 %v2630_v12, %v2628_v48  ;;  %v2862_v21 = vshrl.u32 %v6586_v3, 16 }
 0x2d2   : > { %v3749_v31 = vpop.f32.mrf.mxu1  ;;  %v2866_v17 = vshll.u32 %v6614_v63, 16 }
 0x2d3   : > { %v6612_v27 = vsel %vm4658_vm7, %v4651_v34, %v4650_v54  ;;  %v2360_v33 = vpack.c.b16 %v2352_v19, %v2352_v19  ;;  %v2864_v48 = vor.u32 %v2862_v21, %v2860_v22  ;;  %v3750_v19 = vadd.f32 %v6361_v45, %v3749_v31 }
 0x2d4   : > { %v6629_v34 = vrot.slane %v2866_v17, 1 }
 0x2d5   : > { %v2634_v36 = vshll.u32 %v2360_v33, 16  ;;  %v3105_v29 = vrot.slane %v2360_v33, 1  ;;  %v4079_v12 = vadd.f32 %v6317_v14, %v3750_v19 }
 0x2d6   : > { %v6625_v44 = vpop.f32.mrf.mxu3  ;;  %v2869_v33 = vsel %vm2365_vm5, %v2864_v48, %v6629_v34 }
 0x2d7   : > { %v2636_v1 = vrot.slane %v2634_v36, 1  ;;  %v3106_v25 = vsel %vm3038_vm3, %v3103_v6, %v3105_v29  ;;  %v6638_v36 = vpop.f32.mrf.mxu2 }
 0x2d9   : > { %3024 = vrot.lane.b32.xlu0 %v2861_v39, %s5546_s17  ;;  %v1194_v49 = vpop.f32.mrf.mxu0  ;;  %v2637_v60 = vsel %vm2365_vm5, %v2632_v23, %v2636_v1 }
 0x2da   : > { %v3751_v53 = vpop.f32.mrf.mxu1  ;;  %2972 = vrot.lane.b32.xlu2 %v2637_v60, %s5546_s17  ;;  %v1511_v22 = vadd.f32 %v6399_v59, %v1194_v49 }
 0x2db   : > { %v3752_v54 = vadd.f32 %v6361_v45, %v3751_v53 }
 0x2dc   : > { %5150 = vmatmul.msk.bf16.gmra.mxu0 %vm788_vm1, %v5370_v62  ;;  %v4350_v62 = vmax.f32 %v4079_v12, 0.0  ;;  %v1647_v14 = vmax.f32 %v1511_v22, 0.0  ;;  %v1571_v22 = vadd.f32 %v6399_v59, %v6589_v52 }
 0x2dd   : > { %v4081_v41 = vadd.f32 %v6331_v56, %v3752_v54  ;;  %v5371_v54 = vld [vmem:[%s5642_s20 + $0x168] sm:$0xff] }
 0x2de   : > { %v6644_v6 = vpop.f32.mrf.mxu3  ;;  %v1817_v48 = vsel %vm1388_vm2, %v1647_v14, 0.0 }
 0x2df   : > { %5257 = vmatmul.msk.bf16.gmra.mxu2 %vm3175_vm4, %v3106_v25  ;;  %v4351_v56 = vmax.f32 %v4081_v41, 0.0  ;;  %v6653_v41 = vpop.f32.mrf.mxu2 }
 0x2e1   : > { %v1196_v39 = vpop.f32.mrf.mxu0  ;;  %v4488_v29 = vmax.f32 %v4350_v62, %v4351_v56 }
 0x2e2   : > { %v1512_v23 = vadd.f32 %v6399_v59, %v1196_v39  ;;  %v3754_v31 = vpop.f32.mrf.mxu1  ;;  %3026 = vrot.lane.b32.xlu2 %v2869_v33, %s5546_s17 }
 0x2e3   : > { %v3755_v1 = vadd.f32 %v6361_v45, %v3754_v31  ;;  %v2959_v21 = vpop.permute.xlu0 %2958 }
 0x2e4   : > { %v3249_v17 = vsel %vm3175_vm4, %v6314_v11, %v2959_v21  ;;  %v1648_v60 = vmax.f32 %v1512_v23, 0.0  ;;  %v1953_v23 = vpack.c.bf16 %v1817_v48, %v1817_v48  ;;  %v2961_v21 = vpop.permute.xlu2 %2960 }
 0x2e5   : > { %v4084_v49 = vadd.f32 %v6356_v13, %v3755_v1  ;;  %3788 = vmatmul.bf16.gmra.mxu1 %v3249_v17  ;;  %v1570_v13 = vadd.f32 %v6399_v59, %v6574_v57  ;;  %v1707_v57 = vmax.f32 %v1571_v22, 0.0 }
 0x2e6   : > { %v1954_v33 = vpack.c.bf16 %v1648_v60, %v1648_v60  ;;  %v6664_v1 = vpop.f32.mrf.mxu3 }
 0x2e7   : > { %v4352_v53 = vmax.f32 %v4084_v49, 0.0  ;;  %v1706_v14 = vmax.f32 %v1570_v13, 0.0  ;;  %v2213_v49 = vunpack.c.l.b16 %v1953_v23 }
 0x2e8   : > { %v2214_v17 = vunpack.c.l.b16 %v1954_v33 }
 0x2e9   : > { %v4489_v19 = vmax.f32 %v4488_v29, %v4352_v53  ;;  %v1199_v25 = vpop.f32.mrf.mxu0 }
 0x2ea   : > { %v3756_v39 = vpop.f32.mrf.mxu1  ;;  %v1513_v31 = vadd.f32 %v6399_v59, %v1199_v25  ;;  %v6667_v29 = vpack.c.b16 %v2214_v17, %v2213_v49 }
 0x2eb   : > { %v3757_v11 = vadd.f32 %v6361_v45, %v3756_v39  ;;  %v3013_v12 = vpop.permute.xlu0 %3012  ;;  %v2012_v39 = vpack.c.bf16 %v1706_v14, %v1706_v14 }
 0x2ec   : > { %5151 = vmatmul.msk.bf16.gmra.mxu0 %vm788_vm1, %v5371_v54  ;;  %v3330_v56 = vsel %vm3175_vm4, %v6236_v18, %v3013_v12  ;;  %v1649_v60 = vmax.f32 %v1513_v31, 0.0  ;;  %v2641_v23 = vshll.u32 %v6667_v29, 16 }
 0x2ed   : > { %3923 = vmatmul.bf16.gmra.mxu3 %v3330_v56  ;;  %v4086_v62 = vadd.f32 %v6375_v58, %v3757_v11  ;;  %v2013_v56 = vpack.c.bf16 %v1707_v57, %v1707_v57  ;;  %v3252_v11 = vsel %vm3175_vm4, %v6329_v38, %v2961_v21  ;;  %v1572_v38 = vadd.f32 %v6399_v59, %v6610_v42 }
 0x2ee   : > { %v1955_v33 = vpack.c.bf16 %v1649_v60, %v1649_v60  ;;  %v6677_v31 = vpop.f32.mrf.mxu3  ;;  %v5372_v60 = vld [vmem:[%s5642_s20 + $0x170] sm:$0xff] }
 0x2ef   : > { %v4353_v25 = vmax.f32 %v4086_v62, 0.0  ;;  %v2269_v62 = vunpack.c.l.b16 %v2012_v39  ;;  %v2270_v49 = vunpack.c.l.b16 %v2013_v56 }
 0x2f0   : > { %v2215_v57 = vunpack.c.l.b16 %v1955_v33  ;;  %v3107_v33 = vrot.slane %v6667_v29, 1 }
 0x2f1   : > { %v1201_v52 = vpop.f32.mrf.mxu0  ;;  %v4490_v17 = vmax.f32 %v4489_v19, %v4353_v25  ;;  %v1573_v19 = vadd.f32 %v6399_v59, %v6625_v44  ;;  %v6688_v25 = vpack.c.b16 %v2270_v49, %v2269_v62  ;;  %v1708_v44 = vmax.f32 %v1572_v38, 0.0 }
 0x2f2   : > { %v1514_v53 = vadd.f32 %v6399_v59, %v1201_v52  ;;  %v3759_v54 = vpop.f32.mrf.mxu1  ;;  %v6670_v48 = vpop.f32.mrf.mxu2 }
 0x2f3   : > { %v3760_v12 = vadd.f32 %v6361_v45, %v3759_v54  ;;  %v3015_v52 = vpop.permute.xlu2 %3014 }
 0x2f4   : > { %v1650_v58 = vmax.f32 %v1514_v53, 0.0  ;;  %v3333_v56 = vsel %vm3175_vm4, %v6333_v51, %v3015_v52  ;;  %v5373_v51 = vld [vmem:[%s5642_s20 + $0x178] sm:$0xff] }
 0x2f5   : > { %v4089_v13 = vadd.f32 %v6402_v15, %v3760_v12  ;;  %3793 = vmatmul.bf16.gmra.mxu1 %v3252_v11 }
 0x2f6   : > { %v1956_v22 = vpack.c.bf16 %v1650_v58, %v1650_v58  ;;  %v2643_v58 = vrot.slane %v2641_v23, 1 }
 0x2f7   : > { %v4354_v14 = vmax.f32 %v4089_v13, 0.0  ;;  %v2639_v13 = vshrl.u32 %v6667_v29, 16 }
 0x2f8   : > { %v2216_v54 = vunpack.c.l.b16 %v1956_v22 }
 0x2f9   : > { %v4491_v53 = vmax.f32 %v4490_v17, %v4354_v14  ;;  %v1204_v28 = vpop.f32.mrf.mxu0  ;;  %v2644_v17 = vor.u32 %v2643_v58, %v2639_v13  ;;  %v1709_v14 = vmax.f32 %v1573_v19, 0.0 }
 0x2fa   : > { %v6682_v15 = vpack.c.b16 %v2216_v54, %v2215_v57  ;;  %v3761_v21 = vpop.f32.mrf.mxu1  ;;  %v6684_v12 = vpop.f32.mrf.mxu2  ;;  %v1515_v42 = vadd.f32 %v6399_v59, %v1204_v28  ;;  %v2870_v28 = vshrl.u32 %v6614_v63, 16  ;;  %v2874_v54 = vshll.u32 %v6688_v25, 16 }
 0x2fb   : > { %v3762_v39 = vadd.f32 %v6361_v45, %v3761_v21  ;;  %v2014_v21 = vpack.c.bf16 %v1708_v44, %v1708_v44 }
 0x2fc   : > { %5152 = vmatmul.msk.bf16.gmra.mxu0 %vm788_vm1, %v5372_v60  ;;  %v7497_v11 = vrot.slane %v6682_v15, 1  ;;  %v2646_v22 = vshll.u32 %v6682_v15, 16  ;;  %v1651_v52 = vmax.f32 %v1515_v42, 0.0  ;;  %v6707_v60 = vpop.f32.mrf.mxu3  ;;  %v2872_v13 = vor.u32 %v2870_v28, %v6629_v34 }
 0x2fd   : > { %3928 = vmatmul.bf16.gmra.mxu3 %v3333_v56  ;;  %v4091_v49 = vadd.f32 %v6419_v10, %v3762_v39  ;;  %v2015_v10 = vpack.c.bf16 %v1709_v14, %v1709_v14 }
 0x2fe   : > { %v3109_v23 = vsel %vm3038_vm3, %v3107_v33, %v7497_v11  ;;  %v2648_v62 = vrot.slane %v2646_v22, 1  ;;  %v1957_v22 = vpack.c.bf16 %v1651_v52, %v1651_v52 }
 0x2ff   : > { %5258 = vmatmul.msk.bf16.gmra.mxu2 %vm3175_vm4, %v3109_v23  ;;  %v4355_v39 = vmax.f32 %v4091_v49, 0.0  ;;  %v2272_v2 = vunpack.c.l.b16 %v2015_v10  ;;  %v1574_v10 = vadd.f32 %v6399_v59, %v6644_v6 }
 0x300   : > { %v2649_v57 = vsel %vm2365_vm5, %v2644_v17, %v2648_v62  ;;  %v2217_v18 = vunpack.c.l.b16 %v1957_v22  ;;  %v7518_v22 = vrot.slane %v6682_v15, 1 }
 0x301   : > { %2974 = vrot.lane.b32.xlu1 %v2649_v57, %s5546_s17  ;;  %v1206_v38 = vpop.f32.mrf.mxu0  ;;  %v2876_v57 = vrot.slane %v2874_v54, 1  ;;  %v4492_v14 = vmax.f32 %v4491_v53, %v4355_v39  ;;  %v6732_v53 = vld [vmem:[%s7487_s4] ss:$0 sm:$0xff]  ;;  %v2650_v39 = vshrl.u32 %v6682_v15, 16 }
 0x302   : > { %v1516_v58 = vadd.f32 %v6399_v59, %v1206_v38  ;;  %v3764_v19 = vpop.f32.mrf.mxu1  ;;  %v6711_v56 = vpop.f32.mrf.mxu2  ;;  %v2271_v38 = vunpack.c.l.b16 %v2014_v21 }
 0x303   : > { %v3765_v33 = vadd.f32 %v6361_v45, %v3764_v19  ;;  %v2963_v42 = vpop.permute.xlu1 %2962  ;;  %v2877_v19 = vsel %vm2365_vm5, %v2872_v13, %v2876_v57 }
 0x304   : > { %v1652_v23 = vmax.f32 %v1516_v58, 0.0  ;;  %v3255_v17 = vsel %vm3175_vm4, %v6373_v24, %v2963_v42  ;;  %v6720_v34 = vpop.f32.mrf.mxu3 }
 0x305   : > { %v4094_v44 = vadd.f32 %v6441_v46, %v3765_v33  ;;  %3798 = vmatmul.bf16.gmra.mxu1 %v3255_v17  ;;  %v6725_v46 = vpack.c.b16 %v2272_v2, %v2271_v38 }
 0x306   : > { %v1958_v11 = vpack.c.bf16 %v1652_v23, %v1652_v23  ;;  %v2652_v23 = vor.u32 %v2650_v39, %v2648_v62 }
 0x307   : > { %v4356_v49 = vmax.f32 %v4094_v44, 0.0 }
 0x308   : > { %v2218_v45 = vunpack.c.l.b16 %v1958_v11 }
 0x309   : > { %v4493_v28 = vmax.f32 %v4492_v14, %v4356_v49  ;;  %3028 = vrot.lane.b32.xlu1 %v2877_v19, %s5546_s17  ;;  %v1209_v24 = vpop.f32.mrf.mxu0 }
 0x30a   : > { %v6723_v52 = vpack.c.b16 %v2218_v45, %v2217_v18  ;;  %v3766_v54 = vpop.f32.mrf.mxu1  ;;  %v6727_v21 = vpop.f32.mrf.mxu2  ;;  %v1575_v18 = vadd.f32 %v6399_v59, %v6664_v1  ;;  %v1517_v2 = vadd.f32 %v6399_v59, %v1209_v24  ;;  %v2878_v1 = vshrl.u32 %v6688_v25, 16 }
 0x30b   : > { %v3767_v11 = vadd.f32 %v6732_v53, %v3766_v54  ;;  %v3017_v58 = vpop.permute.xlu1 %3016  ;;  %v2882_v45 = vshll.u32 %v6725_v46, 16 }
 0x30c   : > { %5153 = vmatmul.msk.bf16.gmra.mxu0 %vm788_vm1, %v5373_v51  ;;  %v3336_v33 = vsel %vm3175_vm4, %v6377_v35, %v3017_v58  ;;  %v3110_v42 = vrot.slane %v6723_v52, 1  ;;  %v2654_v13 = vshll.u32 %v6723_v52, 16  ;;  %v1710_v51 = vmax.f32 %v1574_v10, 0.0  ;;  %v1368_v19 = vpop.f32.mrf.mxu3 }
 0x30d   : > { %3933 = vmatmul.bf16.gmra.mxu3 %v3336_v33  ;;  %v4096_v44 = vadd.f32 %v6456_v61, %v3767_v11  ;;  %v1711_v38 = vmax.f32 %v1575_v18, 0.0  ;;  %v1653_v14 = vmax.f32 %v1517_v2, 0.0  ;;  %v2880_v39 = vor.u32 %v2878_v1, %v2876_v57 }
 0x30e   : > { %v3111_v6 = vsel %vm3038_vm3, %v7518_v22, %v3110_v42  ;;  %v2656_v17 = vrot.slane %v2654_v13, 1  ;;  %v2016_v11 = vpack.c.bf16 %v1710_v51, %v1710_v51 }
 0x30f   : > { %5259 = vmatmul.msk.bf16.gmra.mxu2 %vm3175_vm4, %v3111_v6  ;;  %v4357_v61 = vmax.f32 %v4096_v44, 0.0  ;;  %v2017_v2 = vpack.c.bf16 %v1711_v38, %v1711_v38  ;;  %v1959_v33 = vpack.c.bf16 %v1653_v14, %v1653_v14  ;;  %v2884_v6 = vrot.slane %v2882_v45, 1 }
 0x310   : > { %v2657_v49 = vsel %vm2365_vm5, %v2652_v23, %v2656_v17  ;;  %v2273_v19 = vunpack.c.l.b16 %v2016_v11 }
 0x311   : > { %2976 = vrot.lane.b32.xlu0 %v2657_v49, %s5546_s17  ;;  %v1211_v24 = vpop.f32.mrf.mxu0  ;;  %v4494_v49 = vmax.f32 %v4493_v28, %v4357_v61  ;;  %v2274_v1 = vunpack.c.l.b16 %v2017_v2  ;;  %v2219_v44 = vunpack.c.l.b16 %v1959_v33 }
 0x312   : > { %v1518_v62 = vadd.f32 %v6399_v59, %v1211_v24  ;;  %v3769_v54 = vpop.f32.mrf.mxu1  ;;  %v6756_v58 = vpop.f32.mrf.mxu2  ;;  %v2885_v24 = vsel %vm2365_vm5, %v2880_v39, %v2884_v6 }
 0x313   : > { %v3770_v10 = vadd.f32 %v6732_v53, %v3769_v54  ;;  %v2965_v18 = vpop.permute.xlu0 %2964  ;;  %v5374_v54 = vld [vmem:[%s5642_s20 + $0x180] sm:$0xff]  ;;  %v6776_v61 = vpack.c.b16 %v2274_v1, %v2273_v19  ;;  %v2886_v1 = vshrl.u32 %v6725_v46, 16 }
 0x314   : > { %v1654_v13 = vmax.f32 %v1518_v62, 0.0  ;;  %v3258_v22 = vsel %vm3175_vm4, %v6417_v5, %v2965_v18 }
 0x315   : > { %v4099_v23 = vadd.f32 %v6485_v0, %v3770_v10  ;;  %3803 = vmatmul.bf16.gmra.mxu1 %v3258_v22  ;;  %v6772_v0 = vld [vmem:[%s7485_s2] ss:$0 sm:$0xff]  ;;  %7519 = vst [vmem:[#allocation15_spill] sm:$0xff] %v6776_v61  ;;  %v2658_v10 = vshrl.u32 %v6723_v52, 16  ;;  %v2967_v22 = vpop.permute.xlu2 %2966 }
 0x316   : > { %v1960_v59 = vpack.c.bf16 %v1654_v13, %v1654_v13  ;;  %v1576_v28 = vadd.f32 %v6772_v0, %v6677_v31  ;;  %v1577_v18 = vadd.f32 %v6772_v0, %v6707_v60 }
 0x317   : > { %v4358_v57 = vmax.f32 %v4099_v23, 0.0 }
 0x318   : > { %v2220_v51 = vunpack.c.l.b16 %v1960_v59  ;;  %v1712_v59 = vmax.f32 %v1576_v28, 0.0 }
 0x319   : > { %v4495_v38 = vmax.f32 %v4494_v49, %v4358_v57  ;;  %3030 = vrot.lane.b32.xlu0 %v2885_v24, %s5546_s17  ;;  %v1214_v14 = vpop.f32.mrf.mxu0  ;;  %v2660_v49 = vor.u32 %v2658_v10, %v2656_v17  ;;  %v1713_v57 = vmax.f32 %v1577_v18, 0.0  ;;  %v2890_v24 = vshll.u32 %v6776_v61, 16 }
 0x31a   : > { %v6765_v62 = vpack.c.b16 %v2220_v51, %v2219_v44  ;;  %v3771_v5 = vpop.f32.mrf.mxu1  ;;  %v6767_v45 = vpop.f32.mrf.mxu2  ;;  %v1519_v2 = vadd.f32 %v6772_v0, %v1214_v14  ;;  %v2018_v14 = vpack.c.bf16 %v1712_v59, %v1712_v59 }
 0x31b   : > { %v3772_v39 = vadd.f32 %v6732_v53, %v3771_v5  ;;  %v3019_v11 = vpop.permute.xlu0 %3018 }
 0x31c   : > { %5154 = vmatmul.msk.bf16.gmra.mxu0 %vm788_vm1, %v5374_v54  ;;  %v3339_v33 = vsel %vm3175_vm4, %v6421_v26, %v3019_v11  ;;  %v3112_v13 = vrot.slane %v6765_v62, 1  ;;  %v2662_v31 = vshll.u32 %v6765_v62, 16  ;;  %v1655_v44 = vmax.f32 %v1519_v2, 0.0 }
 0x31d   : > { %3938 = vmatmul.bf16.gmra.mxu3 %v3339_v33  ;;  %v4101_v60 = vadd.f32 %v6514_v47, %v3772_v39  ;;  %v2019_v39 = vpack.c.bf16 %v1713_v57, %v1713_v57  ;;  %v2888_v11 = vor.u32 %v2886_v1, %v2884_v6  ;;  %v3261_v2 = vsel %vm3175_vm4, %v6454_v16, %v2967_v22  ;;  %v3021_v57 = vpop.permute.xlu2 %3020 }
 0x31e   : > { %v3113_v23 = vsel %vm3038_vm3, %v3110_v42, %v3112_v13  ;;  %v2664_v19 = vrot.slane %v2662_v31, 1  ;;  %v1961_v10 = vpack.c.bf16 %v1655_v44, %v1655_v44  ;;  %v2892_v33 = vrot.slane %v2890_v24, 1 }
 0x31f   : > { %5260 = vmatmul.msk.bf16.gmra.mxu2 %vm3175_vm4, %v3113_v23  ;;  %v4359_v47 = vmax.f32 %v4101_v60, 0.0  ;;  %v2275_v23 = vunpack.c.l.b16 %v2018_v14  ;;  %v1578_v60 = vadd.f32 %v6772_v0, %v6720_v34  ;;  %v3342_v34 = vsel %vm3175_vm4, %v6458_v50, %v3021_v57 }
 0x320   : > { %v2665_v51 = vsel %vm2365_vm5, %v2660_v49, %v2664_v19  ;;  %v2221_v6 = vunpack.c.l.b16 %v1961_v10  ;;  %v2893_v44 = vsel %vm2365_vm5, %v2888_v11, %v2892_v33  ;;  %v2666_v11 = vshrl.u32 %v6765_v62, 16 }
 0x321   : > { %2978 = vrot.lane.b32.xlu2 %v2665_v51, %s5546_s17  ;;  %v1216_v54 = vpop.f32.mrf.mxu0  ;;  %v4496_v49 = vmax.f32 %v4495_v38, %v4359_v47  ;;  %v1714_v47 = vmax.f32 %v1578_v60, 0.0 }
 0x322   : > { %v1520_v42 = vadd.f32 %v6772_v0, %v1216_v54  ;;  %v3774_v17 = vpop.f32.mrf.mxu1  ;;  %v6796_v5 = vpop.f32.mrf.mxu2  ;;  %v2276_v54 = vunpack.c.l.b16 %v2019_v39 }
 0x323   : > { %v3775_v28 = vadd.f32 %v6732_v53, %v3774_v17 }
 0x324   : > { %v1656_v18 = vmax.f32 %v1520_v42, 0.0  ;;  %v5375_v42 = vld [vmem:[%s5642_s20 + $0x188] sm:$0xff]  ;;  %v6811_v38 = vpack.c.b16 %v2276_v54, %v2275_v23 }
 0x325   : > { %v4104_v31 = vadd.f32 %v6542_v9, %v3775_v28  ;;  %3808 = vmatmul.bf16.gmra.mxu1 %v3261_v2  ;;  %v2668_v2 = vor.u32 %v2666_v11, %v2664_v19 }
 0x326   : > { %v1962_v59 = vpack.c.bf16 %v1656_v18, %v1656_v18  ;;  %7520 = vst [vmem:[#allocation16_spill] sm:$0xff] %v6811_v38  ;;  %v2898_v60 = vshll.u32 %v6811_v38, 16 }
 0x327   : > { %v4360_v51 = vmax.f32 %v4104_v31, 0.0 }
 0x328   : > { %v2222_v1 = vunpack.c.l.b16 %v1962_v59  ;;  %v2894_v59 = vshrl.u32 %v6776_v61, 16 }
 0x329   : > { %v4497_v17 = vmax.f32 %v4496_v49, %v4360_v51  ;;  %3032 = vrot.lane.b32.xlu2 %v2893_v44, %s5546_s17  ;;  %v1219_v16 = vpop.f32.mrf.mxu0  ;;  %v1884_v51 = vsel %vm1421_vm6, %v1714_v47, 0.0  ;;  %v2900_v47 = vrot.slane %v2898_v60, 1 }
 0x32a   : > { %v6807_v9 = vpack.c.b16 %v2222_v1, %v2221_v6  ;;  %v3776_v22 = vpop.f32.mrf.mxu1  ;;  %v6809_v24 = vpop.f32.mrf.mxu2  ;;  %v1521_v28 = vadd.f32 %v6772_v0, %v1219_v16 }
 0x32b   : > { %v3777_v14 = vadd.f32 %v6732_v53, %v3776_v22 }
 0x32c   : > { %5155 = vmatmul.msk.bf16.gmra.mxu0 %vm788_vm1, %v5375_v42  ;;  %v3114_v39 = vrot.slane %v6807_v9, 1  ;;  %v2670_v10 = vshll.u32 %v6807_v9, 16  ;;  %v1657_v49 = vmax.f32 %v1521_v28, 0.0  ;;  %v2896_v42 = vor.u32 %v2894_v59, %v2892_v33  ;;  %v5376_v33 = vld [vmem:[%s5642_s20 + $0x190] sm:$0xff]  ;;  %s4749_s20 = sshll.u32 %s274_s22, 4  ;;  %s4750_s20 = int_to_ptr.vmem [resolvable:$true] %s4749_s20 }
 0x32d   : > { %3943 = vmatmul.bf16.gmra.mxu3 %v3342_v34  ;;  %v4106_v23 = vadd.f32 %v6576_v40, %v3777_v14  ;;  %v2020_v40 = vpack.c.bf16 %v1884_v51, %v1884_v51 }
 0x32e   : > { %v3115_v18 = vsel %vm3038_vm3, %v3112_v13, %v3114_v39  ;;  %v2672_v31 = vrot.slane %v2670_v10, 1  ;;  %v1963_v16 = vpack.c.bf16 %v1657_v49, %v1657_v49 }
 0x32f   : > { %5261 = vmatmul.msk.bf16.gmra.mxu2 %vm3175_vm4, %v3115_v18  ;;  %v4361_v6 = vmax.f32 %v4106_v23, 0.0  ;;  %v2356_v18 = vunpack.c.l.b16 %v2020_v40 }
 0x330   : > { %v2673_v54 = vsel %vm2365_vm5, %v2668_v2, %v2672_v31  ;;  %v2223_v23 = vunpack.c.l.b16 %v1963_v16 }
 0x331   : > { %2980 = vrot.lane.b32.xlu1 %v2673_v54, %s5546_s17  ;;  %v1221_v57 = vpop.f32.mrf.mxu0  ;;  %v4498_v10 = vmax.f32 %v4497_v17, %v4361_v6  ;;  %v2901_v54 = vsel %vm2365_vm5, %v2896_v42, %v2900_v47  ;;  %v6842_v60 = vpack.c.b16 %v2356_v18, %v2356_v18  ;;  %v2674_v17 = vshrl.u32 %v6807_v9, 16 }
 0x332   : > { %v1522_v13 = vadd.f32 %v6772_v0, %v1221_v57  ;;  %v3779_v19 = vpop.f32.mrf.mxu1  ;;  %v6832_v14 = vpop.f32.mrf.mxu2  ;;  %v2902_v18 = vshrl.u32 %v6811_v38, 16 }
 0x333   : > { %v3780_v1 = vadd.f32 %v6732_v53, %v3779_v19  ;;  %v2969_v44 = vpop.permute.xlu1 %2968  ;;  %7521 = vst [vmem:[#allocation17_spill] sm:$0xff] %v6842_v60  ;;  %v2676_v16 = vor.u32 %v2674_v17, %v2672_v31 }
 0x334   : > { %v1658_v22 = vmax.f32 %v1522_v13, 0.0  ;;  %v3264_v34 = vsel %vm3175_vm4, %v6502_v37, %v2969_v44 }
 0x335   : > { %v4109_v28 = vadd.f32 %v6594_v8, %v3780_v1  ;;  %3813 = vmatmul.bf16.gmra.mxu1 %v3264_v34  ;;  %v2906_v34 = vshll.u32 %v6842_v60, 16 }
 0x336   : > { %v1964_v11 = vpack.c.bf16 %v1658_v22, %v1658_v22 }
 0x337   : > { %v4362_v2 = vmax.f32 %v4109_v28, 0.0 }
 0x338   : > { %v2224_v51 = vunpack.c.l.b16 %v1964_v11 }
 0x339   : > { %v4499_v59 = vmax.f32 %v4498_v10, %v4362_v2  ;;  %3034 = vrot.lane.b32.xlu1 %v2901_v54, %s5546_s17  ;;  %v1224_v49 = vpop.f32.mrf.mxu0 }
 0x33a   : > { %v6840_v57 = vpack.c.b16 %v2224_v51, %v2223_v23  ;;  %v3781_v37 = vpop.f32.mrf.mxu1  ;;  %v1523_v19 = vadd.f32 %v6772_v0, %v1224_v49  ;;  %v6852_v44 = vpop.f32.mrf.mxu2 }
 0x33b   : > { %v3782_v8 = vadd.f32 %v6732_v53, %v3781_v37  ;;  %v3023_v13 = vpop.permute.xlu1 %3022 }
 0x33c   : > { %5156 = vmatmul.msk.bf16.gmra.mxu0 %vm788_vm1, %v5376_v33  ;;  %v3345_v6 = vsel %vm3175_vm4, %v6537_v7, %v3023_v13  ;;  %v3116_v40 = vrot.slane %v6840_v57, 1  ;;  %v2678_v1 = vshll.u32 %v6840_v57, 16  ;;  %v1659_v11 = vmax.f32 %v1523_v19, 0.0 }
 0x33d   : > { %3948 = vmatmul.bf16.gmra.mxu3 %v3345_v6  ;;  %v4111_v28 = vadd.f32 %v6617_v30, %v3782_v8  ;;  %v2908_v33 = vrot.slane %v2906_v34, 1  ;;  %v2904_v8 = vor.u32 %v2902_v18, %v2900_v47  ;;  %v2682_v18 = vshrl.u32 %v6840_v57, 16 }
 0x33e   : > { %v3117_v42 = vsel %vm3038_vm3, %v3114_v39, %v3116_v40  ;;  %v2680_v22 = vrot.slane %v2678_v1, 1  ;;  %v1965_v49 = vpack.c.bf16 %v1659_v11, %v1659_v11 }
 0x33f   : > { %5262 = vmatmul.msk.bf16.gmra.mxu2 %vm3175_vm4, %v3117_v42  ;;  %v4363_v39 = vmax.f32 %v4111_v28, 0.0  ;;  %v2909_v28 = vsel %vm2365_vm5, %v2904_v8, %v2908_v33 }
 0x340   : > { %v2681_v10 = vsel %vm2365_vm5, %v2676_v16, %v2680_v22  ;;  %v2225_v1 = vunpack.c.l.b16 %v1965_v49  ;;  %v2684_v33 = vor.u32 %v2682_v18, %v2680_v22 }
 0x341   : > { %2982 = vrot.lane.b32.xlu0 %v2681_v10, %s5546_s17  ;;  %v1226_v2 = vpop.f32.mrf.mxu0  ;;  %v4500_v19 = vmax.f32 %v4499_v59, %v4363_v39 }
 0x342   : > { %v1524_v23 = vadd.f32 %v6772_v0, %v1226_v2  ;;  %v3784_v51 = vpop.f32.mrf.mxu1  ;;  %v6866_v16 = vpop.f32.mrf.mxu2 }
 0x343   : > { %v3785_v31 = vadd.f32 %v6732_v53, %v3784_v51  ;;  %v2971_v54 = vpop.permute.xlu0 %2970 }
 0x344   : > { %v1660_v30 = vmax.f32 %v1524_v23, 0.0  ;;  %v3267_v37 = vsel %vm3175_vm4, %v6550_v32, %v2971_v54 }
 0x345   : > { %v4114_v13 = vadd.f32 %v6638_v36, %v3785_v31  ;;  %3818 = vmatmul.bf16.gmra.mxu1 %v3267_v37  ;;  %v2973_v31 = vpop.permute.xlu2 %2972 }
 0x346   : > { %v1966_v17 = vpack.c.bf16 %v1660_v30, %v1660_v30 }
 0x347   : > { %v4364_v6 = vmax.f32 %v4114_v13, 0.0 }
 0x348   : > { %v2226_v42 = vunpack.c.l.b16 %v1966_v17 }
 0x349   : > { %v4501_v10 = vmax.f32 %v4500_v19, %v4364_v6  ;;  %3036 = vrot.lane.b32.xlu0 %v2909_v28, %s5546_s17  ;;  %v1229_v34 = vpop.f32.mrf.mxu0 }
 0x34a   : > { %v6870_v11 = vpack.c.b16 %v2226_v42, %v2225_v1  ;;  %v3786_v32 = vpop.f32.mrf.mxu1  ;;  %v1525_v59 = vadd.f32 %v6772_v0, %v1229_v34  ;;  %v6884_v19 = vpop.f32.mrf.mxu2 }
 0x34b   : > { %v3787_v47 = vadd.f32 %v6732_v53, %v3786_v32  ;;  %v3025_v36 = vpop.permute.xlu0 %3024 }
 0x34c   : > { %v3348_v2 = vsel %vm3175_vm4, %v6552_v4, %v3025_v36  ;;  %v3118_v23 = vrot.slane %v6870_v11, 1  ;;  %v2686_v51 = vshll.u32 %v6870_v11, 16  ;;  %v1661_v37 = vmax.f32 %v1525_v59, 0.0 }
 0x34d   : > { %v4116_v39 = vadd.f32 %v6653_v41, %v3787_v47  ;;  %3953 = vmatmul.bf16.gmra.mxu3 %v3348_v2  ;;  %v3027_v32 = vpop.permute.xlu2 %3026 }
 0x34e   : > { %v3119_v54 = vsel %vm3038_vm3, %v3116_v40, %v3118_v23  ;;  %v2688_v49 = vrot.slane %v2686_v51, 1  ;;  %v1967_v1 = vpack.c.bf16 %v1661_v37, %v1661_v37  ;;  %v3270_v40 = vsel %vm3175_vm4, %v6591_v43, %v2973_v31 }
 0x34f   : > { %v4365_v30 = vmax.f32 %v4116_v39, 0.0  ;;  %5263 = vmatmul.msk.bf16.gmra.mxu2 %vm3175_vm4, %v3119_v54  ;;  %v3351_v39 = vsel %vm3175_vm4, %v6586_v3, %v3027_v32 }
 0x350   : > { %v2689_v8 = vsel %vm2365_vm5, %v2684_v33, %v2688_v49  ;;  %v2227_v47 = vunpack.c.l.b16 %v1967_v1  ;;  %v2690_v33 = vshrl.u32 %v6870_v11, 16 }
 0x351   : > { %v4502_v13 = vmax.f32 %v4501_v10, %v4365_v30  ;;  %2984 = vrot.lane.b32.xlu2 %v2689_v8, %s5546_s17  ;;  %v1231_v17 = vpop.f32.mrf.mxu0  ;;  %v6899_v8 = vpop.f32.mrf.mxu3 }
 0x352   : > { %v1526_v41 = vadd.f32 %v6772_v0, %v1231_v17  ;;  %v6894_v54 = vpop.f32.mrf.mxu2  ;;  %7522 = vst [vmem:[#allocation18_spill] sm:$0xff] %v6899_v8 }
 0x353   : > { %v4503_v6 = vrot.slane %v4502_v13, 4 }
 0x354   : > { %v1662_v42 = vmax.f32 %v1526_v41, 0.0  ;;  %v2692_v41 = vor.u32 %v2690_v33, %v2688_v49 }
 0x355   : > { %v4504_v22 = vmax.f32 %v4502_v13, %v4503_v6  ;;  %3823 = vmatmul.bf16.gmra.mxu1 %v3270_v40 }
 0x356   : > { %v1968_v28 = vpack.c.bf16 %v1662_v42, %v1662_v42 }
 0x357   : > { %v4505_v34 = vrot.slane %v4504_v22, 2 }
 0x358   : > { %v2228_v10 = vunpack.c.l.b16 %v1968_v28 }
 0x359   : > { %v4506_v36 = vmax.f32 %v4504_v22, %v4505_v34  ;;  %v1234_v18 = vpop.f32.mrf.mxu0 }
 0x35a   : > { %v6889_v59 = vpack.c.b16 %v2228_v10, %v2227_v47  ;;  %v1527_v2 = vadd.f32 %v6772_v0, %v1234_v18 }
 0x35b   : > { %v4507_v51 = vrot.slane %v4506_v36, 1 }
 0x35c   : > { %v1663_v43 = vmax.f32 %v1527_v2, 0.0  ;;  %v3120_v31 = vrot.slane %v6889_v59, 1  ;;  %v2694_v30 = vshll.u32 %v6889_v59, 16  ;;  %v2698_v49 = vshrl.u32 %v6889_v59, 16 }
 0x35d   : > { %v4508_v37 = vmax.f32 %v4506_v36, %v4507_v51  ;;  %3958 = vmatmul.bf16.gmra.mxu3 %v3351_v39  ;;  %v6911_v36 = vpop.f32.mrf.mxu2  ;;  %v6913_v51 = vpop.f32.mrf.mxu3 }
 0x35e   : > { %v1833_v13 = vsel %vm1421_vm6, %v1663_v43, 0.0  ;;  %v3121_v17 = vsel %vm3038_vm3, %v3118_v23, %v3120_v31  ;;  %v2696_v6 = vrot.slane %v2694_v30, 1  ;;  %7523 = vst [vmem:[#allocation19_spill] sm:$0xff] %v6913_v51 }
 0x35f   : > { %v4616_v1 = vpack.c.bf16 %v4508_v37, %v4508_v37  ;;  %v1969_v42 = vpack.c.bf16 %v1833_v13, %v1833_v13  ;;  %5264 = vmatmul.msk.bf16.gmra.mxu2 %vm3175_vm4, %v3121_v17 }
 0x360   : > { %v2697_v40 = vsel %vm2365_vm5, %v2692_v41, %v2696_v6  ;;  %v2700_v18 = vor.u32 %v2698_v49, %v2696_v6 }
 0x361   : > { %v4652_v22 = vunpack.c.l.b16 %v4616_v1  ;;  %v2353_v28 = vunpack.c.l.b16 %v1969_v42  ;;  %2986 = vrot.lane.b32.xlu1 %v2697_v40, %s5546_s17  ;;  %v1236_v34 = vpop.f32.mrf.mxu0 }
 0x362   : > { %v3789_v32 = vpop.f32.mrf.mxu1 }
 0x363   : > { %v6908_v47 = vsel %vm4660_vm8, %v4652_v22, %v6612_v27  ;;  %v2361_v10 = vpack.c.b16 %v2353_v28, %v2353_v28  ;;  %v3790_v37 = vadd.f32 %v6732_v53, %v3789_v32 }
 0x365   : > { %v2702_v23 = vshll.u32 %v2361_v10, 16  ;;  %v3122_v33 = vrot.slane %v2361_v10, 1  ;;  %v6922_v41 = vpop.f32.mrf.mxu2  ;;  %v4119_v1 = vadd.f32 %v6670_v48, %v3790_v37 }
 0x367   : > { %v2704_v2 = vrot.slane %v2702_v23, 1  ;;  %v3123_v13 = vsel %vm3038_vm3, %v3120_v31, %v3122_v33  ;;  %v4366_v10 = vmax.f32 %v4119_v1, 0.0 }
 0x369   : > { %v1238_v39 = vpop.f32.mrf.mxu0  ;;  %v2705_v43 = vsel %vm2365_vm5, %v2700_v18, %v2704_v2 }
 0x36a   : > { %v3791_v30 = vpop.f32.mrf.mxu1  ;;  %2988 = vrot.lane.b32.xlu2 %v2705_v43, %s5546_s17  ;;  %v1528_v42 = vadd.f32 %v6772_v0, %v1238_v39 }
 0x36b   : > { %v3792_v27 = vadd.f32 %v6732_v53, %v3791_v30 }
 0x36c   : > { %v1664_v23 = vmax.f32 %v1528_v42, 0.0 }
 0x36d   : > { %v4121_v17 = vadd.f32 %v6684_v12, %v3792_v27  ;;  %v6937_v27 = vpop.f32.mrf.mxu2 }
 0x36e   : > { %v1834_v43 = vsel %vm1388_vm2, %v1664_v23, 0.0 }
 0x36f   : > { %5265 = vmatmul.msk.bf16.gmra.mxu2 %vm3175_vm4, %v3123_v13  ;;  %v4367_v34 = vmax.f32 %v4121_v17, 0.0  ;;  %v1970_v1 = vpack.c.bf16 %v1834_v43, %v1834_v43 }
 0x370   : > { %v6924_v6 = vpop.f32.mrf.mxu3 }
 0x371   : > { %v1240_v40 = vpop.f32.mrf.mxu0  ;;  %v4509_v48 = vmax.f32 %v4366_v10, %v4367_v34 }
 0x372   : > { %v1529_v22 = vadd.f32 %v6772_v0, %v1240_v40  ;;  %v3794_v28 = vpop.f32.mrf.mxu1 }
 0x373   : > { %v3795_v32 = vadd.f32 %v6732_v53, %v3794_v28  ;;  %v2975_v31 = vpop.permute.xlu1 %2974 }
 0x374   : > { %v3273_v12 = vsel %vm3175_vm4, %v6667_v29, %v2975_v31  ;;  %v1665_v18 = vmax.f32 %v1529_v22, 0.0  ;;  %v2229_v22 = vunpack.c.l.b16 %v1970_v1 }
 0x375   : > { %v4124_v49 = vadd.f32 %v6711_v56, %v3795_v32  ;;  %3828 = vmatmul.bf16.gmra.mxu1 %v3273_v12 }
 0x376   : > { %v1971_v37 = vpack.c.bf16 %v1665_v18, %v1665_v18 }
 0x377   : > { %v4368_v2 = vmax.f32 %v4124_v49, 0.0 }
 0x378   : > { %v6933_v39 = vpop.f32.mrf.mxu3  ;;  %v2230_v40 = vunpack.c.l.b16 %v1971_v37 }
 0x379   : > { %v4510_v33 = vmax.f32 %v4509_v48, %v4368_v2  ;;  %v1243_v30 = vpop.f32.mrf.mxu0 }
 0x37a   : > { %v3796_v13 = vpop.f32.mrf.mxu1  ;;  %v1530_v56 = vadd.f32 %v6772_v0, %v1243_v30  ;;  %v6946_v31 = vpack.c.b16 %v2230_v40, %v2229_v22 }
 0x37b   : > { %v3797_v29 = vadd.f32 %v6732_v53, %v3796_v13  ;;  %v3029_v17 = vpop.permute.xlu1 %3028 }
 0x37c   : > { %v3354_v42 = vsel %vm3175_vm4, %v6614_v63, %v3029_v17  ;;  %v1666_v28 = vmax.f32 %v1530_v56, 0.0  ;;  %v2709_v13 = vshll.u32 %v6946_v31, 16 }
 0x37d   : > { %3963 = vmatmul.bf16.gmra.mxu3 %v3354_v42  ;;  %v4126_v20 = vadd.f32 %v6727_v21, %v3797_v29 }
 0x37e   : > { %v1972_v2 = vpack.c.bf16 %v1666_v28, %v1666_v28 }
 0x37f   : > { %v4369_v49 = vmax.f32 %v4126_v20, 0.0 }
 0x380   : > { %v6944_v34 = vpop.f32.mrf.mxu3  ;;  %v2231_v1 = vunpack.c.l.b16 %v1972_v2 }
 0x381   : > { %7524 = vst [vmem:[#allocation20_spill] sm:$0xff] %v6944_v34  ;;  %v1245_v32 = vpop.f32.mrf.mxu0  ;;  %v4511_v29 = vmax.f32 %v4510_v33, %v4369_v49  ;;  %v2707_v33 = vshrl.u32 %v6946_v31, 16 }
 0x382   : > { %v1531_v12 = vadd.f32 %v6772_v0, %v1245_v32  ;;  %v3799_v10 = vpop.f32.mrf.mxu1  ;;  %v6949_v23 = vpop.f32.mrf.mxu2 }
 0x383   : > { %v3800_v18 = vadd.f32 %v6732_v53, %v3799_v10  ;;  %v2977_v48 = vpop.permute.xlu0 %2976  ;;  %v3124_v10 = vrot.slane %v6946_v31, 1 }
 0x384   : > { %v1667_v43 = vmax.f32 %v1531_v12, 0.0  ;;  %v3276_v21 = vsel %vm3175_vm4, %v6682_v15, %v2977_v48  ;;  %v2711_v15 = vrot.slane %v2709_v13, 1 }
 0x385   : > { %v4129_v30 = vadd.f32 %v6756_v58, %v3800_v18  ;;  %3833 = vmatmul.bf16.gmra.mxu1 %v3276_v21 }
 0x386   : > { %v1973_v37 = vpack.c.bf16 %v1667_v43, %v1667_v43  ;;  %v2979_v43 = vpop.permute.xlu2 %2978 }
 0x387   : > { %v4370_v17 = vmax.f32 %v4129_v30, 0.0  ;;  %v2712_v30 = vor.u32 %v2711_v15, %v2707_v33 }
 0x388   : > { %v2232_v56 = vunpack.c.l.b16 %v1973_v37  ;;  %v6956_v42 = vpop.f32.mrf.mxu3 }
 0x389   : > { %7525 = vst [vmem:[#allocation21_spill] sm:$0xff] %v6956_v42  ;;  %v4512_v40 = vmax.f32 %v4511_v29, %v4370_v17  ;;  %v1248_v20 = vpop.f32.mrf.mxu0  ;;  %v7537_v42 = vld [vmem:[#allocation13_spill] sm:$0xff] }
 0x38a   : > { %v6958_v22 = vpack.c.b16 %v2232_v56, %v2231_v1  ;;  %v3801_v28 = vpop.f32.mrf.mxu1  ;;  %v6960_v32 = vpop.f32.mrf.mxu2  ;;  %v1532_v49 = vadd.f32 %v6772_v0, %v1248_v20 }
 0x38b   : > { %v3802_v58 = vadd.f32 %v6732_v53, %v3801_v28  ;;  %v3031_v12 = vpop.permute.xlu0 %3030 }
 0x38c   : > { %v3357_v18 = vsel %vm3175_vm4, %v6688_v25, %v3031_v12  ;;  %v3125_v48 = vrot.slane %v6958_v22, 1  ;;  %v2714_v2 = vshll.u32 %v6958_v22, 16  ;;  %v1668_v29 = vmax.f32 %v1532_v49, 0.0 }
 0x38d   : > { %3968 = vmatmul.bf16.gmra.mxu3 %v3357_v18  ;;  %v4131_v13 = vadd.f32 %v6767_v45, %v3802_v58  ;;  %v3279_v58 = vsel %vm3175_vm4, %v6723_v52, %v2979_v43 }
 0x38e   : > { %v3126_v21 = vsel %vm3038_vm3, %v3124_v10, %v3125_v48  ;;  %v2716_v37 = vrot.slane %v2714_v2, 1  ;;  %v1974_v33 = vpack.c.bf16 %v1668_v29, %v1668_v29 }
 0x38f   : > { %5266 = vmatmul.msk.bf16.gmra.mxu2 %vm3175_vm4, %v3126_v21  ;;  %v4371_v10 = vmax.f32 %v4131_v13, 0.0 }
 0x390   : > { %v6973_v17 = vpop.f32.mrf.mxu3  ;;  %v2717_v1 = vsel %vm2365_vm5, %v2712_v30, %v2716_v37  ;;  %v3033_v30 = vpop.permute.xlu2 %3032 }
 0x391   : > { %7526 = vst [vmem:[#allocation22_spill] sm:$0xff] %v6973_v17  ;;  %2990 = vrot.lane.b32.xlu0 %v2717_v1, %s5546_s17  ;;  %v1250_v56 = vpop.f32.mrf.mxu0  ;;  %v4513_v2 = vmax.f32 %v4512_v40, %v4371_v10  ;;  %v2233_v1 = vunpack.c.l.b16 %v1974_v33 }
 0x392   : > { %v1533_v20 = vadd.f32 %v6772_v0, %v1250_v56  ;;  %v3804_v28 = vpop.f32.mrf.mxu1  ;;  %v6978_v12 = vpop.f32.mrf.mxu2 }
 0x393   : > { %v3805_v15 = vadd.f32 %v6732_v53, %v3804_v28  ;;  %v2718_v28 = vshrl.u32 %v6958_v22, 16 }
 0x394   : > { %v1669_v45 = vmax.f32 %v1533_v20, 0.0 }
 0x395   : > { %v4134_v49 = vadd.f32 %v6796_v5, %v3805_v15  ;;  %3838 = vmatmul.bf16.gmra.mxu1 %v3279_v58  ;;  %v3360_v5 = vsel %vm3175_vm4, %v6725_v46, %v3033_v30  ;;  %v2720_v33 = vor.u32 %v2718_v28, %v2716_v37 }
 0x396   : > { %v1975_v18 = vpack.c.bf16 %v1669_v45, %v1669_v45 }
 0x397   : > { %v4372_v21 = vmax.f32 %v4134_v49, 0.0 }
 0x398   : > { %v2234_v56 = vunpack.c.l.b16 %v1975_v18  ;;  %v6984_v51 = vpop.f32.mrf.mxu3 }
 0x399   : > { %7527 = vst [vmem:[#allocation23_spill] sm:$0xff] %v6984_v51  ;;  %v4514_v8 = vmax.f32 %v4513_v2, %v4372_v21  ;;  %v1253_v13 = vpop.f32.mrf.mxu0 }
 0x39a   : > { %v6986_v60 = vpack.c.b16 %v2234_v56, %v2233_v1  ;;  %v3806_v29 = vpop.f32.mrf.mxu1  ;;  %v6988_v20 = vpop.f32.mrf.mxu2  ;;  %v1534_v40 = vadd.f32 %v6772_v0, %v1253_v13 }
 0x39b   : > { %v3807_v52 = vadd.f32 %v6732_v53, %v3806_v29 }
 0x39c   : > { %v3127_v43 = vrot.slane %v6986_v60, 1  ;;  %v2722_v10 = vshll.u32 %v6986_v60, 16  ;;  %v1670_v49 = vmax.f32 %v1534_v40, 0.0 }
 0x39d   : > { %3973 = vmatmul.bf16.gmra.mxu3 %v3360_v5  ;;  %v4136_v58 = vadd.f32 %v6809_v24, %v3807_v52 }
 0x39e   : > { %v3128_v15 = vsel %vm3038_vm3, %v3125_v48, %v3127_v43  ;;  %v2724_v45 = vrot.slane %v2722_v10, 1  ;;  %v1976_v24 = vpack.c.bf16 %v1670_v49, %v1670_v49 }
 0x39f   : > { %5267 = vmatmul.msk.bf16.gmra.mxu2 %vm3175_vm4, %v3128_v15  ;;  %v4373_v48 = vmax.f32 %v4136_v58, 0.0 }
 0x3a0   : > { %v7000_v18 = vpop.f32.mrf.mxu3  ;;  %v2725_v2 = vsel %vm2365_vm5, %v2720_v33, %v2724_v45  ;;  %v2235_v15 = vunpack.c.l.b16 %v1976_v24 }
 0x3a1   : > { %7528 = vst [vmem:[#allocation24_spill] sm:$0xff] %v7000_v18  ;;  %2992 = vrot.lane.b32.xlu1 %v2725_v2, %s5546_s17  ;;  %v1255_v21 = vpop.f32.mrf.mxu0  ;;  %v4515_v28 = vmax.f32 %v4514_v8, %v4373_v48 }
 0x3a2   : > { %v1535_v30 = vadd.f32 %v6772_v0, %v1255_v21  ;;  %v3809_v1 = vpop.f32.mrf.mxu1  ;;  %v7005_v56 = vpop.f32.mrf.mxu2 }
 0x3a3   : > { %v3810_v37 = vadd.f32 %v6732_v53, %v3809_v1  ;;  %v2981_v13 = vpop.permute.xlu1 %2980 }
 0x3a4   : > { %v1671_v29 = vmax.f32 %v1535_v30, 0.0  ;;  %v3282_v52 = vsel %vm3175_vm4, %v6765_v62, %v2981_v13 }
 0x3a5   : > { %v4139_v5 = vadd.f32 %v6832_v14, %v3810_v37  ;;  %3843 = vmatmul.bf16.gmra.mxu1 %v3282_v52  ;;  %v2726_v14 = vshrl.u32 %v6986_v60, 16 }
 0x3a6   : > { %v1977_v40 = vpack.c.bf16 %v1671_v29, %v1671_v29 }
 0x3a7   : > { %v4374_v10 = vmax.f32 %v4139_v5, 0.0  ;;  %v2728_v29 = vor.u32 %v2726_v14, %v2724_v45 }
 0x3a8   : > { %v2236_v33 = vunpack.c.l.b16 %v1977_v40  ;;  %v7011_v2 = vpop.f32.mrf.mxu3 }
 0x3a9   : > { %7529 = vst [vmem:[#allocation25_spill] sm:$0xff] %v7011_v2  ;;  %v4516_v21 = vmax.f32 %v4515_v28, %v4374_v10  ;;  %v1258_v58 = vpop.f32.mrf.mxu0 }
 0x3aa   : > { %v7013_v18 = vpack.c.b16 %v2236_v33, %v2235_v15  ;;  %v3811_v1 = vpop.f32.mrf.mxu1  ;;  %v7015_v49 = vpop.f32.mrf.mxu2  ;;  %v1536_v37 = vadd.f32 %v6772_v0, %v1258_v58 }
 0x3ab   : > { %v3812_v30 = vadd.f32 %v6732_v53, %v3811_v1  ;;  %v3035_v62 = vpop.permute.xlu1 %3034 }
 0x3ac   : > { %v3363_v8 = vsel %vm3175_vm4, %v6776_v61, %v3035_v62  ;;  %v3129_v48 = vrot.slane %v7013_v18, 1  ;;  %v2730_v13 = vshll.u32 %v7013_v18, 16  ;;  %v1672_v40 = vmax.f32 %v1536_v37, 0.0 }
 0x3ad   : > { %3978 = vmatmul.bf16.gmra.mxu3 %v3363_v8  ;;  %v4141_v5 = vadd.f32 %v6852_v44, %v3812_v30 }
 0x3ae   : > { %v3130_v24 = vsel %vm3038_vm3, %v3127_v43, %v3129_v48  ;;  %v2732_v52 = vrot.slane %v2730_v13, 1  ;;  %v1978_v44 = vpack.c.bf16 %v1672_v40, %v1672_v40  ;;  %v7531_v13 = vld [vmem:[#allocation6_spill] sm:$0xff] }
 0x3af   : > { %5268 = vmatmul.msk.bf16.gmra.mxu2 %vm3175_vm4, %v3130_v24  ;;  %v4375_v43 = vmax.f32 %v4141_v5, 0.0  ;;  %v1544_v24 = vadd.f32 %v6772_v0, %v7531_v13 }
 0x3b0   : > { %v2733_v28 = vsel %vm2365_vm5, %v2728_v29, %v2732_v52  ;;  %v7028_v10 = vpop.f32.mrf.mxu3 }
 0x3b1   : > { %7530 = vst [vmem:[#allocation26_spill] sm:$0xff] %v7028_v10  ;;  %2994 = vrot.lane.b32.xlu2 %v2733_v28, %s5546_s17  ;;  %v1260_v15 = vpop.f32.mrf.mxu0  ;;  %v4517_v29 = vmax.f32 %v4516_v21, %v4375_v43  ;;  %v1680_v51 = vmax.f32 %v1544_v24, 0.0 }
 0x3b2   : > { %v1537_v33 = vadd.f32 %v6772_v0, %v1260_v15  ;;  %v3814_v58 = vpop.f32.mrf.mxu1  ;;  %v7032_v1 = vpop.f32.mrf.mxu2  ;;  %v2237_v15 = vunpack.c.l.b16 %v1978_v44 }
 0x3b3   : > { %v3815_v45 = vadd.f32 %v6732_v53, %v3814_v58  ;;  %v2983_v62 = vpop.permute.xlu0 %2982 }
 0x3b4   : > { %v1673_v30 = vmax.f32 %v1537_v33, 0.0  ;;  %v3285_v14 = vsel %vm3175_vm4, %v6807_v9, %v2983_v62  ;;  %v7532_v62 = vld [vmem:[#allocation5_spill] sm:$0xff] }
 0x3b5   : > { %v4144_v37 = vadd.f32 %v6866_v16, %v3815_v45  ;;  %3848 = vmatmul.bf16.gmra.mxu1 %v3285_v14  ;;  %v2734_v45 = vshrl.u32 %v7013_v18, 16 }
 0x3b6   : > { %v1979_v8 = vpack.c.bf16 %v1673_v30, %v1673_v30  ;;  %v2754_v30 = vshll.u32 %v7532_v62, 16 }
 0x3b7   : > { %v4376_v28 = vmax.f32 %v4144_v37, 0.0 }
 0x3b8   : > { %v2238_v10 = vunpack.c.l.b16 %v1979_v8  ;;  %v7047_v14 = vpop.f32.mrf.mxu3  ;;  %v2736_v8 = vor.u32 %v2734_v45, %v2732_v52 }
 0x3b9   : > { %v4518_v5 = vmax.f32 %v4517_v29, %v4376_v28  ;;  %v1263_v2 = vpop.f32.mrf.mxu0  ;;  %7533 = vst [vmem:[#allocation6_spill] sm:$0xff] %v7047_v14  ;;  %v7057_v29 = vrot.slane %v2754_v30, 1  ;;  %v1850_v28 = vsel %vm1421_vm6, %v1680_v51, 0.0  ;;  %v2985_v14 = vpop.permute.xlu2 %2984 }
 0x3ba   : > { %v7040_v58 = vpack.c.b16 %v2238_v10, %v2237_v15  ;;  %v3816_v40 = vpop.f32.mrf.mxu1  ;;  %v7042_v33 = vpop.f32.mrf.mxu2  ;;  %v1538_v21 = vadd.f32 %v6772_v0, %v1263_v2  ;;  %v2758_v2 = vshrl.u32 %v7532_v62, 16 }
 0x3bb   : > { %v3817_v9 = vadd.f32 %v6732_v53, %v3816_v40  ;;  %v3037_v16 = vpop.permute.xlu0 %3036 }
 0x3bc   : > { %v3366_v43 = vsel %vm3175_vm4, %v6811_v38, %v3037_v16  ;;  %v3131_v10 = vrot.slane %v7040_v58, 1  ;;  %v2738_v44 = vshll.u32 %v7040_v58, 16  ;;  %v1674_v15 = vmax.f32 %v1538_v21, 0.0  ;;  %v7534_v16 = vld [vmem:[#allocation7_spill] sm:$0xff]  ;;  %v7535_v38 = vld [vmem:[#allocation9_spill] sm:$0xff] }
 0x3bd   : > { %3983 = vmatmul.bf16.gmra.mxu3 %v3366_v43  ;;  %v4146_v24 = vadd.f32 %v6884_v19, %v3817_v9  ;;  %v2762_v43 = vshll.u32 %v7534_v16, 16  ;;  %v1986_v9 = vpack.c.bf16 %v1850_v28, %v1850_v28 }
 0x3be   : > { %v3132_v37 = vsel %vm3038_vm3, %v3129_v48, %v3131_v10  ;;  %v2740_v13 = vrot.slane %v2738_v44, 1  ;;  %v2760_v44 = vor.u32 %v2758_v2, %v7057_v29  ;;  %v1980_v55 = vpack.c.bf16 %v1674_v15, %v1674_v15 }
 0x3bf   : > { %5269 = vmatmul.msk.bf16.gmra.mxu2 %vm3175_vm4, %v3132_v37  ;;  %v4377_v45 = vmax.f32 %v4146_v24, 0.0  ;;  %v3288_v37 = vsel %vm3175_vm4, %v6840_v57, %v2985_v14  ;;  %v2354_v28 = vunpack.c.l.b16 %v1986_v9  ;;  %v2786_v2 = vshrl.u32 %v7535_v38, 16 }
 0x3c0   : > { %v2741_v40 = vsel %vm2365_vm5, %v2736_v8, %v2740_v13  ;;  %v2764_v8 = vrot.slane %v2762_v43, 1  ;;  %v2239_v15 = vunpack.c.l.b16 %v1980_v55  ;;  %v3148_v57 = vrot.slane %v7537_v42, 1 }
 0x3c1   : > { %2996 = vrot.lane.b32.xlu0 %v2741_v40, %s5546_s17  ;;  %v1265_v48 = vpop.f32.mrf.mxu0  ;;  %v7083_v9 = vpack.c.b16 %v2354_v28, %v2354_v28  ;;  %v2742_v55 = vshrl.u32 %v7040_v58, 16 }
 0x3c2   : > { %v1539_v19 = vadd.f32 %v6772_v0, %v1265_v48  ;;  %v3819_v52 = vpop.f32.mrf.mxu1  ;;  %v7068_v21 = vpop.f32.mrf.mxu2  ;;  %v2782_v0 = vshll.u32 %v7535_v38, 16  ;;  %v2765_v17 = vsel %vm2365_vm5, %v2760_v44, %v2764_v8 }
 0x3c3   : > { %v3820_v30 = vadd.f32 %v6732_v53, %v3819_v52  ;;  %v7074_v48 = vpop.f32.mrf.mxu3  ;;  %v4519_v53 = vmax.f32 %v4518_v5, %v4377_v45  ;;  %v7088_v5 = vld [vmem:[%s7487_s4] ss:$0 sm:$0xff] }
 0x3c4   : > { %v1675_v51 = vmax.f32 %v1539_v19, 0.0  ;;  %7536 = vst [vmem:[#allocation5_spill] sm:$0xff] %v7074_v48  ;;  %v7540_v48 = vld [vmem:[#allocation12_spill] sm:$0xff] }
 0x3c5   : > { %v4149_v40 = vadd.f32 %v6894_v54, %v3820_v30  ;;  %3853 = vmatmul.bf16.gmra.mxu1 %v3288_v37  ;;  %v2784_v54 = vrot.slane %v2782_v0, 1  ;;  %v7538_v37 = vld [vmem:[#allocation11_spill] sm:$0xff]  ;;  %v7539_v0 = vld [vmem:[#allocation8_spill] sm:$0xff] }
 0x3c6   : > { %v1981_v24 = vpack.c.bf16 %v1675_v51, %v1675_v51  ;;  %v7504_v51 = vrot.slane %v7538_v37, 1 }
 0x3c7   : > { %v4378_v52 = vmax.f32 %v4149_v40, 0.0  ;;  %v2788_v44 = vor.u32 %v2786_v2, %v2784_v54 }
 0x3c8   : > { %v2240_v19 = vunpack.c.l.b16 %v1981_v24  ;;  %v3149_v42 = vsel %vm3038_vm3, %v7504_v51, %v3148_v57  ;;  %v2777_v24 = vshll.u32 %v7539_v0, 16 }
 0x3c9   : > { %v4520_v14 = vmax.f32 %v4519_v53, %v4378_v52  ;;  %3002 = vrot.lane.b32.xlu0 %v2765_v17, %s5546_s17  ;;  %v2744_v52 = vor.u32 %v2742_v55, %v2740_v13 }
 0x3ca   : > { %v7080_v43 = vpack.c.b16 %v2240_v19, %v2239_v15  ;;  %v3821_v30 = vpop.f32.mrf.mxu1  ;;  %v7099_v28 = vpop.f32.mrf.mxu2  ;;  %v2770_v19 = vshll.u32 %v7083_v9, 16  ;;  %v2779_v55 = vrot.slane %v2777_v24, 1 }
 0x3cb   : > { %v3822_v45 = vadd.f32 %v7088_v5, %v3821_v30  ;;  %v7106_v51 = vpop.f32.mrf.mxu3 }
 0x3cc   : > { %v3133_v17 = vrot.slane %v7080_v43, 1  ;;  %v2746_v40 = vshll.u32 %v7080_v43, 16  ;;  %v2750_v15 = vshrl.u32 %v7080_v43, 16 }
 0x3cd   : > { %5277 = vmatmul.msk.bf16.vlgmr.msra.gmra.mxu3 %vm3175_vm4, %v3149_v42  ;;  %v4151_v30 = vadd.f32 %v6911_v36, %v3822_v45  ;;  %v2793_v42 = vsel %vm2365_vm5, %v2788_v44, %v7540_v48  ;;  %v2775_v45 = vshrl.u32 %v7539_v0, 16 }
 0x3ce   : > { %v3134_v53 = vsel %vm3038_vm3, %v3131_v10, %v3133_v17  ;;  %v2748_v2 = vrot.slane %v2746_v40, 1  ;;  %v2766_v10 = vshrl.u32 %v7534_v16, 16 }
 0x3cf   : > { %5270 = vmatmul.msk.bf16.gmra.mxu2 %vm3175_vm4, %v3134_v53  ;;  %v4379_v40 = vmax.f32 %v4151_v30, 0.0  ;;  %v3150_v30 = vrot.slane %v6377_v35, 1 }
 0x3d0   : > { %v2749_v61 = vsel %vm2365_vm5, %v2744_v52, %v2748_v2  ;;  %v2752_v34 = vor.u32 %v2750_v15, %v2748_v2  ;;  %v2768_v52 = vor.u32 %v2766_v10, %v2764_v8  ;;  %v2772_v2 = vrot.slane %v2770_v19, 1 }
 0x3d1   : > { %3008 = vrot.lane.b32.xlu0 %v2793_v42, %s5546_s17  ;;  %2998 = vrot.lane.b32.xlu1 %v2749_v61, %s5546_s17  ;;  %v2780_v15 = vor.u32 %v2779_v55, %v2775_v45  ;;  %v4521_v42 = vmax.f32 %v4520_v14, %v4379_v40  ;;  %v3151_v14 = vsel %vm3038_vm3, %v3148_v57, %v3150_v30  ;;  %v3135_v19 = vrot.slane %v7532_v62, 1  ;;  %v2989_v55 = vpop.permute.xlu2 %2988 }
 0x3d2   : > { %v3824_v13 = vpop.f32.mrf.mxu1  ;;  %v2757_v36 = vsel %vm2365_vm5, %v2752_v34, %v7057_v29  ;;  %v7122_v29 = vpop.f32.mrf.mxu2  ;;  %v2773_v24 = vsel %vm2365_vm5, %v2768_v52, %v2772_v2  ;;  %v3294_v57 = vsel %vm3175_vm4, %v6889_v59, %v2989_v55  ;;  %v3152_v52 = vrot.slane %v6421_v26, 1 }
 0x3d3   : > { %v3825_v53 = vadd.f32 %v7088_v5, %v3824_v13  ;;  %v2987_v48 = vpop.permute.xlu1 %2986  ;;  %3000 = vrot.lane.b32.xlu2 %v2757_v36, %s5546_s17  ;;  %v7127_v36 = vpop.f32.mrf.mxu3  ;;  %v2785_v8 = vsel %vm2365_vm5, %v2780_v15, %v2784_v54  ;;  %v3136_v35 = vsel %vm3038_vm3, %v3133_v17, %v3135_v19  ;;  %v3137_v17 = vrot.slane %v7534_v16, 1 }
 0x3d4   : > { %v3291_v44 = vsel %vm3175_vm4, %v6870_v11, %v2987_v48 }
 0x3d5   : > { %v4154_v61 = vadd.f32 %v6922_v41, %v3825_v53  ;;  %3858 = vmatmul.bf16.gmra.mxu1 %v3291_v44  ;;  %v3138_v59 = vsel %vm3038_vm3, %v3135_v19, %v3137_v17 }
 0x3d7   : > { %v4380_v34 = vmax.f32 %v4154_v61, 0.0 }
 0x3d9   : > { %v4522_v13 = vmax.f32 %v4521_v42, %v4380_v34  ;;  %3004 = vrot.lane.b32.xlu1 %v2773_v24, %s5546_s17  ;;  %v3153_v42 = vsel %vm3038_vm3, %v3150_v30, %v3152_v52  ;;  %v3154_v30 = vrot.slane %v6458_v50, 1 }
 0x3da   : > { %v3826_v11 = vpop.f32.mrf.mxu1  ;;  %v7138_v54 = vpop.f32.mrf.mxu2 }
 0x3db   : > { %v3827_v41 = vadd.f32 %v7088_v5, %v3826_v11  ;;  %3006 = vrot.lane.b32.xlu2 %v2785_v8, %s5546_s17  ;;  %v7140_v48 = vpop.f32.mrf.mxu3  ;;  %s4737_s17 = scalar_lea.sflag [#allocation3], %s272_s9 }
 0x3dd   : > { %v4156_v10 = vadd.f32 %v6937_v27, %v3827_v41  ;;  %5278 = vmatmul.msk.bf16.gmra.mxu3 %vm3175_vm4, %v3151_v14 }
 0x3df   : > { %v4381_v45 = vmax.f32 %v4156_v10, 0.0  ;;  %5271 = vmatmul.msk.bf16.gmra.mxu2 %vm3175_vm4, %v3136_v35  ;;  %v3139_v10 = vrot.slane %v7083_v9, 1 }
 0x3e1   : > { %v4523_v40 = vmax.f32 %v4522_v13, %v4381_v45  ;;  %v3155_v45 = vsel %vm3038_vm3, %v3152_v52, %v3154_v30 }
 0x3e2   : > { %v7146_v15 = vpop.f32.mrf.mxu2 }
 0x3e3   : > { %v4524_v53 = vrot.slane %v4523_v40, 4  ;;  %v7150_v24 = vpop.f32.mrf.mxu3 }
 0x3e5   : > { %v4525_v44 = vmax.f32 %v4523_v40, %v4524_v53  ;;  %3863 = vmatmul.bf16.gmra.mxu1 %v3294_v57 }
 0x3e7   : > { %v4526_v27 = vrot.slane %v4525_v44, 2 }
 0x3e9   : > { %v4527_v2 = vmax.f32 %v4525_v44, %v4526_v27 }
 0x3ea   : > { %v7157_v41 = vpop.f32.mrf.mxu2 }
 0x3eb   : > { %v4528_v61 = vrot.slane %v4527_v2, 1  ;;  %v7159_v14 = vpop.f32.mrf.mxu3 }
 0x3ed   : > { %v4529_v34 = vmax.f32 %v4527_v2, %v4528_v61  ;;  %5279 = vmatmul.msk.bf16.gmra.mxu3 %vm3175_vm4, %v3153_v42 }
 0x3ef   : > { %v4617_v13 = vpack.c.bf16 %v4529_v34, %v4529_v34  ;;  %5272 = vmatmul.msk.bf16.gmra.mxu2 %vm3175_vm4, %v3138_v59  ;;  %v7541_v34 = vld [vmem:[#allocation14_spill] sm:$0xff] }
 0x3f0   : > { %v3156_v59 = vrot.slane %v7541_v34, 1 }
 0x3f1   : > { %v4653_v26 = vunpack.c.l.b16 %v4617_v13 }
 0x3f2   : > { %v3829_v11 = vpop.f32.mrf.mxu1  ;;  %v7170_v53 = vpop.f32.mrf.mxu2 }
 0x3f3   : > { %v7155_v8 = vsel %vm4662_vm9, %v4653_v26, %v6908_v47  ;;  %v3830_v55 = vadd.f32 %v7088_v5, %v3829_v11  ;;  %v3140_v47 = vsel %vm3038_vm3, %v3137_v17, %v3139_v10  ;;  %v3141_v10 = vrot.slane %v7539_v0, 1 }
 0x3f5   : > { %v4159_v9 = vadd.f32 %v6949_v23, %v3830_v55 }
 0x3f7   : > { %v4382_v61 = vmax.f32 %v4159_v9, 0.0 }
 0x3fa   : > { %v3831_v35 = vpop.f32.mrf.mxu1  ;;  %v7182_v23 = vpop.f32.mrf.mxu2 }
 0x3fb   : > { %v3832_v19 = vadd.f32 %v7088_v5, %v3831_v35  ;;  %v3142_v35 = vrot.slane %v7535_v38, 1 }
 0x3fd   : > { %5280 = vmatmul.msk.bf16.gmra.mxu3 %vm3175_vm4, %v3155_v45  ;;  %v4161_v40 = vadd.f32 %v6960_v32, %v3832_v19  ;;  %v3157_v19 = vsel %vm3038_vm3, %v3154_v30, %v3156_v59  ;;  %v7542_v59 = vld [vmem:[#allocation10_spill] sm:$0xff] }
 0x3ff   : > { %5273 = vmatmul.msk.bf16.gmra.mxu2 %vm3175_vm4, %v3140_v47  ;;  %v4383_v44 = vmax.f32 %v4161_v40, 0.0 }
 0x400   : > { %v7172_v50 = vpop.f32.mrf.mxu3 }
 0x401   : > { %v4530_v32 = vmax.f32 %v4382_v61, %v4383_v44  ;;  %v3158_v61 = vrot.slane %v6537_v7, 1 }
 0x402   : > { %v3834_v57 = vpop.f32.mrf.mxu1 }
 0x403   : > { %v3835_v27 = vadd.f32 %v7088_v5, %v3834_v57  ;;  %v2991_v52 = vpop.permute.xlu0 %2990 }
 0x404   : > { %v3297_v2 = vsel %vm3175_vm4, %v6946_v31, %v2991_v52 }
 0x405   : > { %v4164_v17 = vadd.f32 %v6978_v12, %v3835_v27  ;;  %3868 = vmatmul.bf16.gmra.mxu1 %v3297_v2  ;;  %v3143_v12 = vsel %vm3038_vm3, %v3141_v10, %v3142_v35 }
 0x407   : > { %v4384_v42 = vmax.f32 %v4164_v17, 0.0  ;;  %v3159_v17 = vrot.slane %v6552_v4, 1 }
 0x408   : > { %v7180_v13 = vpop.f32.mrf.mxu3 }
 0x409   : > { %v4531_v26 = vmax.f32 %v4530_v32, %v4384_v42 }
 0x40a   : > { %v3836_v11 = vpop.f32.mrf.mxu1 }
 0x40b   : > { %v3837_v31 = vadd.f32 %v7088_v5, %v3836_v11  ;;  %v3144_v11 = vrot.slane %v7542_v59, 1  ;;  %v2995_v4 = vpop.permute.xlu2 %2994 }
 0x40d   : > { %5281 = vmatmul.msk.bf16.gmra.mxu3 %vm3175_vm4, %v3157_v19  ;;  %v4166_v45 = vadd.f32 %v6988_v20, %v3837_v31 }
 0x40f   : > { %5274 = vmatmul.msk.bf16.gmra.mxu2 %vm3175_vm4, %v3143_v12  ;;  %v4385_v9 = vmax.f32 %v4166_v45, 0.0 }
 0x410   : > { %v7192_v55 = vpop.f32.mrf.mxu3 }
 0x411   : > { %v4532_v52 = vmax.f32 %v4531_v26, %v4385_v9 }
 0x412   : > { %v3839_v47 = vpop.f32.mrf.mxu1  ;;  %v7194_v40 = vpop.f32.mrf.mxu2 }
 0x413   : > { %v3840_v57 = vadd.f32 %v7088_v5, %v3839_v47  ;;  %v2993_v44 = vpop.permute.xlu1 %2992  ;;  %v3303_v47 = vsel %vm3175_vm4, %v6986_v60, %v2995_v4  ;;  %v7543_v60 = vrot.slane %v7538_v37, 1  ;;  %v3163_v4 = vrot.slane %v6614_v63, 1 }
 0x414   : > { %v3300_v30 = vsel %vm3175_vm4, %v6958_v22, %v2993_v44  ;;  %v3160_v22 = vsel %vm3038_vm3, %v3158_v61, %v3159_v17  ;;  %v3161_v44 = vrot.slane %v6586_v3, 1 }
 0x415   : > { %v4169_v27 = vadd.f32 %v7005_v56, %v3840_v57  ;;  %3873 = vmatmul.bf16.gmra.mxu1 %v3300_v30  ;;  %v3145_v56 = vsel %vm3038_vm3, %v3142_v35, %v3144_v11 }
 0x416   : > { %v3162_v61 = vsel %vm3038_vm3, %v3159_v17, %v3161_v44 }
 0x417   : > { %v4386_v2 = vmax.f32 %v4169_v27, 0.0 }
 0x418   : > { %v7200_v20 = vpop.f32.mrf.mxu3 }
 0x419   : > { %v4533_v32 = vmax.f32 %v4532_v52, %v4386_v2 }
 0x41a   : > { %v3841_v42 = vpop.f32.mrf.mxu1  ;;  %v7204_v34 = vpop.f32.mrf.mxu2 }
 0x41b   : > { %v3842_v10 = vadd.f32 %v7088_v5, %v3841_v42 }
 0x41d   : > { %5282 = vmatmul.msk.bf16.gmra.mxu3 %vm3175_vm4, %v3160_v22  ;;  %v4171_v26 = vadd.f32 %v7015_v49, %v3842_v10 }
 0x41f   : > { %5275 = vmatmul.msk.bf16.gmra.mxu2 %vm3175_vm4, %v3145_v56  ;;  %v4387_v12 = vmax.f32 %v4171_v26, 0.0 }
 0x420   : > { %v7213_v7 = vpop.f32.mrf.mxu3 }
 0x421   : > { %v4534_v35 = vmax.f32 %v4533_v32, %v4387_v12 }
 0x422   : > { %v3844_v31 = vpop.f32.mrf.mxu1  ;;  %v7215_v19 = vpop.f32.mrf.mxu2 }
 0x423   : > { %v3845_v45 = vadd.f32 %v7088_v5, %v3844_v31 }
 0x425   : > { %v4174_v9 = vadd.f32 %v7032_v1, %v3845_v45  ;;  %3878 = vmatmul.bf16.gmra.mxu1 %v3303_v47  ;;  %v3147_v1 = vsel %vm3038_vm3, %v3144_v11, %v7543_v60 }
 0x427   : > { %v4388_v57 = vmax.f32 %v4174_v9, 0.0  ;;  %v3164_v9 = vsel %vm3038_vm3, %v3161_v44, %v3163_v4 }
 0x428   : > { %v7221_v49 = vpop.f32.mrf.mxu3 }
 0x429   : > { %v4535_v30 = vmax.f32 %v4534_v35, %v4388_v57 }
 0x42a   : > { %v3846_v27 = vpop.f32.mrf.mxu1  ;;  %v7224_v52 = vpop.f32.mrf.mxu2 }
 0x42b   : > { %v3847_v2 = vadd.f32 %v7088_v5, %v3846_v27 }
 0x42d   : > { %5283 = vmatmul.msk.bf16.gmra.mxu3 %vm3175_vm4, %v3162_v61  ;;  %v4176_v32 = vadd.f32 %v7042_v33, %v3847_v2 }
 0x42f   : > { %5276 = vmatmul.msk.bf16.gmra.mxu2 %vm3175_vm4, %v3147_v1  ;;  %v4389_v10 = vmax.f32 %v4176_v32, 0.0 }
 0x430   : > { %v7234_v42 = vpop.f32.mrf.mxu3 }
 0x431   : > { %v4536_v11 = vmax.f32 %v4535_v30, %v4389_v10 }
 0x432   : > { %v3849_v3 = vpop.f32.mrf.mxu1  ;;  %v7236_v59 = vpop.f32.mrf.mxu2 }
 0x433   : > { %v3850_v22 = vadd.f32 %v7088_v5, %v3849_v3  ;;  %v2997_v56 = vpop.permute.xlu0 %2996 }
 0x434   : > { %v3306_v17 = vsel %vm3175_vm4, %v7013_v18, %v2997_v56 }
 0x435   : > { %v4179_v37 = vadd.f32 %v7068_v21, %v3850_v22  ;;  %3883 = vmatmul.bf16.gmra.mxu1 %v3306_v17 }
 0x437   : > { %v4390_v26 = vmax.f32 %v4179_v37, 0.0  ;;  %v3001_v37 = vpop.permute.xlu2 %3000 }
 0x438   : > { %v7242_v33 = vpop.f32.mrf.mxu3 }
 0x439   : > { %v4537_v31 = vmax.f32 %v4536_v11, %v4390_v26 }
 0x43a   : > { %v3851_v12 = vpop.f32.mrf.mxu1  ;;  %v7245_v45 = vpop.f32.mrf.mxu2 }
 0x43b   : > { %v3852_v47 = vadd.f32 %v7088_v5, %v3851_v12 }
 0x43d   : > { %5284 = vmatmul.msk.bf16.gmra.mxu3 %vm3175_vm4, %v3164_v9  ;;  %v4181_v18 = vadd.f32 %v7099_v28, %v3852_v47  ;;  %v3165_v28 = vrot.slane %v6688_v25, 1  ;;  %v3312_v47 = vsel %vm3175_vm4, %v7080_v43, %v3001_v37 }
 0x43f   : > { %v4391_v30 = vmax.f32 %v4181_v18, 0.0  ;;  %v3166_v56 = vsel %vm3038_vm3, %v3163_v4, %v3165_v28 }
 0x440   : > { %v7251_v21 = vpop.f32.mrf.mxu3 }
 0x441   : > { %v4538_v44 = vmax.f32 %v4537_v31, %v4391_v30 }
 0x442   : > { %v3854_v35 = vpop.f32.mrf.mxu1  ;;  %v7253_v57 = vpop.f32.mrf.mxu2 }
 0x443   : > { %v3855_v63 = vadd.f32 %v7088_v5, %v3854_v35  ;;  %v2999_v27 = vpop.permute.xlu1 %2998  ;;  %v3167_v35 = vrot.slane %v6725_v46, 1 }
 0x444   : > { %v3309_v2 = vsel %vm3175_vm4, %v7040_v58, %v2999_v27  ;;  %v3925_v58 = vadd.f32 %v7088_v5, %v6924_v6  ;;  %v3927_v6 = vadd.f32 %v7088_v5, %v6933_v39  ;;  %v7544_v39 = vld [vmem:[#allocation20_spill] sm:$0xff] }
 0x445   : > { %v4184_v61 = vadd.f32 %v7122_v29, %v3855_v63  ;;  %3888 = vmatmul.bf16.gmra.mxu1 %v3309_v2 }
 0x447   : > { %v4392_v60 = vmax.f32 %v4184_v61, 0.0 }
 0x448   : > { %v7259_v1 = vpop.f32.mrf.mxu3 }
 0x449   : > { %v4539_v32 = vmax.f32 %v4538_v44, %v4392_v60 }
 0x44a   : > { %v3856_v3 = vpop.f32.mrf.mxu1  ;;  %v7262_v10 = vpop.f32.mrf.mxu2 }
 0x44b   : > { %v3857_v22 = vadd.f32 %v7088_v5, %v3856_v3 }
 0x44d   : > { %5285 = vmatmul.msk.bf16.gmra.mxu3 %vm3175_vm4, %v3166_v56  ;;  %v4186_v29 = vadd.f32 %v7138_v54, %v3857_v22  ;;  %v3003_v56 = vpop.permute.xlu0 %3002 }
 0x44f   : > { %v4393_v31 = vmax.f32 %v4186_v29, 0.0 }
 0x450   : > { %v4253_v17 = vpop.f32.mrf.mxu3 }
 0x451   : > { %v4254_v11 = vadd.f32 %v4253_v17, %v3925_v58  ;;  %v4540_v9 = vmax.f32 %v4539_v32, %v4393_v31  ;;  %v3930_v32 = vadd.f32 %v7088_v5, %v7544_v39 }
 0x452   : > { %v3859_v26 = vpop.f32.mrf.mxu1  ;;  %v7270_v25 = vpop.f32.mrf.mxu2 }
 0x453   : > { %v3860_v12 = vadd.f32 %v7088_v5, %v3859_v26  ;;  %v4420_v61 = vmax.f32 %v4254_v11, 0.0 }
 0x455   : > { %v4189_v4 = vadd.f32 %v7146_v15, %v3860_v12  ;;  %3893 = vmatmul.bf16.gmra.mxu1 %v3312_v47  ;;  %v3168_v15 = vsel %vm3038_vm3, %v3165_v28, %v3167_v35  ;;  %v3315_v28 = vsel %vm3175_vm4, %v7532_v62, %v3003_v56 }
 0x457   : > { %v4394_v54 = vmax.f32 %v4189_v4, 0.0 }
 0x458   : > { %v4255_v18 = vpop.f32.mrf.mxu3 }
 0x459   : > { %v4541_v30 = vmax.f32 %v4540_v9, %v4394_v54  ;;  %v4256_v63 = vadd.f32 %v4255_v18, %v3927_v6  ;;  %v7545_v6 = vld [vmem:[#allocation15_spill] sm:$0xff]  ;;  %v7546_v54 = vld [vmem:[#allocation21_spill] sm:$0xff] }
 0x45a   : > { %v3861_v27 = vpop.f32.mrf.mxu1  ;;  %v7279_v2 = vpop.f32.mrf.mxu2  ;;  %v3169_v9 = vrot.slane %v7545_v6, 1  ;;  %v3932_v18 = vadd.f32 %v7088_v5, %v7546_v54 }
 0x45b   : > { %v4421_v44 = vmax.f32 %v4256_v63, 0.0  ;;  %v3862_v43 = vadd.f32 %v7088_v5, %v3861_v27 }
 0x45c   : > { %v3170_v62 = vsel %vm3038_vm3, %v3167_v35, %v3169_v9 }
 0x45d   : > { %v4575_v60 = vmax.f32 %v4421_v44, %v4420_v61  ;;  %v4191_v3 = vadd.f32 %v7157_v41, %v3862_v43  ;;  %5286 = vmatmul.msk.bf16.gmra.mxu3 %vm3175_vm4, %v3168_v15  ;;  %v5417_v41 = vld [vmem:[%s7488_s5 + $0x38] sm:$0xff] }
 0x45e   : > { %4722 = vmatpush.bf16.msrb.mxu3 %v5417_v41  ;;  %v7547_v43 = vld [vmem:[#allocation22_spill] sm:$0xff] }
 0x45f   : > { %v4395_v46 = vmax.f32 %v4191_v3, 0.0  ;;  %v3935_v15 = vadd.f32 %v7088_v5, %v7547_v43 }
 0x460   : > { %v4258_v22 = vpop.f32.mrf.mxu3 }
 0x461   : > { %v4542_v58 = vmax.f32 %v4541_v30, %v4395_v46  ;;  %v4259_v29 = vadd.f32 %v4258_v22, %v3930_v32  ;;  %v3005_v32 = vpop.permute.xlu1 %3004 }
 0x462   : > { %v3864_v17 = vpop.f32.mrf.mxu1  ;;  %v7287_v37 = vpop.f32.mrf.mxu2  ;;  %v3318_v35 = vsel %vm3175_vm4, %v7534_v16, %v3005_v32 }
 0x463   : > { %v4422_v11 = vmax.f32 %v4259_v29, 0.0  ;;  %v3865_v26 = vadd.f32 %v7088_v5, %v3864_v17 }
 0x465   : > { %v4576_v31 = vmax.f32 %v4575_v60, %v4422_v11  ;;  %v4194_v12 = vadd.f32 %v7170_v53, %v3865_v26  ;;  %3898 = vmatmul.bf16.gmra.mxu1 %v3315_v28  ;;  %v7548_v26 = vld [vmem:[#allocation23_spill] sm:$0xff] }
 0x466   : > { %v3937_v41 = vadd.f32 %v7088_v5, %v7548_v26 }
 0x467   : > { %v4396_v47 = vmax.f32 %v4194_v12, 0.0 }
 0x468   : > { %v4260_v4 = vpop.f32.mrf.mxu3 }
 0x469   : > { %v4543_v30 = vmax.f32 %v4542_v58, %v4396_v47  ;;  %v4261_v61 = vadd.f32 %v4260_v4, %v3932_v18  ;;  %v7549_v47 = vld [vmem:[#allocation16_spill] sm:$0xff] }
 0x46a   : > { %v3866_v63 = vpop.f32.mrf.mxu1  ;;  %v7299_v27 = vpop.f32.mrf.mxu2  ;;  %v3171_v4 = vrot.slane %v7549_v47, 1 }
 0x46b   : > { %v3867_v44 = vadd.f32 %v7088_v5, %v3866_v63  ;;  %v4423_v60 = vmax.f32 %v4261_v61, 0.0 }
 0x46c   : > { %v3172_v63 = vsel %vm3038_vm3, %v3169_v9, %v3171_v4 }
 0x46d   : > { %v4196_v53 = vadd.f32 %v7182_v23, %v3867_v44  ;;  %5287 = vmatmul.msk.bf16.gmra.mxu3 %vm3175_vm4, %v3170_v62  ;;  %v4577_v58 = vmax.f32 %v4576_v31, %v4423_v60  ;;  %v5416_v44 = vld [vmem:[%s7488_s5 + $0x30] sm:$0xff]  ;;  %v7550_v62 = vld [vmem:[#allocation24_spill] sm:$0xff]  ;;  %v3007_v60 = vpop.permute.xlu2 %3006 }
 0x46e   : > { %4723 = vmatpush.bf16.msrb.mxu3 %v5416_v44 }
 0x46f   : > { %v4397_v3 = vmax.f32 %v4196_v53, 0.0  ;;  %v3940_v53 = vadd.f32 %v7088_v5, %v7550_v62 }
 0x470   : > { %v4263_v39 = vpop.f32.mrf.mxu3 }
 0x471   : > { %v4544_v46 = vmax.f32 %v4543_v30, %v4397_v3  ;;  %v4264_v22 = vadd.f32 %v4263_v39, %v3935_v15 }
 0x472   : > { %v7307_v56 = vpop.f32.mrf.mxu2 }
 0x473   : > { %v4545_v29 = vrot.slane %v4544_v46, 4  ;;  %v4424_v17 = vmax.f32 %v4264_v22, 0.0 }
 0x475   : > { %v4546_v23 = vmax.f32 %v4544_v46, %v4545_v29  ;;  %v4578_v11 = vmax.f32 %v4577_v58, %v4424_v17  ;;  %3903 = vmatmul.bf16.gmra.mxu1 %v3318_v35  ;;  %v3321_v58 = vsel %vm3175_vm4, %v7539_v0, %v3007_v60  ;;  %v7551_v17 = vld [vmem:[#allocation25_spill] sm:$0xff] }
 0x476   : > { %v3942_v35 = vadd.f32 %v7088_v5, %v7551_v17 }
 0x477   : > { %v4547_v28 = vrot.slane %v4546_v23, 2 }
 0x478   : > { %v4265_v12 = vpop.f32.mrf.mxu3 }
 0x479   : > { %v4548_v6 = vmax.f32 %v4546_v23, %v4547_v28  ;;  %v4266_v54 = vadd.f32 %v4265_v12, %v3937_v41 }
 0x47a   : > { %v7314_v18 = vpop.f32.mrf.mxu2 }
 0x47b   : > { %v4549_v31 = vrot.slane %v4548_v6, 1  ;;  %v4425_v30 = vmax.f32 %v4266_v54, 0.0 }
 0x47d   : > { %v4550_v61 = vmax.f32 %v4548_v6, %v4549_v31  ;;  %v4579_v16 = vmax.f32 %v4578_v11, %v4425_v30  ;;  %5288 = vmatmul.msk.bf16.gmra.mxu3 %vm3175_vm4, %v3172_v63  ;;  %v7552_v11 = vld [vmem:[#allocation17_spill] sm:$0xff]  ;;  %v7553_v63 = vld [vmem:[#allocation26_spill] sm:$0xff] }
 0x47e   : > { %v3173_v26 = vrot.slane %v7552_v11, 1  ;;  %v5415_v11 = vld [vmem:[%s7488_s5 + $0x28] sm:$0xff] }
 0x47f   : > { %v4618_v43 = vpack.c.bf16 %v4550_v61, %v4550_v61  ;;  %v3945_v61 = vadd.f32 %v7088_v5, %v7553_v63  ;;  %4724 = vmatpush.bf16.msrb.mxu3 %v5415_v11  ;;  %v5414_v11 = vld [vmem:[%s7488_s5 + $0x20] sm:$0xff] }
 0x480   : > { %v4268_v15 = vpop.f32.mrf.mxu3  ;;  %v3174_v0 = vsel %vm3038_vm3, %v3171_v4, %v3173_v26 }
 0x481   : > { %v4654_v3 = vunpack.c.l.b16 %v4618_v43  ;;  %v4269_v39 = vadd.f32 %v4268_v15, %v3940_v53  ;;  %v3009_v53 = vpop.permute.xlu0 %3008 }
 0x482   : > { %v3869_v32 = vpop.f32.mrf.mxu1  ;;  %v7323_v9 = vpop.f32.mrf.mxu2 }
 0x483   : > { %v7326_v46 = vsel %vm4664_vm10, %v4654_v3, %v7155_v8  ;;  %v4426_v22 = vmax.f32 %v4269_v39, 0.0  ;;  %v3870_v23 = vadd.f32 %v7088_v5, %v3869_v32  ;;  %4725 = vmatpush.bf16.msrb.mxu3 %v5414_v11 }
 0x485   : > { %v4580_v29 = vmax.f32 %v4579_v16, %v4426_v22  ;;  %3908 = vmatmul.bf16.gmra.mxu1 %v3321_v58  ;;  %v4199_v8 = vadd.f32 %v7194_v40, %v3870_v23  ;;  %v7554_v22 = vld [vmem:[#allocation6_spill] sm:$0xff] }
 0x486   : > { %v3947_v58 = vadd.f32 %v7088_v5, %v7554_v22 }
 0x487   : > { %v4398_v16 = vmax.f32 %v4199_v8, 0.0  ;;  %v7555_v8 = vld [vmem:[#allocation5_spill] sm:$0xff] }
 0x488   : > { %v4270_v41 = vpop.f32.mrf.mxu3 }
 0x489   : > { %v4271_v28 = vadd.f32 %v4270_v41, %v3942_v35 }
 0x48a   : > { %v3871_v12 = vpop.f32.mrf.mxu1  ;;  %v7334_v47 = vpop.f32.mrf.mxu2 }
 0x48b   : > { %v4427_v6 = vmax.f32 %v4271_v28, 0.0  ;;  %v3872_v54 = vadd.f32 %v7088_v5, %v3871_v12 }
 0x48d   : > { %v4581_v31 = vmax.f32 %v4580_v29, %v4427_v6  ;;  %v4201_v30 = vadd.f32 %v7204_v34, %v3872_v54  ;;  %5289 = vmatmul.msk.bf16.gmra.mxu3 %vm3175_vm4, %v3174_v0  ;;  %v3324_v34 = vsel %vm3175_vm4, %v7535_v38, %v3009_v53  ;;  %v3950_v6 = vadd.f32 %v7088_v5, %v7555_v8 }
 0x48f   : > { %v4399_v44 = vmax.f32 %v4201_v30, 0.0 }
 0x490   : > { %v4273_v62 = vpop.f32.mrf.mxu3 }
 0x491   : > { %v4551_v43 = vmax.f32 %v4398_v16, %v4399_v44  ;;  %v4274_v15 = vadd.f32 %v4273_v62, %v3945_v61  ;;  %v3952_v62 = vadd.f32 %v7088_v5, %v7106_v51  ;;  %v7556_v51 = vld [vmem:[#allocation18_spill] sm:$0xff] }
 0x492   : > { %v3874_v40 = vpop.f32.mrf.mxu1  ;;  %v7343_v60 = vpop.f32.mrf.mxu2 }
 0x493   : > { %v4428_v3 = vmax.f32 %v4274_v15, 0.0  ;;  %v3875_v4 = vadd.f32 %v7088_v5, %v3874_v40 }
 0x495   : > { %v4582_v39 = vmax.f32 %v4581_v31, %v4428_v3  ;;  %v4204_v32 = vadd.f32 %v7215_v19, %v3875_v4  ;;  %3913 = vmatmul.bf16.gmra.mxu1 %v3324_v34 }
 0x497   : > { %v4400_v29 = vmax.f32 %v4204_v32, 0.0 }
 0x498   : > { %v4275_v17 = vpop.f32.mrf.mxu3 }
 0x499   : > { %v4552_v35 = vmax.f32 %v4551_v43, %v4400_v29  ;;  %v4276_v23 = vadd.f32 %v4275_v17, %v3947_v58  ;;  %v3920_v17 = vadd.f32 %v7088_v5, %v7556_v51 }
 0x49a   : > { %v3876_v26 = vpop.f32.mrf.mxu1  ;;  %v7354_v41 = vpop.f32.mrf.mxu2 }
 0x49b   : > { %v4429_v28 = vmax.f32 %v4276_v23, 0.0  ;;  %v3877_v38 = vadd.f32 %v7088_v5, %v3876_v26 }
 0x49d   : > { %v4583_v19 = vmax.f32 %v4582_v39, %v4429_v28  ;;  %v4206_v12 = vadd.f32 %v7224_v52, %v3877_v38 }
 0x49f   : > { %v4401_v54 = vmax.f32 %v4206_v12, 0.0 }
 0x4a0   : > { %v4278_v0 = vpop.f32.mrf.mxu3 }
 0x4a1   : > { %v4553_v31 = vmax.f32 %v4552_v35, %v4401_v54  ;;  %v4279_v30 = vadd.f32 %v4278_v0, %v3950_v6  ;;  %v3957_v54 = vadd.f32 %v7088_v5, %v7140_v48 }
 0x4a2   : > { %v3879_v63 = vpop.f32.mrf.mxu1  ;;  %v7360_v61 = vpop.f32.mrf.mxu2 }
 0x4a3   : > { %v3880_v16 = vadd.f32 %v7088_v5, %v3879_v63  ;;  %v4430_v4 = vmax.f32 %v4279_v30, 0.0 }
 0x4a5   : > { %v4209_v44 = vadd.f32 %v7236_v59, %v3880_v16  ;;  %v3955_v59 = vadd.f32 %v7088_v5, %v7127_v36 }
 0x4a7   : > { %v4402_v53 = vmax.f32 %v4209_v44, 0.0 }
 0x4a8   : > { %v4280_v43 = vpop.f32.mrf.mxu3 }
 0x4a9   : > { %v4554_v52 = vmax.f32 %v4553_v31, %v4402_v53  ;;  %v4281_v15 = vadd.f32 %v4280_v43, %v3952_v62 }
 0x4aa   : > { %v3881_v40 = vpop.f32.mrf.mxu1  ;;  %v7366_v3 = vpop.f32.mrf.mxu2 }
 0x4ab   : > { %v4431_v34 = vmax.f32 %v4281_v15, 0.0  ;;  %v3882_v39 = vadd.f32 %v7088_v5, %v3881_v40 }
 0x4ad   : > { %v4593_v32 = vmax.f32 %v4430_v4, %v4431_v34  ;;  %v4211_v22 = vadd.f32 %v7245_v45, %v3882_v39 }
 0x4af   : > { %v4403_v58 = vmax.f32 %v4211_v22, 0.0 }
 0x4b0   : > { %v4283_v29 = vpop.f32.mrf.mxu3 }
 0x4b1   : > { %v4555_v35 = vmax.f32 %v4554_v52, %v4403_v58  ;;  %v4284_v23 = vadd.f32 %v4283_v29, %v3955_v59  ;;  %v3962_v29 = vadd.f32 %v7088_v5, %v7159_v14 }
 0x4b2   : > { %v3884_v26 = vpop.f32.mrf.mxu1  ;;  %v4248_v28 = vpop.f32.mrf.mxu2 }
 0x4b3   : > { %v4432_v38 = vmax.f32 %v4284_v23, 0.0  ;;  %v3885_v12 = vadd.f32 %v7088_v5, %v3884_v26  ;;  %v4249_v45 = vadd.f32 %v4248_v28, %v3920_v17 }
 0x4b5   : > { %v4594_v8 = vmax.f32 %v4593_v32, %v4432_v38  ;;  %v4214_v36 = vadd.f32 %v7253_v57, %v3885_v12  ;;  %v4418_v6 = vmax.f32 %v4249_v45, 0.0  ;;  %v3960_v57 = vadd.f32 %v7088_v5, %v7150_v24  ;;  %v5413_v24 = vld [vmem:[%s7488_s5 + $0x18] sm:$0xff] }
 0x4b6   : > { %4726 = vmatpush.bf16.msrb.mxu3 %v5413_v24 }
 0x4b7   : > { %v4404_v0 = vmax.f32 %v4214_v36, 0.0  ;;  %v7381_v31 = vmax.f32 %v4583_v19, %v4418_v6  ;;  %v3967_v6 = vadd.f32 %v7088_v5, %v7180_v13 }
 0x4b8   : > { %v4285_v30 = vpop.f32.mrf.mxu3 }
 0x4b9   : > { %v4556_v63 = vmax.f32 %v4555_v35, %v4404_v0  ;;  %v4286_v16 = vadd.f32 %v4285_v30, %v3957_v54 }
 0x4ba   : > { %v3886_v44 = vpop.f32.mrf.mxu1 }
 0x4bb   : > { %v4433_v62 = vmax.f32 %v4286_v16, 0.0  ;;  %v3887_v53 = vadd.f32 %v7088_v5, %v3886_v44 }
 0x4bd   : > { %v4595_v43 = vmax.f32 %v4594_v8, %v4433_v62  ;;  %v4216_v52 = vadd.f32 %v7262_v10, %v3887_v53  ;;  %v3970_v62 = vadd.f32 %v7088_v5, %v7192_v55 }
 0x4bf   : > { %v4405_v15 = vmax.f32 %v4216_v52, 0.0 }
 0x4c0   : > { %v4288_v40 = vpop.f32.mrf.mxu3 }
 0x4c1   : > { %v4557_v4 = vmax.f32 %v4556_v63, %v4405_v15  ;;  %v4289_v48 = vadd.f32 %v4288_v40, %v3960_v57 }
 0x4c2   : > { %v3889_v34 = vpop.f32.mrf.mxu1 }
 0x4c3   : > { %v4434_v19 = vmax.f32 %v4289_v48, 0.0  ;;  %v3890_v39 = vadd.f32 %v7088_v5, %v3889_v34 }
 0x4c5   : > { %v4596_v32 = vmax.f32 %v4595_v43, %v4434_v19  ;;  %v4219_v22 = vadd.f32 %v7270_v25, %v3890_v39  ;;  %v3965_v25 = vadd.f32 %v7088_v5, %v7172_v50 }
 0x4c7   : > { %v4406_v59 = vmax.f32 %v4219_v22, 0.0 }
 0x4c8   : > { %v4290_v58 = vpop.f32.mrf.mxu3 }
 0x4c9   : > { %v4558_v10 = vmax.f32 %v4557_v4, %v4406_v59  ;;  %v4291_v17 = vadd.f32 %v4290_v58, %v3962_v29 }
 0x4ca   : > { %v3891_v51 = vpop.f32.mrf.mxu1 }
 0x4cb   : > { %v3892_v35 = vadd.f32 %v7088_v5, %v3891_v51  ;;  %v4435_v11 = vmax.f32 %v4291_v17, 0.0 }
 0x4cd   : > { %v4221_v23 = vadd.f32 %v7279_v2, %v3892_v35  ;;  %v4597_v45 = vmax.f32 %v4596_v32, %v4435_v11 }
 0x4cf   : > { %v4407_v26 = vmax.f32 %v4221_v23, 0.0 }
 0x4d0   : > { %v4293_v28 = vpop.f32.mrf.mxu3 }
 0x4d1   : > { %v4559_v38 = vmax.f32 %v4558_v10, %v4407_v26  ;;  %v4294_v14 = vadd.f32 %v4293_v28, %v3965_v25  ;;  %v3975_v10 = vadd.f32 %v7088_v5, %v7213_v7  ;;  %v3977_v26 = vadd.f32 %v7088_v5, %v7221_v49 }
 0x4d2   : > { %v3894_v12 = vpop.f32.mrf.mxu1 }
 0x4d3   : > { %v4436_v8 = vmax.f32 %v4294_v14, 0.0  ;;  %v3895_v0 = vadd.f32 %v7088_v5, %v3894_v12 }
 0x4d5   : > { %v4598_v36 = vmax.f32 %v4597_v45, %v4436_v8  ;;  %v4224_v16 = vadd.f32 %v7287_v37, %v3895_v0  ;;  %v3972_v37 = vadd.f32 %v7088_v5, %v7200_v20  ;;  %v5412_v20 = vld [vmem:[%s7488_s5 + $0x10] sm:$0xff] }
 0x4d6   : > { %4727 = vmatpush.bf16.msrb.mxu3 %v5412_v20 }
 0x4d7   : > { %v4408_v52 = vmax.f32 %v4224_v16, 0.0 }
 0x4d8   : > { %v4295_v54 = vpop.f32.mrf.mxu3 }
 0x4d9   : > { %v4296_v30 = vadd.f32 %v4295_v54, %v3967_v6  ;;  %v4560_v48 = vmax.f32 %v4559_v38, %v4408_v52 }
 0x4da   : > { %v3896_v2 = vpop.f32.mrf.mxu1 }
 0x4db   : > { %v4437_v63 = vmax.f32 %v4296_v30, 0.0  ;;  %v3897_v50 = vadd.f32 %v7088_v5, %v3896_v2 }
 0x4dd   : > { %v4599_v44 = vmax.f32 %v4598_v36, %v4437_v63  ;;  %v4226_v53 = vadd.f32 %v7299_v27, %v3897_v50 }
 0x4df   : > { %v4409_v15 = vmax.f32 %v4226_v53, 0.0 }
 0x4e0   : > { %v4298_v43 = vpop.f32.mrf.mxu3 }
 0x4e1   : > { %v4299_v57 = vadd.f32 %v4298_v43, %v3970_v62  ;;  %v4561_v39 = vmax.f32 %v4560_v48, %v4409_v15  ;;  %v3982_v43 = vadd.f32 %v7088_v5, %v7242_v33  ;;  %v5410_v33 = vld [vmem:[%s7488_s5] sm:$0xff] }
 0x4e2   : > { %v3899_v13 = vpop.f32.mrf.mxu1 }
 0x4e3   : > { %v4438_v40 = vmax.f32 %v4299_v57, 0.0  ;;  %v3900_v4 = vadd.f32 %v7088_v5, %v3899_v13 }
 0x4e5   : > { %v4600_v34 = vmax.f32 %v4599_v44, %v4438_v40  ;;  %v4229_v19 = vadd.f32 %v7307_v56, %v3900_v4 }
 0x4e7   : > { %v4410_v32 = vmax.f32 %v4229_v19, 0.0  ;;  %v3985_v19 = vadd.f32 %v7088_v5, %v7251_v21  ;;  %v5481_v21 = vld [vmem:[%s7487_s4] ss:$0 sm:$0xff] }
 0x4e8   : > { %v4300_v55 = vpop.f32.mrf.mxu3 }
 0x4e9   : > { %v4562_v22 = vmax.f32 %v4561_v39, %v4410_v32  ;;  %v4301_v27 = vadd.f32 %v4300_v55, %v3972_v37 }
 0x4ea   : > { %v3901_v59 = vpop.f32.mrf.mxu1 }
 0x4eb   : > { %v4439_v58 = vmax.f32 %v4301_v27, 0.0  ;;  %v3902_v51 = vadd.f32 %v7088_v5, %v3901_v59 }
 0x4ed   : > { %v4601_v29 = vmax.f32 %v4600_v34, %v4439_v58  ;;  %v4231_v25 = vadd.f32 %v7314_v18, %v3902_v51  ;;  %v3980_v18 = vadd.f32 %v7088_v5, %v7234_v42  ;;  %v5411_v34 = vld [vmem:[%s7488_s5 + $0x8] sm:$0xff] }
 0x4ee   : > { %4728 = vmatpush.bf16.msrb.mxu3 %v5411_v34 }
 0x4ef   : > { %v4411_v38 = vmax.f32 %v4231_v25, 0.0 }
 0x4f0   : > { %v4303_v24 = vpop.f32.mrf.mxu3 }
 0x4f1   : > { %v4304_v17 = vadd.f32 %v4303_v24, %v3975_v10  ;;  %v4563_v6 = vmax.f32 %v4562_v22, %v4411_v38 }
 0x4f2   : > { %v3904_v35 = vpop.f32.mrf.mxu1  ;;  %4729 = vmatpush.bf16.msrb.mxu3 %v5410_v33 }
 0x4f3   : > { %v4440_v56 = vmax.f32 %v4304_v17, 0.0  ;;  %v3905_v23 = vadd.f32 %v7088_v5, %v3904_v35  ;;  %v4250_v17 = vpop.f32.mrf.mxu2  ;;  %v7557_v35 = vld [vmem:[#allocation19_spill] sm:$0xff] }
 0x4f5   : > { %v4602_v11 = vmax.f32 %v4601_v29, %v4440_v56  ;;  %v4234_v7 = vadd.f32 %v7323_v9, %v3905_v23  ;;  %v3922_v56 = vadd.f32 %v5481_v21, %v7557_v35  ;;  %v3987_v23 = vadd.f32 %v5481_v21, %v7259_v1 }
 0x4f7   : > { %v4412_v45 = vmax.f32 %v4234_v7, 0.0  ;;  %v4251_v25 = vadd.f32 %v4250_v17, %v3922_v56 }
 0x4f8   : > { %v4305_v28 = vpop.f32.mrf.mxu3 }
 0x4f9   : > { %v4306_v14 = vadd.f32 %v4305_v28, %v3977_v26  ;;  %v4564_v30 = vmax.f32 %v4563_v6, %v4412_v45 }
 0x4fa   : > { %v3906_v12 = vpop.f32.mrf.mxu1 }
 0x4fb   : > { %v4441_v8 = vmax.f32 %v4306_v14, 0.0  ;;  %v3907_v36 = vadd.f32 %v7088_v5, %v3906_v12 }
 0x4fd   : > { %v4603_v54 = vmax.f32 %v4602_v11, %v4441_v8  ;;  %v4236_v0 = vadd.f32 %v7334_v47, %v3907_v36 }
 0x4ff   : > { %v4413_v2 = vmax.f32 %v4236_v0, 0.0 }
 0x500   : > { %v4308_v49 = vpop.f32.mrf.mxu3 }
 0x501   : > { %v4565_v63 = vmax.f32 %v4564_v30, %v4413_v2  ;;  %v4309_v9 = vadd.f32 %v4308_v49, %v3980_v18 }
 0x502   : > { %v3909_v50 = vpop.f32.mrf.mxu1 }
 0x503   : > { %v4566_v16 = vrot.slane %v4565_v63, 4  ;;  %v4442_v44 = vmax.f32 %v4309_v9, 0.0  ;;  %v3910_v58 = vadd.f32 %v7088_v5, %v3909_v50 }
 0x505   : > { %v4567_v62 = vmax.f32 %v4565_v63, %v4566_v16  ;;  %v4604_v53 = vmax.f32 %v4603_v54, %v4442_v44  ;;  %v4239_v20 = vadd.f32 %v7343_v60, %v3910_v58 }
 0x507   : > { %v4568_v52 = vrot.slane %v4567_v62, 2  ;;  %v4414_v28 = vmax.f32 %v4239_v20, 0.0 }
 0x508   : > { %v4310_v57 = vpop.f32.mrf.mxu3 }
 0x509   : > { %v4569_v13 = vmax.f32 %v4567_v62, %v4568_v52  ;;  %v4311_v47 = vadd.f32 %v4310_v57, %v3982_v43 }
 0x50a   : > { %v3911_v15 = vpop.f32.mrf.mxu1 }
 0x50b   : > { %v4570_v40 = vrot.slane %v4569_v13, 1  ;;  %v4443_v42 = vmax.f32 %v4311_v47, 0.0  ;;  %v3912_v55 = vadd.f32 %v7088_v5, %v3911_v15  ;;  %v5474_v15 = vld [vmem:[%s7489_s6] ss:$0 sm:$0xff] }
 0x50d   : > { %v4571_v4 = vmax.f32 %v4569_v13, %v4570_v40  ;;  %v4605_v48 = vmax.f32 %v4604_v53, %v4443_v42  ;;  %v4241_v24 = vadd.f32 %v7354_v41, %v3912_v55  ;;  %v4419_v41 = vmax.f32 %v4251_v25, 0.0 }
 0x50f   : > { %v4619_v37 = vpack.c.bf16 %v4571_v4, %v4571_v4  ;;  %v4415_v11 = vmax.f32 %v4241_v24, 0.0  ;;  %v4585_v60 = vmax.f32 %v7381_v31, %v4419_v41 }
 0x510   : > { %v4313_v39 = vpop.f32.mrf.mxu3 }
 0x511   : > { %v4655_v32 = vunpack.c.l.b16 %v4619_v37  ;;  %v4314_v22 = vadd.f32 %v4313_v39, %v3985_v19  ;;  %v4572_v45 = vmax.f32 %v4414_v28, %v4415_v11 }
 0x512   : > { %v3914_v27 = vpop.f32.mrf.mxu1 }
 0x513   : > { %v4667_v59 = vsel %vm4666_vm11, %v4655_v32, %v7326_v46  ;;  %v4444_v29 = vmax.f32 %v4314_v22, 0.0  ;;  %v3915_v10 = vadd.f32 %v5481_v21, %v3914_v27 }
 0x515   : > { %v4606_v51 = vmax.f32 %v4605_v48, %v4444_v29  ;;  %v4244_v46 = vadd.f32 %v7360_v61, %v3915_v10 }
 0x517   : > { %v4416_v38 = vmax.f32 %v4244_v46, 0.0 }
 0x518   : > { %v4315_v5 = vpop.f32.mrf.mxu3 }
 0x519   : > { %v4316_v26 = vadd.f32 %v4315_v5, %v3987_v23  ;;  %v4573_v6 = vmax.f32 %v4572_v45, %v4416_v38 }
 0x51a   : > { %v3916_v7 = vpop.f32.mrf.mxu1 }
 0x51b   : > { %v4445_v14 = vmax.f32 %v4316_v26, 0.0  ;;  %v3917_v12 = vadd.f32 %v5481_v21, %v3916_v7 }
 0x51d   : > { %v4607_v8 = vmax.f32 %v4606_v51, %v4445_v14  ;;  %v4246_v36 = vadd.f32 %v7366_v3, %v3917_v12 }
 0x51f   : > { %v4608_v1 = vrot.slane %v4607_v8, 4  ;;  %v4417_v54 = vmax.f32 %v4246_v36, 0.0 }
 0x521   : > { %v4609_v61 = vmax.f32 %v4607_v8, %v4608_v1  ;;  %v4574_v0 = vmax.f32 %v4573_v6, %v4417_v54 }
 0x523   : > { %v4610_v18 = vrot.slane %v4609_v61, 2  ;;  %v4586_v30 = vmax.f32 %v4585_v60, %v4574_v0 }
 0x525   : > { %v4611_v2 = vmax.f32 %v4609_v61, %v4610_v18  ;;  %v4587_v49 = vrot.slane %v4586_v30, 4 }
 0x527   : > { %v4588_v63 = vmax.f32 %v4586_v30, %v4587_v49  ;;  %v4612_v9 = vrot.slane %v4611_v2, 1 }
 0x529   : > { %v4589_v50 = vrot.slane %v4588_v63, 2  ;;  %v4613_v44 = vmax.f32 %v4611_v2, %v4612_v9 }
 0x52b   : > { %v4590_v16 = vmax.f32 %v4588_v63, %v4589_v50  ;;  %v4621_v53 = vpack.c.bf16 %v4613_v44, %v4613_v44 }
 0x52d   : > { %v4591_v62 = vrot.slane %v4590_v16, 1  ;;  %v4657_v31 = vunpack.c.l.b16 %v4621_v53 }
 0x52f   : > { %v4592_v3 = vmax.f32 %v4590_v16, %v4591_v62 }
 0x531   : > { %v4620_v43 = vpack.c.bf16 %v4592_v3, %v4592_v3 }
 0x533   : > { %v4656_v52 = vunpack.c.l.b16 %v4620_v43 }
 0x535   : > { %v4669_v57 = vsel %vm4668_vm12, %v4656_v52, %v4667_v59 }
 0x536   : > { %v4671_v13 = vsel %vm4670_vm13, %v4657_v31, %v4669_v57 }
 0x537   : > { %v4672_v47 = vpack.c.b16 %v4671_v13, %v4671_v13 }
 0x539   : > { %4730 = vmatmul.bf16.vlgmr.msrb.gmra.mxu3 %v4672_v47 }
 0x5bc   : > { %v4731_v40 = vpop.f32.mrf.mxu3 }
 0x5bd   : > { %v4732_v42 = vadd.f32 %v5474_v15, %v4731_v40 }
 0x5bf   : > { %4735 = vst [vmem:[%s274_s22] sm:$0xff] %v4732_v42 }
 0x5c0   : > { %5509 = shalt.err (!%p5506_p3)
}
 0x5c1   : > { %5432 = dma.vmem_to_hbm [thread:$0]  (%p5622_p5), %s4750_s20, 128, %s4752_s23, %s4737_s17  }
 0x5c4   : > { %v4733_v4 = vpop.f32.mrf.mxu3 }
 0x5c5 PF: > { %p5438_p4 = scmp.ge.s32.totalorder %s5544_s27, 2  ;;  %s4763_s9 = sand.u32 1, %s5532_s24  }
 0x5c6   : > { %s4764_s18 = scalar_lea.sflag [#allocation3], %s4763_s9 }
 0x5c7   : > { %p5435_p7 = pnand %p5438_p4, %p5626_p6 }
 0x5c9   : > { %p5436_p8 = pneg %p5435_p7 }
 0x5cb   : > { %5527 = dma.done.wait (%p5436_p8), %s4764_s18, 128  }
 0x5cc   : > { %5529 = vsyncadd (%p5436_p8), %s4764_s18, 4294967168  ;;  %p17_p9 = scmp.ge.s32.totalorder %s5610_s30, 4   ;;  %s7558_s24 = smov %s5536_s25 }
 0x5cd   : > { %s7559_s25 = smov %s5540_s26  ;;  %s7560_s26 = smov %s5620_s10 }
 0x5ce   : > { %s7561_s27 = smov %s5610_s30  ;;  %19 = sbr.rel (!%p17_p9) target bundleno = 3 (0x3), region = 83 }
 0x5d3   :  { %4770 = vsyncpa [#allocation3], 1 }
 0x5d4   :  { %4772 = vsyncpa [#allocation3 + $0x1], 1 }

</bundles_post_ra>
